<compile_context>
chip_gen: v6e
topology: v6e:2x2x1
jax: 0.10.0
libtpu: 0.0.40
codegen_flags: <defaults>
</compile_context>

<pallas_src>
import functools

import numpy as np
import jax
import jax.numpy as jnp
from jax.experimental import pallas as pl
from jax.experimental.pallas import tpu as pltpu

# dtype fed to the MXU; accumulation is always f32 via preferred_element_type.
MXU_DTYPE = jnp.bfloat16
_LN_EPS = 1e-5


# -----------------------------------------------------------------------------
# Small helpers (tile selection, compiler params, in-kernel math)
# -----------------------------------------------------------------------------
def _round_up(x, m):
    return ((x + m - 1) // m) * m


def _row_tile(m, target=256):
    """Multiple-of-8 row tile (cdiv grid, masked tail).  Capped at `target`
    (v7x 64 MiB VMEM) and split so that we get >= 2 grid steps (megacore)."""
    if m <= 8:
        return m
    t = min(_round_up(m, 8), target)
    if t >= m:                               # would give a single grid step
        t = _round_up((m + 1) // 2, 8)       # split work across both TCs
    return t


def _pick_group(nW, B_, N, want_rows):
    """Window-group size GW.  Must divide nW (mask alignment) when shifted,
    else B_; prefers GW*N a multiple of 8 (clean 2D row slab) and >= 2 grid
    steps (v7x megacore); GW*N ~ want_rows to fill the MXU."""
    base = nW if nW > 1 else B_
    cands = [d for d in range(1, base + 1)
             if base % d == 0 and d * N <= max(N, want_rows)]

    def aligned(d):
        return (d * N) % 8 == 0 or d * N == B_ * N

    best = None
    for d in cands:                          # prefer aligned + >=2 grid steps
        if aligned(d) and (B_ // d) >= 2:
            best = d
    if best is None:
        for d in cands:                      # else any aligned group
            if aligned(d):
                best = d
    if best is None:
        # TODO(synk): N*GW not 8-aligned (e.g. N=49 with tiny nW); pad N.
        best = max(cands)
    return best


def _compiler_params(block_bytes):
    """parallel grid + a VMEM limit sized from the (double-buffered) block
    footprint, clamped to stay within v7x's 64 MiB physical VMEM."""
    limit = int(min(64 << 20, max(2 * block_bytes + (4 << 20), 16 << 20)))
    return pltpu.CompilerParams(dimension_semantics=("parallel",),
                                vmem_limit_bytes=limit)


def _erf_f32(x):
    # Abramowitz & Stegun 7.1.26, |err| <= 1.5e-7.
    # TODO(synk): on v5e this erf polynomial may bind the VALU slot; a
    # tanh/EUP-based GELU approximation would move the work to the EUP.
    a1, a2, a3, a4, a5 = 0.254829592, -0.284496736, 1.421413741, -1.453152027, 1.061405429
    p = 0.3275911
    ax = jnp.abs(x)
    t = 1.0 / (1.0 + p * ax)
    poly = ((((a5 * t + a4) * t + a3) * t + a2) * t + a1) * t
    y = 1.0 - poly * jnp.exp(-ax * ax)
    return jnp.where(x < 0.0, -y, y)


def _gelu_exact(x):
    # matches torch nn.GELU() (erf form)
    return 0.5 * x * (1.0 + _erf_f32(x * 0.7071067811865476))


def _layernorm(x, g, b, eps):
    mu = jnp.mean(x, axis=-1, keepdims=True)
    var = jnp.mean(jnp.square(x - mu), axis=-1, keepdims=True)
    return (x - mu) * jax.lax.rsqrt(var + eps) * g + b


def _mxu_dot(a, b):
    # activations cast to bf16; weights already live in bf16 in HBM.
    return jnp.dot(a.astype(MXU_DTYPE), b.astype(MXU_DTYPE),
                   preferred_element_type=jnp.float32)


# -----------------------------------------------------------------------------
# Pallas kernels
# -----------------------------------------------------------------------------
def _ln_matmul_kernel(x_ref, g_ref, b_ref, w_ref, bias_ref, o_ref, *, eps):
    """LayerNorm -> matmul + bias (PatchMerging norm -> reduction)."""
    x = x_ref[...].astype(jnp.float32)
    y = _layernorm(x, g_ref[...], b_ref[...], eps)
    o_ref[...] = (_mxu_dot(y, w_ref[...]) + bias_ref[...]).astype(o_ref.dtype)


def ln_linear(x, g, b, w, bias=None, *, eps=_LN_EPS, row_tile=256):
    """LayerNorm(x) @ w + bias, row-tiled.  x:(M,K) f32, w:(K,N) bf16."""
    M, K = x.shape
    N = w.shape[1]
    if bias is None:
        bias = jnp.zeros((N,), jnp.float32)
    tm = _row_tile(M, row_tile)
    block_bytes = (tm * K * 4 + tm * N * 4 + K * N * w.dtype.itemsize
                   + (2 * K + 3 * N) * 4)
    return pl.pallas_call(
        functools.partial(_ln_matmul_kernel, eps=eps),
        out_shape=jax.ShapeDtypeStruct((M, N), jnp.float32),
        grid=(pl.cdiv(M, tm),),
        in_specs=[
            pl.BlockSpec((tm, K), lambda i: (i, 0)),
            pl.BlockSpec((1, K), lambda i: (0, 0)),
            pl.BlockSpec((1, K), lambda i: (0, 0)),
            pl.BlockSpec((K, N), lambda i: (0, 0)),
            pl.BlockSpec((1, N), lambda i: (0, 0)),
        ],
        out_specs=pl.BlockSpec((tm, N), lambda i: (i, 0)),
        compiler_params=_compiler_params(block_bytes),
    )(x, g.reshape(1, K), b.reshape(1, K), w, bias.reshape(1, N))


def _matmul_ln_kernel(x_ref, w_ref, bias_ref, g_ref, b_ref, o_ref, *, eps):
    """matmul + bias -> LayerNorm (patch embedding conv-as-matmul)."""
    acc = _mxu_dot(x_ref[...].astype(jnp.float32), w_ref[...]) + bias_ref[...]
    o_ref[...] = _layernorm(acc, g_ref[...], b_ref[...], eps).astype(o_ref.dtype)


def linear_ln(x, w, bias, g, b, *, eps=_LN_EPS, row_tile=256):
    """LayerNorm(x @ w + bias), row-tiled.  w:(K,N) bf16."""
    M, K = x.shape
    N = w.shape[1]
    tm = _row_tile(M, row_tile)
    block_bytes = (tm * K * 4 + tm * N * 4 + K * N * w.dtype.itemsize + 3 * N * 4)
    return pl.pallas_call(
        functools.partial(_matmul_ln_kernel, eps=eps),
        out_shape=jax.ShapeDtypeStruct((M, N), jnp.float32),
        grid=(pl.cdiv(M, tm),),
        in_specs=[
            pl.BlockSpec((tm, K), lambda i: (i, 0)),
            pl.BlockSpec((K, N), lambda i: (0, 0)),
            pl.BlockSpec((1, N), lambda i: (0, 0)),
            pl.BlockSpec((1, N), lambda i: (0, 0)),
            pl.BlockSpec((1, N), lambda i: (0, 0)),
        ],
        out_specs=pl.BlockSpec((tm, N), lambda i: (i, 0)),
        compiler_params=_compiler_params(block_bytes),
    )(x, w, bias.reshape(1, N), g.reshape(1, N), b.reshape(1, N))


def _mlp_kernel(x_ref, g_ref, b_ref, w1_ref, b1_ref, w2_ref, b2_ref, o_ref, *, eps):
    """LN2 -> fc1 -> exact GELU -> fc2 -> + residual, all in one VMEM pass."""
    x = x_ref[...].astype(jnp.float32)
    y = _layernorm(x, g_ref[...], b_ref[...], eps)
    h = _mxu_dot(y, w1_ref[...]) + b1_ref[...]
    h = _gelu_exact(h)                           # hidden activation never hits HBM
    out = _mxu_dot(h, w2_ref[...]) + b2_ref[...]
    o_ref[...] = (x + out).astype(o_ref.dtype)   # residual fused


def mlp_block(x, g, b, w1, b1, w2, b2, *, eps=_LN_EPS, row_tile=256):
    M, C = x.shape
    H = w1.shape[1]
    tm = _row_tile(M, row_tile)
    block_bytes = (2 * tm * C * 4 + tm * H * 4
                   + C * H * w1.dtype.itemsize + H * C * w2.dtype.itemsize
                   + (3 * C + H) * 4)
    return pl.pallas_call(
        functools.partial(_mlp_kernel, eps=eps),
        out_shape=jax.ShapeDtypeStruct((M, C), jnp.float32),
        grid=(pl.cdiv(M, tm),),
        in_specs=[
            pl.BlockSpec((tm, C), lambda i: (i, 0)),
            pl.BlockSpec((1, C), lambda i: (0, 0)),
            pl.BlockSpec((1, C), lambda i: (0, 0)),
            pl.BlockSpec((C, H), lambda i: (0, 0)),
            pl.BlockSpec((1, H), lambda i: (0, 0)),
            pl.BlockSpec((H, C), lambda i: (0, 0)),
            pl.BlockSpec((1, C), lambda i: (0, 0)),
        ],
        out_specs=pl.BlockSpec((tm, C), lambda i: (i, 0)),
        compiler_params=_compiler_params(block_bytes),
    )(x, g.reshape(1, C), b.reshape(1, C), w1, b1.reshape(1, H), w2, b2.reshape(1, C))


def _window_attn_kernel(x_ref, g1_ref, b1_ref, qkvw_ref, qkvb_ref, rpb_ref,
                        mask_ref, pw_ref, pb_ref, o_ref, attn_scr, *,
                        gw, n, heads, scale, eps):
    """Fused: LN1 -> QKV -> window attention (+rel-pos bias, +shift mask)
    -> output projection -> + residual, for one group of GW windows."""
    C = x_ref.shape[-1]
    hd = C // heads
    x = x_ref[...].astype(jnp.float32)                         # (GW*N, C)
    y = _layernorm(x, g1_ref[...], b1_ref[...], eps)
    qkv = _mxu_dot(y, qkvw_ref[...]) + qkvb_ref[...]           # (GW*N, 3C) f32
    qkv = qkv.reshape(gw, n, 3 * C)
    mask = mask_ref[...].astype(jnp.float32)                   # (GW or 1, N, N)
    for h in range(heads):                                     # static unroll
        q = qkv[:, :, h * hd:(h + 1) * hd] * scale
        k = qkv[:, :, C + h * hd:C + (h + 1) * hd]
        v = qkv[:, :, 2 * C + h * hd:2 * C + (h + 1) * hd]
        s = jnp.einsum('gnd,gmd->gnm', q.astype(MXU_DTYPE), k.astype(MXU_DTYPE),
                       preferred_element_type=jnp.float32)
        s = s + rpb_ref[h][None, :, :] + mask
        s = s - jnp.max(s, axis=-1, keepdims=True)
        p = jnp.exp(s)
        p = p * pl.reciprocal(jnp.sum(p, axis=-1, keepdims=True), approx=True)
        # head output written straight into a VMEM scratch slab (no concat)
        attn_scr[:, :, h * hd:(h + 1) * hd] = jnp.einsum(
            'gnm,gmd->gnd', p.astype(MXU_DTYPE), v.astype(MXU_DTYPE),
            preferred_element_type=jnp.float32)
    o = attn_scr[...].reshape(gw * n, C)
    proj = _mxu_dot(o, pw_ref[...]) + pb_ref[...]              # fused projection
    o_ref[...] = (x + proj).astype(o_ref.dtype)                # fused 1st residual


def window_attention(x_win, blk, mask, *, B_, N, C, eps=_LN_EPS, target_rows=512):
    """x_win: (B_*N, C) pre-norm tokens in window order.
    Returns x_win + proj(attn(LN1(x_win))) in the same (window) order."""
    heads = blk["num_heads"]
    hd = C // heads
    scale = hd ** (-0.5)
    nW = mask.shape[0]
    want = max(1, target_rows)
    GW = _pick_group(nW, B_, N, want)
    rows = GW * N
    if nW > 1:
        per = nW // GW
        mask_spec = pl.BlockSpec((GW, N, N), lambda g: (g % per, 0, 0))
    else:
        mask_spec = pl.BlockSpec((1, N, N), lambda g: (0, 0, 0))
    block_bytes = (2 * rows * C * 4                       # x block + out block
                   + rows * 3 * C * 4 + rows * C * 4      # qkv temp + scratch
                   + 3 * C * C * 2 + C * C * 2            # bf16 weights
                   + heads * N * N * 4 + GW * N * N * 4   # rpb + mask
                   + 7 * C * 4)
    return pl.pallas_call(
        functools.partial(_window_attn_kernel, gw=GW, n=N, heads=heads,
                          scale=scale, eps=eps),
        out_shape=jax.ShapeDtypeStruct((B_ * N, C), jnp.float32),
        grid=(B_ // GW,),
        in_specs=[
            pl.BlockSpec((rows, C), lambda g: (g, 0)),
            pl.BlockSpec((1, C), lambda g: (0, 0)),
            pl.BlockSpec((1, C), lambda g: (0, 0)),
            pl.BlockSpec((C, 3 * C), lambda g: (0, 0)),
            pl.BlockSpec((1, 3 * C), lambda g: (0, 0)),
            pl.BlockSpec((heads, N, N), lambda g: (0, 0, 0)),
            mask_spec,
            pl.BlockSpec((C, C), lambda g: (0, 0)),
            pl.BlockSpec((1, C), lambda g: (0, 0)),
        ],
        out_specs=pl.BlockSpec((rows, C), lambda g: (g, 0)),
        scratch_shapes=[pltpu.VMEM((GW, N, C), jnp.float32)],
        compiler_params=_compiler_params(block_bytes),
    )(x_win,
      blk["norm1_g"].reshape(1, C), blk["norm1_b"].reshape(1, C),
      blk["qkv_w"], blk["qkv_b"].reshape(1, 3 * C),
      blk["rpb"], mask,
      blk["proj_w"], blk["proj_b"].reshape(1, C))


# -----------------------------------------------------------------------------
# Plain-JAX glue (layout permutations / static index tables)
# -----------------------------------------------------------------------------
def window_partition(x, ws):
    B, H, W, C = x.shape
    x = x.reshape(B, H // ws, ws, W // ws, ws, C)
    return x.transpose(0, 1, 3, 2, 4, 5).reshape(-1, ws, ws, C)


def window_reverse(windows, ws, H, W):
    B = windows.shape[0] // ((H // ws) * (W // ws))
    x = windows.reshape(B, H // ws, W // ws, ws, ws, -1)
    return x.transpose(0, 1, 3, 2, 4, 5).reshape(B, H, W, -1)


def _window_partition_np(x, ws):
    B, H, W, C = x.shape
    x = x.reshape(B, H // ws, ws, W // ws, ws, C)
    return x.transpose(0, 1, 3, 2, 4, 5).reshape(-1, ws, ws, C)


def relative_position_index(ws):
    coords = np.stack(np.meshgrid(np.arange(ws), np.arange(ws), indexing="ij"))
    coords_flatten = coords.reshape(2, -1)
    rel = coords_flatten[:, :, None] - coords_flatten[:, None, :]
    rel = rel.transpose(1, 2, 0).astype(np.int64)
    rel[:, :, 0] += ws - 1
    rel[:, :, 1] += ws - 1
    rel[:, :, 0] *= 2 * ws - 1
    return rel.sum(-1)  # (ws*ws, ws*ws)


def compute_attn_mask(H, W, ws, shift):
    img_mask = np.zeros((1, H, W, 1), np.float32)
    h_slices = (slice(0, -ws), slice(-ws, -shift), slice(-shift, None))
    w_slices = (slice(0, -ws), slice(-ws, -shift), slice(-shift, None))
    cnt = 0
    for h in h_slices:
        for w in w_slices:
            img_mask[:, h, w, :] = cnt
            cnt += 1
    mask_windows = _window_partition_np(img_mask, ws).reshape(-1, ws * ws)
    attn_mask = mask_windows[:, None, :] - mask_windows[:, :, None]
    attn_mask = np.where(attn_mask != 0, -100.0, 0.0).astype(np.float32)
    return attn_mask  # (nW, N, N)


# -----------------------------------------------------------------------------
# Parameter initialization (deterministic, synthetic)
# -----------------------------------------------------------------------------
def _trunc(key, shape, std=0.02):
    return (std * jax.random.truncated_normal(key, -2.0, 2.0, shape)).astype(jnp.float32)


def init_params(key, *, img_size, patch_size, in_ch, embed_dim,
                depths, num_heads, window_size, mlp_ratio):
    keys = iter(jax.random.split(key, 256))
    nk = lambda: next(keys)
    params = {}
    pr = img_size // patch_size

    # conv-as-matmul weight, pre-reshaped and stored bf16 (review: bf16 weights in HBM)
    pe_w = _trunc(nk(), (embed_dim, in_ch, patch_size, patch_size))
    params["patch_embed"] = dict(
        proj_w=pe_w.reshape(embed_dim, in_ch * patch_size * patch_size).T.astype(MXU_DTYPE),
        proj_b=jnp.zeros((embed_dim,), jnp.float32),
        norm_g=jnp.ones((embed_dim,), jnp.float32),
        norm_b=jnp.zeros((embed_dim,), jnp.float32),
    )

    layers = []
    for i_layer in range(len(depths)):
        dim = int(embed_dim * 2 ** i_layer)
        res = (pr // 2 ** i_layer, pr // 2 ** i_layer)
        heads = num_heads[i_layer]
        blocks = []
        for i_blk in range(depths[i_layer]):
            shift = 0 if i_blk % 2 == 0 else window_size // 2
            ws = window_size
            if min(res) <= ws:          # same adjustment as SwinTransformerBlock.__init__
                shift = 0
                ws = min(res)
            N = ws * ws
            hidden = int(dim * mlp_ratio)
            rpb_table = _trunc(nk(), ((2 * ws - 1) * (2 * ws - 1), heads))
            rpi = relative_position_index(ws).reshape(-1)
            # relative-position bias precomputed once (review: no per-call gather)
            rpb = rpb_table[rpi].reshape(N, N, heads).transpose(2, 0, 1).astype(jnp.float32)
            blk = dict(
                window_size=ws, shift_size=shift, num_heads=heads,
                norm1_g=jnp.ones((dim,), jnp.float32), norm1_b=jnp.zeros((dim,), jnp.float32),
                norm2_g=jnp.ones((dim,), jnp.float32), norm2_b=jnp.zeros((dim,), jnp.float32),
                qkv_w=_trunc(nk(), (dim, 3 * dim)).astype(MXU_DTYPE),
                qkv_b=jnp.zeros((3 * dim,), jnp.float32),
                proj_w=_trunc(nk(), (dim, dim)).astype(MXU_DTYPE),
                proj_b=jnp.zeros((dim,), jnp.float32),
                rpb=rpb,
                fc1_w=_trunc(nk(), (dim, hidden)).astype(MXU_DTYPE),
                fc1_b=jnp.zeros((hidden,), jnp.float32),
                fc2_w=_trunc(nk(), (hidden, dim)).astype(MXU_DTYPE),
                fc2_b=jnp.zeros((dim,), jnp.float32),
                attn_mask=(jnp.asarray(compute_attn_mask(res[0], res[1], ws, shift))
                           if shift > 0 else jnp.zeros((1, N, N), jnp.float32)),
            )
            blocks.append(blk)
        layer = dict(dim=dim, input_resolution=res, blocks=blocks)
        if i_layer < len(depths) - 1:
            layer["downsample"] = dict(
                norm_g=jnp.ones((4 * dim,), jnp.float32),
                norm_b=jnp.zeros((4 * dim,), jnp.float32),
                red_w=_trunc(nk(), (4 * dim, 2 * dim)).astype(MXU_DTYPE),
            )
        else:
            layer["downsample"] = None
        layers.append(layer)
    params["layers"] = layers
    return params


# -----------------------------------------------------------------------------
# Model forward (composed from fused Pallas kernels)
# -----------------------------------------------------------------------------
def patch_embed_fwd(x, pe, patch_size, embed_dim):
    B, C, H, W = x.shape
    p = patch_size
    Hp, Wp = H // p, W // p
    # stride-p / kernel-p conv == matmul on flattened patches (c, dh, dw order)
    xp = x.reshape(B, C, Hp, p, Wp, p).transpose(0, 2, 4, 1, 3, 5).reshape(B * Hp * Wp, C * p * p)
    out = linear_ln(xp, pe["proj_w"], pe["proj_b"], pe["norm_g"], pe["norm_b"])
    return out.reshape(B, Hp * Wp, embed_dim)


def swin_block_fwd(x, blk, B, H, W, C):
    ws, shift = blk["window_size"], blk["shift_size"]
    # TODO(synk): roll + window partition/reverse stay as XLA layout glue; a
    # scalar-prefetched gather index table could fold them into the attention DMA.
    h = x.reshape(B, H, W, C)
    if shift > 0:
        h = jnp.roll(h, shift=(-shift, -shift), axis=(1, 2))
    xw = window_partition(h, ws)                  # (B_, ws, ws, C)
    B_ = xw.shape[0]
    N = ws * ws
    # fused LN1 + QKV + window attention + projection + first residual
    # (LN and the residual add are per-token, so they commute with the
    #  roll / window permutation)
    y = window_attention(xw.reshape(B_ * N, C), blk, blk["attn_mask"],
                         B_=B_, N=N, C=C)
    y = y.reshape(B_, ws, ws, C)
    h = window_reverse(y, ws, H, W)
    if shift > 0:
        h = jnp.roll(h, shift=(shift, shift), axis=(1, 2))
    x = h.reshape(B, H * W, C)                    # shortcut + attn already fused
    # fused LayerNorm(norm2) + fc1 + GELU + fc2 + second residual
    y = mlp_block(x.reshape(B * H * W, C), blk["norm2_g"], blk["norm2_b"],
                  blk["fc1_w"], blk["fc1_b"], blk["fc2_w"], blk["fc2_b"])
    return y.reshape(B, H * W, C)


def patch_merging_fwd(x, pm, H, W):
    B, L, C = x.shape
    x = x.reshape(B, H, W, C)
    x0 = x[:, 0::2, 0::2, :]
    x1 = x[:, 1::2, 0::2, :]
    x2 = x[:, 0::2, 1::2, :]
    x3 = x[:, 1::2, 1::2, :]
    xcat = jnp.concatenate([x0, x1, x2, x3], axis=-1)
    xcat = xcat.reshape(B * (H // 2) * (W // 2), 4 * C)
    y = ln_linear(xcat, pm["norm_g"], pm["norm_b"], pm["red_w"], None)
    return y.reshape(B, (H // 2) * (W // 2), 2 * C)


def swin_transformer_fwd(x, params, *, patch_size, embed_dim):
    B = x.shape[0]
    x = patch_embed_fwd(x, params["patch_embed"], patch_size, embed_dim)
    # pos_drop / attn_drop / proj_drop / DropPath are identity at rate 0 (eval).
    st_layer = []
    for layer in params["layers"]:
        H, W = layer["input_resolution"]
        C = layer["dim"]
        for blk in layer["blocks"]:
            x = swin_block_fwd(x, blk, B, H, W, C)
        x_st = x
        if layer["downsample"] is not None:
            x = patch_merging_fwd(x, layer["downsample"], H, W)
        h_w = int(np.sqrt(x_st.shape[1]))
        # faithful to the PyTorch `view([B, -1, H_W, H_W])` (raw reshape)
        st_layer.append(jnp.reshape(x_st, (B, -1, h_w, h_w)))
    return x, st_layer


# -----------------------------------------------------------------------------
if __name__ == "__main__":
    # small configuration consistent with the module
    img_size, patch_size, in_ch = 16, 4, 3
    embed_dim = 32
    depths = [2, 2]
    num_heads = [2, 4]
    window_size = 2
    mlp_ratio = 4

    key = jax.random.PRNGKey(0)
    pkey, xkey = jax.random.split(key)
    params = init_params(pkey, img_size=img_size, patch_size=patch_size, in_ch=in_ch,
                         embed_dim=embed_dim, depths=depths, num_heads=num_heads,
                         window_size=window_size, mlp_ratio=mlp_ratio)

    x = jax.random.normal(xkey, (2, in_ch, img_size, img_size), dtype=jnp.float32)  # NCHW

    fwd = jax.jit(lambda inp: swin_transformer_fwd(inp, params,
                                                   patch_size=patch_size,
                                                   embed_dim=embed_dim))
    out, st_layer = fwd(x)
    jax.block_until_ready(out)
    for t in st_layer:
        jax.block_until_ready(t)

    assert out.shape == (2, 4, 64), out.shape
    assert st_layer[0].shape == (2, 32, 4, 4), st_layer[0].shape
    assert st_layer[1].shape == (2, 64, 2, 2), st_layer[1].shape
    print("KERNEL_OK")
</pallas_src>

<mosaic_0001>
module attributes {stable_mosaic.version = 11 : i64} {
  func.func @_matmul_ln_kernel(%arg0: i32, %arg1: memref<16x48xf32, #tpu.memory_space<vmem>>, %arg2: memref<48x32xbf16, #tpu.memory_space<vmem>>, %arg3: memref<1x32xf32, #tpu.memory_space<vmem>>, %arg4: memref<1x32xf32, #tpu.memory_space<vmem>>, %arg5: memref<1x32xf32, #tpu.memory_space<vmem>>, %arg6: memref<16x32xf32, #tpu.memory_space<vmem>>) attributes {dimension_semantics = [#tpu.dimension_semantics<parallel>], iteration_bounds = array<i64: 2>, scalar_prefetch = 0 : i64, scratch_operands = 0 : i64, tpu.core_type = #tpu.core_type<tc>, window_params = [{transform_indices = @transform_0, window_bounds = array<i64: 16, 48>}, {pipeline_mode = #tpu.pipeline_mode<synchronous>, transform_indices = @transform_1, window_bounds = array<i64: 48, 32>}, {pipeline_mode = #tpu.pipeline_mode<synchronous>, transform_indices = @transform_2, window_bounds = array<i64: 1, 32>}, {pipeline_mode = #tpu.pipeline_mode<synchronous>, transform_indices = @transform_3, window_bounds = array<i64: 1, 32>}, {pipeline_mode = #tpu.pipeline_mode<synchronous>, transform_indices = @transform_4, window_bounds = array<i64: 1, 32>}, {transform_indices = @transform_5, window_bounds = array<i64: 16, 32>}]} {
    %c0 = arith.constant 0 : index
    %c0_0 = arith.constant 0 : index
    %0 = vector.load %arg1[%c0, %c0_0] : memref<16x48xf32, #tpu.memory_space<vmem>>, vector<16x48xf32>
    %c0_1 = arith.constant 0 : index
    %c0_2 = arith.constant 0 : index
    %1 = vector.load %arg2[%c0_1, %c0_2] : memref<48x32xbf16, #tpu.memory_space<vmem>>, vector<48x32xbf16>
    %2 = arith.truncf %0 : vector<16x48xf32> to vector<16x48xbf16>
    %cst = arith.constant dense<0.000000e+00> : vector<16x32xf32>
    %3 = tpu.matmul %2, %1, %cst {dimension_numbers = #tpu.dot_dimension_numbers<[1], [0], [0], [1], [0, 0, 1, 1], [], []>} : vector<16x48xbf16>, vector<48x32xbf16>, vector<16x32xf32> -> vector<16x32xf32>
    %c0_3 = arith.constant 0 : index
    %c0_4 = arith.constant 0 : index
    %4 = vector.load %arg3[%c0_3, %c0_4] : memref<1x32xf32, #tpu.memory_space<vmem>>, vector<1x32xf32>
    %5 = vector.broadcast %4 : vector<1x32xf32> to vector<16x32xf32>
    %6 = arith.addf %3, %5 : vector<16x32xf32>
    %c0_5 = arith.constant 0 : index
    %c0_6 = arith.constant 0 : index
    %7 = vector.load %arg4[%c0_5, %c0_6] : memref<1x32xf32, #tpu.memory_space<vmem>>, vector<1x32xf32>
    %c0_7 = arith.constant 0 : index
    %c0_8 = arith.constant 0 : index
    %8 = vector.load %arg5[%c0_7, %c0_8] : memref<1x32xf32, #tpu.memory_space<vmem>>, vector<1x32xf32>
    %cst_9 = arith.constant dense<0.000000e+00> : vector<16xf32>
    %9 = vector.multi_reduction <add>, %6, %cst_9 [1] : vector<16x32xf32> to vector<16xf32>
    %10 = vector.shape_cast %9 : vector<16xf32> to vector<16x1xf32>
    %cst_10 = arith.constant 3.200000e+01 : f32
    %11 = vector.broadcast %cst_10 : f32 to vector<16x1xf32>
    %12 = arith.divf %10, %11 : vector<16x1xf32>
    %13 = vector.broadcast %12 : vector<16x1xf32> to vector<16x32xf32>
    %14 = arith.subf %6, %13 : vector<16x32xf32>
    %15 = arith.mulf %14, %14 : vector<16x32xf32>
    %cst_11 = arith.constant dense<0.000000e+00> : vector<16xf32>
    %16 = vector.multi_reduction <add>, %15, %cst_11 [1] : vector<16x32xf32> to vector<16xf32>
    %17 = vector.shape_cast %16 : vector<16xf32> to vector<16x1xf32>
    %cst_12 = arith.constant 3.200000e+01 : f32
    %18 = vector.broadcast %cst_12 : f32 to vector<16x1xf32>
    %19 = arith.divf %17, %18 : vector<16x1xf32>
    %20 = vector.broadcast %12 : vector<16x1xf32> to vector<16x32xf32>
    %21 = arith.subf %6, %20 : vector<16x32xf32>
    %cst_13 = arith.constant 9.99999974E-6 : f32
    %22 = vector.broadcast %cst_13 : f32 to vector<16x1xf32>
    %23 = arith.addf %19, %22 : vector<16x1xf32>
    %24 = math.rsqrt %23 : vector<16x1xf32>
    %25 = vector.broadcast %24 : vector<16x1xf32> to vector<16x32xf32>
    %26 = arith.mulf %21, %25 : vector<16x32xf32>
    %27 = vector.broadcast %7 : vector<1x32xf32> to vector<16x32xf32>
    %28 = arith.mulf %26, %27 : vector<16x32xf32>
    %29 = vector.broadcast %8 : vector<1x32xf32> to vector<16x32xf32>
    %30 = arith.addf %28, %29 : vector<16x32xf32>
    %c0_14 = arith.constant 0 : index
    %c0_15 = arith.constant 0 : index
    %31 = vector.load %arg6[%c0_14, %c0_15] : memref<16x32xf32, #tpu.memory_space<vmem>>, vector<16x32xf32>
    tpu.vector_store %arg6[%c0_14, %c0_15], %30 {strides = array<i32>} : memref<16x32xf32, #tpu.memory_space<vmem>>, vector<16x32xf32>,
    return
  }
  func.func @transform_0(%arg0: i32) -> (i32, i32) {
    %c0_i32 = arith.constant 0 : i32
    %c0_i32_0 = arith.constant 0 : i32
    return %arg0, %c0_i32 : i32, i32
  }
  func.func @transform_1(%arg0: i32) -> (i32, i32) {
    %c0_i32 = arith.constant 0 : i32
    %c0_i32_0 = arith.constant 0 : i32
    %c0_i32_1 = arith.constant 0 : i32
    return %c0_i32, %c0_i32_0 : i32, i32
  }
  func.func @transform_2(%arg0: i32) -> (i32, i32) {
    %c0_i32 = arith.constant 0 : i32
    %c0_i32_0 = arith.constant 0 : i32
    %c0_i32_1 = arith.constant 0 : i32
    return %c0_i32, %c0_i32_0 : i32, i32
  }
  func.func @transform_3(%arg0: i32) -> (i32, i32) {
    %c0_i32 = arith.constant 0 : i32
    %c0_i32_0 = arith.constant 0 : i32
    %c0_i32_1 = arith.constant 0 : i32
    return %c0_i32, %c0_i32_0 : i32, i32
  }
  func.func @transform_4(%arg0: i32) -> (i32, i32) {
    %c0_i32 = arith.constant 0 : i32
    %c0_i32_0 = arith.constant 0 : i32
    %c0_i32_1 = arith.constant 0 : i32
    return %c0_i32, %c0_i32_0 : i32, i32
  }
  func.func @transform_5(%arg0: i32) -> (i32, i32) {
    %c0_i32 = arith.constant 0 : i32
    %c0_i32_0 = arith.constant 0 : i32
    return %arg0, %c0_i32 : i32, i32
  }
}

module attributes {stable_mosaic.version = 11 : i64} {
  func.func @_window_attn_kernel(%arg0: i32, %arg1: memref<16x32xf32, #tpu.memory_space<vmem>>, %arg2: memref<1x32xf32, #tpu.memory_space<vmem>>, %arg3: memref<1x32xf32, #tpu.memory_space<vmem>>, %arg4: memref<32x96xbf16, #tpu.memory_space<vmem>>, %arg5: memref<1x96xf32, #tpu.memory_space<vmem>>, %arg6: memref<2x4x4xf32, #tpu.memory_space<vmem>>, %arg7: memref<1x4x4xf32, #tpu.memory_space<vmem>>, %arg8: memref<32x32xbf16, #tpu.memory_space<vmem>>, %arg9: memref<1x32xf32, #tpu.memory_space<vmem>>, %arg10: memref<16x32xf32, #tpu.memory_space<vmem>>, %arg11: memref<4x4x32xf32, #tpu.memory_space<vmem>>) attributes {dimension_semantics = [#tpu.dimension_semantics<parallel>], iteration_bounds = array<i64: 2>, scalar_prefetch = 0 : i64, scratch_operands = 1 : i64, tpu.core_type = #tpu.core_type<tc>, window_params = [{transform_indices = @transform_0, window_bounds = array<i64: 16, 32>}, {pipeline_mode = #tpu.pipeline_mode<synchronous>, transform_indices = @transform_1, window_bounds = array<i64: 1, 32>}, {pipeline_mode = #tpu.pipeline_mode<synchronous>, transform_indices = @transform_2, window_bounds = array<i64: 1, 32>}, {pipeline_mode = #tpu.pipeline_mode<synchronous>, transform_indices = @transform_3, window_bounds = array<i64: 32, 96>}, {pipeline_mode = #tpu.pipeline_mode<synchronous>, transform_indices = @transform_4, window_bounds = array<i64: 1, 96>}, {pipeline_mode = #tpu.pipeline_mode<synchronous>, transform_indices = @transform_5, window_bounds = array<i64: 2, 4, 4>}, {pipeline_mode = #tpu.pipeline_mode<synchronous>, transform_indices = @transform_6, window_bounds = array<i64: 1, 4, 4>}, {pipeline_mode = #tpu.pipeline_mode<synchronous>, transform_indices = @transform_7, window_bounds = array<i64: 32, 32>}, {pipeline_mode = #tpu.pipeline_mode<synchronous>, transform_indices = @transform_8, window_bounds = array<i64: 1, 32>}, {transform_indices = @transform_9, window_bounds = array<i64: 16, 32>}]} {
    %c0 = arith.constant 0 : index
    %c0_0 = arith.constant 0 : index
    %0 = vector.load %arg1[%c0, %c0_0] : memref<16x32xf32, #tpu.memory_space<vmem>>, vector<16x32xf32>
    %c0_1 = arith.constant 0 : index
    %c0_2 = arith.constant 0 : index
    %1 = vector.load %arg2[%c0_1, %c0_2] : memref<1x32xf32, #tpu.memory_space<vmem>>, vector<1x32xf32>
    %c0_3 = arith.constant 0 : index
    %c0_4 = arith.constant 0 : index
    %2 = vector.load %arg3[%c0_3, %c0_4] : memref<1x32xf32, #tpu.memory_space<vmem>>, vector<1x32xf32>
    %cst = arith.constant dense<0.000000e+00> : vector<16xf32>
    %3 = vector.multi_reduction <add>, %0, %cst [1] : vector<16x32xf32> to vector<16xf32>
    %4 = vector.shape_cast %3 : vector<16xf32> to vector<16x1xf32>
    %cst_5 = arith.constant 3.200000e+01 : f32
    %5 = vector.broadcast %cst_5 : f32 to vector<16x1xf32>
    %6 = arith.divf %4, %5 : vector<16x1xf32>
    %7 = vector.broadcast %6 : vector<16x1xf32> to vector<16x32xf32>
    %8 = arith.subf %0, %7 : vector<16x32xf32>
    %9 = arith.mulf %8, %8 : vector<16x32xf32>
    %cst_6 = arith.constant dense<0.000000e+00> : vector<16xf32>
    %10 = vector.multi_reduction <add>, %9, %cst_6 [1] : vector<16x32xf32> to vector<16xf32>
    %11 = vector.shape_cast %10 : vector<16xf32> to vector<16x1xf32>
    %cst_7 = arith.constant 3.200000e+01 : f32
    %12 = vector.broadcast %cst_7 : f32 to vector<16x1xf32>
    %13 = arith.divf %11, %12 : vector<16x1xf32>
    %14 = vector.broadcast %6 : vector<16x1xf32> to vector<16x32xf32>
    %15 = arith.subf %0, %14 : vector<16x32xf32>
    %cst_8 = arith.constant 9.99999974E-6 : f32
    %16 = vector.broadcast %cst_8 : f32 to vector<16x1xf32>
    %17 = arith.addf %13, %16 : vector<16x1xf32>
    %18 = math.rsqrt %17 : vector<16x1xf32>
    %19 = vector.broadcast %18 : vector<16x1xf32> to vector<16x32xf32>
    %20 = arith.mulf %15, %19 : vector<16x32xf32>
    %21 = vector.broadcast %1 : vector<1x32xf32> to vector<16x32xf32>
    %22 = arith.mulf %20, %21 : vector<16x32xf32>
    %23 = vector.broadcast %2 : vector<1x32xf32> to vector<16x32xf32>
    %24 = arith.addf %22, %23 : vector<16x32xf32>
    %c0_9 = arith.constant 0 : index
    %c0_10 = arith.constant 0 : index
    %25 = vector.load %arg4[%c0_9, %c0_10] : memref<32x96xbf16, #tpu.memory_space<vmem>>, vector<32x96xbf16>
    %26 = arith.truncf %24 : vector<16x32xf32> to vector<16x32xbf16>
    %cst_11 = arith.constant dense<0.000000e+00> : vector<16x96xf32>
    %27 = tpu.matmul %26, %25, %cst_11 {dimension_numbers = #tpu.dot_dimension_numbers<[1], [0], [0], [1], [0, 0, 1, 1], [], []>} : vector<16x32xbf16>, vector<32x96xbf16>, vector<16x96xf32> -> vector<16x96xf32>
    %c0_12 = arith.constant 0 : index
    %c0_13 = arith.constant 0 : index
    %28 = vector.load %arg5[%c0_12, %c0_13] : memref<1x96xf32, #tpu.memory_space<vmem>>, vector<1x96xf32>
    %29 = vector.broadcast %28 : vector<1x96xf32> to vector<16x96xf32>
    %30 = arith.addf %27, %29 : vector<16x96xf32>
    %31 = vector.shape_cast %30 : vector<16x96xf32> to vector<4x4x96xf32>
    %c0_14 = arith.constant 0 : index
    %c0_15 = arith.constant 0 : index
    %c0_16 = arith.constant 0 : index
    %32 = vector.load %arg7[%c0_14, %c0_15, %c0_16] : memref<1x4x4xf32, #tpu.memory_space<vmem>>, vector<1x4x4xf32>
    %33 = vector.extract_strided_slice %31 {offsets = [0, 0, 0], sizes = [4, 4, 16], strides = [1, 1, 1]} : vector<4x4x96xf32> to vector<4x4x16xf32>
    %cst_17 = arith.constant 2.500000e-01 : f32
    %34 = vector.broadcast %cst_17 : f32 to vector<4x4x16xf32>
    %35 = arith.mulf %33, %34 : vector<4x4x16xf32>
    %36 = vector.extract_strided_slice %31 {offsets = [0, 0, 32], sizes = [4, 4, 16], strides = [1, 1, 1]} : vector<4x4x96xf32> to vector<4x4x16xf32>
    %37 = vector.extract_strided_slice %31 {offsets = [0, 0, 64], sizes = [4, 4, 16], strides = [1, 1, 1]} : vector<4x4x96xf32> to vector<4x4x16xf32>
    %38 = arith.truncf %35 : vector<4x4x16xf32> to vector<4x4x16xbf16>
    %39 = arith.truncf %36 : vector<4x4x16xf32> to vector<4x4x16xbf16>
    "tpu.trace_start"() <{level = 10 : i32, message = "gnd,gmd->gnm"}> : () -> ()
    %cst_18 = arith.constant dense<0.000000e+00> : vector<4x4x4xf32>
    %40 = tpu.matmul %38, %39, %cst_18 {dimension_numbers = #tpu.dot_dimension_numbers<[2], [2], [1], [1], [0, 0, 0, 1, 1, 1], [0], [0]>} : vector<4x4x16xbf16>, vector<4x4x16xbf16>, vector<4x4x4xf32> -> vector<4x4x4xf32>
    "tpu.trace_stop"() : () -> ()
    %c0_19 = arith.constant 0 : index
    %c0_20 = arith.constant 0 : index
    %c0_21 = arith.constant 0 : index
    %41 = vector.load %arg6[%c0_19, %c0_20, %c0_21] : memref<2x4x4xf32, #tpu.memory_space<vmem>>, vector<1x4x4xf32>
    %42 = vector.shape_cast %41 : vector<1x4x4xf32> to vector<4x4xf32>
    %43 = vector.shape_cast %42 : vector<4x4xf32> to vector<1x4x4xf32>
    %44 = vector.broadcast %43 : vector<1x4x4xf32> to vector<4x4x4xf32>
    %45 = arith.addf %40, %44 : vector<4x4x4xf32>
    %46 = vector.broadcast %32 : vector<1x4x4xf32> to vector<4x4x4xf32>
    %47 = arith.addf %45, %46 : vector<4x4x4xf32>
    %cst_22 = arith.constant dense<0xFF800000> : vector<4x4xf32>
    %48 = vector.multi_reduction <maximumf>, %47, %cst_22 [2] : vector<4x4x4xf32> to vector<4x4xf32>
    %49 = vector.shape_cast %48 : vector<4x4xf32> to vector<4x4x1xf32>
    %50 = vector.broadcast %49 : vector<4x4x1xf32> to vector<4x4x4xf32>
    %51 = arith.subf %47, %50 : vector<4x4x4xf32>
    %52 = math.exp %51 : vector<4x4x4xf32>
    %cst_23 = arith.constant dense<0.000000e+00> : vector<4x4xf32>
    %53 = vector.multi_reduction <add>, %52, %cst_23 [2] : vector<4x4x4xf32> to vector<4x4xf32>
    %54 = vector.shape_cast %53 : vector<4x4xf32> to vector<4x4x1xf32>
    %55 = tpu.reciprocal %54 {approx = true} : vector<4x4x1xf32> -> vector<4x4x1xf32>
    %56 = vector.broadcast %55 : vector<4x4x1xf32> to vector<4x4x4xf32>
    %57 = arith.mulf %52, %56 : vector<4x4x4xf32>
    %58 = arith.truncf %57 : vector<4x4x4xf32> to vector<4x4x4xbf16>
    %59 = arith.truncf %37 : vector<4x4x16xf32> to vector<4x4x16xbf16>
    "tpu.trace_start"() <{level = 10 : i32, message = "gnm,gmd->gnd"}> : () -> ()
    %cst_24 = arith.constant dense<0.000000e+00> : vector<4x4x16xf32>
    %60 = tpu.matmul %58, %59, %cst_24 {dimension_numbers = #tpu.dot_dimension_numbers<[2], [1], [1], [2], [0, 0, 0, 1, 1, 2], [0], [0]>} : vector<4x4x4xbf16>, vector<4x4x16xbf16>, vector<4x4x16xf32> -> vector<4x4x16xf32>
    "tpu.trace_stop"() : () -> ()
    %c0_25 = arith.constant 0 : index
    %c0_26 = arith.constant 0 : index
    %c0_27 = arith.constant 0 : index
    %61 = vector.load %arg11[%c0_25, %c0_26, %c0_27] : memref<4x4x32xf32, #tpu.memory_space<vmem>>, vector<4x4x16xf32>
    tpu.vector_store %arg11[%c0_25, %c0_26, %c0_27], %60 {strides = array<i32>} : memref<4x4x32xf32, #tpu.memory_space<vmem>>, vector<4x4x16xf32>,
    %62 = vector.extract_strided_slice %31 {offsets = [0, 0, 16], sizes = [4, 4, 16], strides = [1, 1, 1]} : vector<4x4x96xf32> to vector<4x4x16xf32>
    %cst_28 = arith.constant 2.500000e-01 : f32
    %63 = vector.broadcast %cst_28 : f32 to vector<4x4x16xf32>
    %64 = arith.mulf %62, %63 : vector<4x4x16xf32>
    %65 = vector.extract_strided_slice %31 {offsets = [0, 0, 48], sizes = [4, 4, 16], strides = [1, 1, 1]} : vector<4x4x96xf32> to vector<4x4x16xf32>
    %66 = vector.extract_strided_slice %31 {offsets = [0, 0, 80], sizes = [4, 4, 16], strides = [1, 1, 1]} : vector<4x4x96xf32> to vector<4x4x16xf32>
    %67 = arith.truncf %64 : vector<4x4x16xf32> to vector<4x4x16xbf16>
    %68 = arith.truncf %65 : vector<4x4x16xf32> to vector<4x4x16xbf16>
    "tpu.trace_start"() <{level = 10 : i32, message = "gnd,gmd->gnm"}> : () -> ()
    %cst_29 = arith.constant dense<0.000000e+00> : vector<4x4x4xf32>
    %69 = tpu.matmul %67, %68, %cst_29 {dimension_numbers = #tpu.dot_dimension_numbers<[2], [2], [1], [1], [0, 0, 0, 1, 1, 1], [0], [0]>} : vector<4x4x16xbf16>, vector<4x4x16xbf16>, vector<4x4x4xf32> -> vector<4x4x4xf32>
    "tpu.trace_stop"() : () -> ()
    %c1 = arith.constant 1 : index
    %c0_30 = arith.constant 0 : index
    %c0_31 = arith.constant 0 : index
    %70 = vector.load %arg6[%c1, %c0_30, %c0_31] : memref<2x4x4xf32, #tpu.memory_space<vmem>>, vector<1x4x4xf32>
    %71 = vector.shape_cast %70 : vector<1x4x4xf32> to vector<4x4xf32>
    %72 = vector.shape_cast %71 : vector<4x4xf32> to vector<1x4x4xf32>
    %73 = vector.broadcast %72 : vector<1x4x4xf32> to vector<4x4x4xf32>
    %74 = arith.addf %69, %73 : vector<4x4x4xf32>
    %75 = vector.broadcast %32 : vector<1x4x4xf32> to vector<4x4x4xf32>
    %76 = arith.addf %74, %75 : vector<4x4x4xf32>
    %cst_32 = arith.constant dense<0xFF800000> : vector<4x4xf32>
    %77 = vector.multi_reduction <maximumf>, %76, %cst_32 [2] : vector<4x4x4xf32> to vector<4x4xf32>
    %78 = vector.shape_cast %77 : vector<4x4xf32> to vector<4x4x1xf32>
    %79 = vector.broadcast %78 : vector<4x4x1xf32> to vector<4x4x4xf32>
    %80 = arith.subf %76, %79 : vector<4x4x4xf32>
    %81 = math.exp %80 : vector<4x4x4xf32>
    %cst_33 = arith.constant dense<0.000000e+00> : vector<4x4xf32>
    %82 = vector.multi_reduction <add>, %81, %cst_33 [2] : vector<4x4x4xf32> to vector<4x4xf32>
    %83 = vector.shape_cast %82 : vector<4x4xf32> to vector<4x4x1xf32>
    %84 = tpu.reciprocal %83 {approx = true} : vector<4x4x1xf32> -> vector<4x4x1xf32>
    %85 = vector.broadcast %84 : vector<4x4x1xf32> to vector<4x4x4xf32>
    %86 = arith.mulf %81, %85 : vector<4x4x4xf32>
    %87 = arith.truncf %86 : vector<4x4x4xf32> to vector<4x4x4xbf16>
    %88 = arith.truncf %66 : vector<4x4x16xf32> to vector<4x4x16xbf16>
    "tpu.trace_start"() <{level = 10 : i32, message = "gnm,gmd->gnd"}> : () -> ()
    %cst_34 = arith.constant dense<0.000000e+00> : vector<4x4x16xf32>
    %89 = tpu.matmul %87, %88, %cst_34 {dimension_numbers = #tpu.dot_dimension_numbers<[2], [1], [1], [2], [0, 0, 0, 1, 1, 2], [0], [0]>} : vector<4x4x4xbf16>, vector<4x4x16xbf16>, vector<4x4x16xf32> -> vector<4x4x16xf32>
    "tpu.trace_stop"() : () -> ()
    %c0_35 = arith.constant 0 : index
    %c0_36 = arith.constant 0 : index
    %c16 = arith.constant 16 : index
    %90 = vector.load %arg11[%c0_35, %c0_36, %c16] : memref<4x4x32xf32, #tpu.memory_space<vmem>>, vector<4x4x16xf32>
    tpu.vector_store %arg11[%c0_35, %c0_36, %c16], %89 {strides = array<i32>} : memref<4x4x32xf32, #tpu.memory_space<vmem>>, vector<4x4x16xf32>,
    %c0_37 = arith.constant 0 : index
    %c0_38 = arith.constant 0 : index
    %c0_39 = arith.constant 0 : index
    %91 = vector.load %arg11[%c0_37, %c0_38, %c0_39] : memref<4x4x32xf32, #tpu.memory_space<vmem>>, vector<4x4x32xf32>
    %92 = vector.shape_cast %91 : vector<4x4x32xf32> to vector<16x32xf32>
    %c0_40 = arith.constant 0 : index
    %c0_41 = arith.constant 0 : index
    %93 = vector.load %arg8[%c0_40, %c0_41] : memref<32x32xbf16, #tpu.memory_space<vmem>>, vector<32x32xbf16>
    %94 = arith.truncf %92 : vector<16x32xf32> to vector<16x32xbf16>
    %cst_42 = arith.constant dense<0.000000e+00> : vector<16x32xf32>
    %95 = tpu.matmul %94, %93, %cst_42 {dimension_numbers = #tpu.dot_dimension_numbers<[1], [0], [0], [1], [0, 0, 1, 1], [], []>} : vector<16x32xbf16>, vector<32x32xbf16>, vector<16x32xf32> -> vector<16x32xf32>
    %c0_43 = arith.constant 0 : index
    %c0_44 = arith.constant 0 : index
    %96 = vector.load %arg9[%c0_43, %c0_44] : memref<1x32xf32, #tpu.memory_space<vmem>>, vector<1x32xf32>
    %97 = vector.broadcast %96 : vector<1x32xf32> to vector<16x32xf32>
    %98 = arith.addf %95, %97 : vector<16x32xf32>
    %99 = arith.addf %0, %98 : vector<16x32xf32>
    %c0_45 = arith.constant 0 : index
    %c0_46 = arith.constant 0 : index
    %100 = vector.load %arg10[%c0_45, %c0_46] : memref<16x32xf32, #tpu.memory_space<vmem>>, vector<16x32xf32>
    tpu.vector_store %arg10[%c0_45, %c0_46], %99 {strides = array<i32>} : memref<16x32xf32, #tpu.memory_space<vmem>>, vector<16x32xf32>,
    return
  }
  func.func @transform_0(%arg0: i32) -> (i32, i32) {
    %c0_i32 = arith.constant 0 : i32
    %c0_i32_0 = arith.constant 0 : i32
    return %arg0, %c0_i32 : i32, i32
  }
  func.func @transform_1(%arg0: i32) -> (i32, i32) {
    %c0_i32 = arith.constant 0 : i32
    %c0_i32_0 = arith.constant 0 : i32
    %c0_i32_1 = arith.constant 0 : i32
    return %c0_i32, %c0_i32_0 : i32, i32
  }
  func.func @transform_2(%arg0: i32) -> (i32, i32) {
    %c0_i32 = arith.constant 0 : i32
    %c0_i32_0 = arith.constant 0 : i32
    %c0_i32_1 = arith.constant 0 : i32
    return %c0_i32, %c0_i32_0 : i32, i32
  }
  func.func @transform_3(%arg0: i32) -> (i32, i32) {
    %c0_i32 = arith.constant 0 : i32
    %c0_i32_0 = arith.constant 0 : i32
    %c0_i32_1 = arith.constant 0 : i32
    return %c0_i32, %c0_i32_0 : i32, i32
  }
  func.func @transform_4(%arg0: i32) -> (i32, i32) {
    %c0_i32 = arith.constant 0 : i32
    %c0_i32_0 = arith.constant 0 : i32
    %c0_i32_1 = arith.constant 0 : i32
    return %c0_i32, %c0_i32_0 : i32, i32
  }
  func.func @transform_5(%arg0: i32) -> (i32, i32, i32) {
    %c0_i32 = arith.constant 0 : i32
    %c0_i32_0 = arith.constant 0 : i32
    %c0_i32_1 = arith.constant 0 : i32
    %c0_i32_2 = arith.constant 0 : i32
    return %c0_i32, %c0_i32_0, %c0_i32_1 : i32, i32, i32
  }
  func.func @transform_6(%arg0: i32) -> (i32, i32, i32) {
    %c0_i32 = arith.constant 0 : i32
    %c0_i32_0 = arith.constant 0 : i32
    %c0_i32_1 = arith.constant 0 : i32
    %c0_i32_2 = arith.constant 0 : i32
    return %c0_i32, %c0_i32_0, %c0_i32_1 : i32, i32, i32
  }
  func.func @transform_7(%arg0: i32) -> (i32, i32) {
    %c0_i32 = arith.constant 0 : i32
    %c0_i32_0 = arith.constant 0 : i32
    %c0_i32_1 = arith.constant 0 : i32
    return %c0_i32, %c0_i32_0 : i32, i32
  }
  func.func @transform_8(%arg0: i32) -> (i32, i32) {
    %c0_i32 = arith.constant 0 : i32
    %c0_i32_0 = arith.constant 0 : i32
    %c0_i32_1 = arith.constant 0 : i32
    return %c0_i32, %c0_i32_0 : i32, i32
  }
  func.func @transform_9(%arg0: i32) -> (i32, i32) {
    %c0_i32 = arith.constant 0 : i32
    %c0_i32_0 = arith.constant 0 : i32
    return %arg0, %c0_i32 : i32, i32
  }
}

module attributes {stable_mosaic.version = 11 : i64} {
  func.func @_mlp_kernel(%arg0: i32, %arg1: memref<16x32xf32, #tpu.memory_space<vmem>>, %arg2: memref<1x32xf32, #tpu.memory_space<vmem>>, %arg3: memref<1x32xf32, #tpu.memory_space<vmem>>, %arg4: memref<32x128xbf16, #tpu.memory_space<vmem>>, %arg5: memref<1x128xf32, #tpu.memory_space<vmem>>, %arg6: memref<128x32xbf16, #tpu.memory_space<vmem>>, %arg7: memref<1x32xf32, #tpu.memory_space<vmem>>, %arg8: memref<16x32xf32, #tpu.memory_space<vmem>>) attributes {dimension_semantics = [#tpu.dimension_semantics<parallel>], iteration_bounds = array<i64: 2>, scalar_prefetch = 0 : i64, scratch_operands = 0 : i64, tpu.core_type = #tpu.core_type<tc>, window_params = [{transform_indices = @transform_0, window_bounds = array<i64: 16, 32>}, {pipeline_mode = #tpu.pipeline_mode<synchronous>, transform_indices = @transform_1, window_bounds = array<i64: 1, 32>}, {pipeline_mode = #tpu.pipeline_mode<synchronous>, transform_indices = @transform_2, window_bounds = array<i64: 1, 32>}, {pipeline_mode = #tpu.pipeline_mode<synchronous>, transform_indices = @transform_3, window_bounds = array<i64: 32, 128>}, {pipeline_mode = #tpu.pipeline_mode<synchronous>, transform_indices = @transform_4, window_bounds = array<i64: 1, 128>}, {pipeline_mode = #tpu.pipeline_mode<synchronous>, transform_indices = @transform_5, window_bounds = array<i64: 128, 32>}, {pipeline_mode = #tpu.pipeline_mode<synchronous>, transform_indices = @transform_6, window_bounds = array<i64: 1, 32>}, {transform_indices = @transform_7, window_bounds = array<i64: 16, 32>}]} {
    %c0 = arith.constant 0 : index
    %c0_0 = arith.constant 0 : index
    %0 = vector.load %arg1[%c0, %c0_0] : memref<16x32xf32, #tpu.memory_space<vmem>>, vector<16x32xf32>
    %c0_1 = arith.constant 0 : index
    %c0_2 = arith.constant 0 : index
    %1 = vector.load %arg2[%c0_1, %c0_2] : memref<1x32xf32, #tpu.memory_space<vmem>>, vector<1x32xf32>
    %c0_3 = arith.constant 0 : index
    %c0_4 = arith.constant 0 : index
    %2 = vector.load %arg3[%c0_3, %c0_4] : memref<1x32xf32, #tpu.memory_space<vmem>>, vector<1x32xf32>
    %cst = arith.constant dense<0.000000e+00> : vector<16xf32>
    %3 = vector.multi_reduction <add>, %0, %cst [1] : vector<16x32xf32> to vector<16xf32>
    %4 = vector.shape_cast %3 : vector<16xf32> to vector<16x1xf32>
    %cst_5 = arith.constant 3.200000e+01 : f32
    %5 = vector.broadcast %cst_5 : f32 to vector<16x1xf32>
    %6 = arith.divf %4, %5 : vector<16x1xf32>
    %7 = vector.broadcast %6 : vector<16x1xf32> to vector<16x32xf32>
    %8 = arith.subf %0, %7 : vector<16x32xf32>
    %9 = arith.mulf %8, %8 : vector<16x32xf32>
    %cst_6 = arith.constant dense<0.000000e+00> : vector<16xf32>
    %10 = vector.multi_reduction <add>, %9, %cst_6 [1] : vector<16x32xf32> to vector<16xf32>
    %11 = vector.shape_cast %10 : vector<16xf32> to vector<16x1xf32>
    %cst_7 = arith.constant 3.200000e+01 : f32
    %12 = vector.broadcast %cst_7 : f32 to vector<16x1xf32>
    %13 = arith.divf %11, %12 : vector<16x1xf32>
    %14 = vector.broadcast %6 : vector<16x1xf32> to vector<16x32xf32>
    %15 = arith.subf %0, %14 : vector<16x32xf32>
    %cst_8 = arith.constant 9.99999974E-6 : f32
    %16 = vector.broadcast %cst_8 : f32 to vector<16x1xf32>
    %17 = arith.addf %13, %16 : vector<16x1xf32>
    %18 = math.rsqrt %17 : vector<16x1xf32>
    %19 = vector.broadcast %18 : vector<16x1xf32> to vector<16x32xf32>
    %20 = arith.mulf %15, %19 : vector<16x32xf32>
    %21 = vector.broadcast %1 : vector<1x32xf32> to vector<16x32xf32>
    %22 = arith.mulf %20, %21 : vector<16x32xf32>
    %23 = vector.broadcast %2 : vector<1x32xf32> to vector<16x32xf32>
    %24 = arith.addf %22, %23 : vector<16x32xf32>
    %c0_9 = arith.constant 0 : index
    %c0_10 = arith.constant 0 : index
    %25 = vector.load %arg4[%c0_9, %c0_10] : memref<32x128xbf16, #tpu.memory_space<vmem>>, vector<32x128xbf16>
    %26 = arith.truncf %24 : vector<16x32xf32> to vector<16x32xbf16>
    %cst_11 = arith.constant dense<0.000000e+00> : vector<16x128xf32>
    %27 = tpu.matmul %26, %25, %cst_11 {dimension_numbers = #tpu.dot_dimension_numbers<[1], [0], [0], [1], [0, 0, 1, 1], [], []>} : vector<16x32xbf16>, vector<32x128xbf16>, vector<16x128xf32> -> vector<16x128xf32>
    %c0_12 = arith.constant 0 : index
    %c0_13 = arith.constant 0 : index
    %28 = vector.load %arg5[%c0_12, %c0_13] : memref<1x128xf32, #tpu.memory_space<vmem>>, vector<1x128xf32>
    %29 = vector.broadcast %28 : vector<1x128xf32> to vector<16x128xf32>
    %30 = arith.addf %27, %29 : vector<16x128xf32>
    %cst_14 = arith.constant 5.000000e-01 : f32
    %31 = vector.broadcast %cst_14 : f32 to vector<16x128xf32>
    %32 = arith.mulf %31, %30 : vector<16x128xf32>
    %cst_15 = arith.constant 0.707106769 : f32
    %33 = vector.broadcast %cst_15 : f32 to vector<16x128xf32>
    %34 = arith.mulf %30, %33 : vector<16x128xf32>
    %35 = math.absf %34 : vector<16x128xf32>
    %cst_16 = arith.constant 0.327591091 : f32
    %36 = vector.broadcast %cst_16 : f32 to vector<16x128xf32>
    %37 = arith.mulf %36, %35 : vector<16x128xf32>
    %cst_17 = arith.constant 1.000000e+00 : f32
    %38 = vector.broadcast %cst_17 : f32 to vector<16x128xf32>
    %39 = arith.addf %38, %37 : vector<16x128xf32>
    %cst_18 = arith.constant 1.000000e+00 : f32
    %40 = vector.broadcast %cst_18 : f32 to vector<16x128xf32>
    %41 = arith.divf %40, %39 : vector<16x128xf32>
    %cst_19 = arith.constant 1.06140542 : f32
    %42 = vector.broadcast %cst_19 : f32 to vector<16x128xf32>
    %43 = arith.mulf %42, %41 : vector<16x128xf32>
    %cst_20 = arith.constant -1.45315206 : f32
    %44 = vector.broadcast %cst_20 : f32 to vector<16x128xf32>
    %45 = arith.addf %43, %44 : vector<16x128xf32>
    %46 = arith.mulf %45, %41 : vector<16x128xf32>
    %cst_21 = arith.constant 1.42141378 : f32
    %47 = vector.broadcast %cst_21 : f32 to vector<16x128xf32>
    %48 = arith.addf %46, %47 : vector<16x128xf32>
    %49 = arith.mulf %48, %41 : vector<16x128xf32>
    %cst_22 = arith.constant -0.284496725 : f32
    %50 = vector.broadcast %cst_22 : f32 to vector<16x128xf32>
    %51 = arith.addf %49, %50 : vector<16x128xf32>
    %52 = arith.mulf %51, %41 : vector<16x128xf32>
    %cst_23 = arith.constant 0.254829586 : f32
    %53 = vector.broadcast %cst_23 : f32 to vector<16x128xf32>
    %54 = arith.addf %52, %53 : vector<16x128xf32>
    %55 = arith.mulf %54, %41 : vector<16x128xf32>
    %cst_24 = arith.constant 0.000000e+00 : f32
    %56 = vector.broadcast %cst_24 : f32 to vector<16x128xf32>
    %57 = arith.subf %56, %35 : vector<16x128xf32>
    %58 = arith.mulf %57, %35 : vector<16x128xf32>
    %59 = math.exp %58 : vector<16x128xf32>
    %60 = arith.mulf %55, %59 : vector<16x128xf32>
    %cst_25 = arith.constant 1.000000e+00 : f32
    %61 = vector.broadcast %cst_25 : f32 to vector<16x128xf32>
    %62 = arith.subf %61, %60 : vector<16x128xf32>
    %cst_26 = arith.constant 0.000000e+00 : f32
    %63 = vector.broadcast %cst_26 : f32 to vector<16x128xf32>
    %64 = arith.cmpf olt, %34, %63 : vector<16x128xf32>
    %cst_27 = arith.constant 0.000000e+00 : f32
    %65 = vector.broadcast %cst_27 : f32 to vector<16x128xf32>
    %66 = arith.subf %65, %62 : vector<16x128xf32>
    %67 = arith.select %64, %66, %62 : vector<16x128xi1>, vector<16x128xf32>
    %cst_28 = arith.constant 1.000000e+00 : f32
    %68 = vector.broadcast %cst_28 : f32 to vector<16x128xf32>
    %69 = arith.addf %68, %67 : vector<16x128xf32>
    %70 = arith.mulf %32, %69 : vector<16x128xf32>
    %c0_29 = arith.constant 0 : index
    %c0_30 = arith.constant 0 : index
    %71 = vector.load %arg6[%c0_29, %c0_30] : memref<128x32xbf16, #tpu.memory_space<vmem>>, vector<128x32xbf16>
    %72 = arith.truncf %70 : vector<16x128xf32> to vector<16x128xbf16>
    %cst_31 = arith.constant dense<0.000000e+00> : vector<16x32xf32>
    %73 = tpu.matmul %72, %71, %cst_31 {dimension_numbers = #tpu.dot_dimension_numbers<[1], [0], [0], [1], [0, 0, 1, 1], [], []>} : vector<16x128xbf16>, vector<128x32xbf16>, vector<16x32xf32> -> vector<16x32xf32>
    %c0_32 = arith.constant 0 : index
    %c0_33 = arith.constant 0 : index
    %74 = vector.load %arg7[%c0_32, %c0_33] : memref<1x32xf32, #tpu.memory_space<vmem>>, vector<1x32xf32>
    %75 = vector.broadcast %74 : vector<1x32xf32> to vector<16x32xf32>
    %76 = arith.addf %73, %75 : vector<16x32xf32>
    %77 = arith.addf %0, %76 : vector<16x32xf32>
    %c0_34 = arith.constant 0 : index
    %c0_35 = arith.constant 0 : index
    %78 = vector.load %arg8[%c0_34, %c0_35] : memref<16x32xf32, #tpu.memory_space<vmem>>, vector<16x32xf32>
    tpu.vector_store %arg8[%c0_34, %c0_35], %77 {strides = array<i32>} : memref<16x32xf32, #tpu.memory_space<vmem>>, vector<16x32xf32>,
    return
  }
  func.func @transform_0(%arg0: i32) -> (i32, i32) {
    %c0_i32 = arith.constant 0 : i32
    %c0_i32_0 = arith.constant 0 : i32
    return %arg0, %c0_i32 : i32, i32
  }
  func.func @transform_1(%arg0: i32) -> (i32, i32) {
    %c0_i32 = arith.constant 0 : i32
    %c0_i32_0 = arith.constant 0 : i32
    %c0_i32_1 = arith.constant 0 : i32
    return %c0_i32, %c0_i32_0 : i32, i32
  }
  func.func @transform_2(%arg0: i32) -> (i32, i32) {
    %c0_i32 = arith.constant 0 : i32
    %c0_i32_0 = arith.constant 0 : i32
    %c0_i32_1 = arith.constant 0 : i32
    return %c0_i32, %c0_i32_0 : i32, i32
  }
  func.func @transform_3(%arg0: i32) -> (i32, i32) {
    %c0_i32 = arith.constant 0 : i32
    %c0_i32_0 = arith.constant 0 : i32
    %c0_i32_1 = arith.constant 0 : i32
    return %c0_i32, %c0_i32_0 : i32, i32
  }
  func.func @transform_4(%arg0: i32) -> (i32, i32) {
    %c0_i32 = arith.constant 0 : i32
    %c0_i32_0 = arith.constant 0 : i32
    %c0_i32_1 = arith.constant 0 : i32
    return %c0_i32, %c0_i32_0 : i32, i32
  }
  func.func @transform_5(%arg0: i32) -> (i32, i32) {
    %c0_i32 = arith.constant 0 : i32
    %c0_i32_0 = arith.constant 0 : i32
    %c0_i32_1 = arith.constant 0 : i32
    return %c0_i32, %c0_i32_0 : i32, i32
  }
  func.func @transform_6(%arg0: i32) -> (i32, i32) {
    %c0_i32 = arith.constant 0 : i32
    %c0_i32_0 = arith.constant 0 : i32
    %c0_i32_1 = arith.constant 0 : i32
    return %c0_i32, %c0_i32_0 : i32, i32
  }
  func.func @transform_7(%arg0: i32) -> (i32, i32) {
    %c0_i32 = arith.constant 0 : i32
    %c0_i32_0 = arith.constant 0 : i32
    return %arg0, %c0_i32 : i32, i32
  }
}

module attributes {stable_mosaic.version = 11 : i64} {
  func.func @_window_attn_kernel(%arg0: i32, %arg1: memref<16x32xf32, #tpu.memory_space<vmem>>, %arg2: memref<1x32xf32, #tpu.memory_space<vmem>>, %arg3: memref<1x32xf32, #tpu.memory_space<vmem>>, %arg4: memref<32x96xbf16, #tpu.memory_space<vmem>>, %arg5: memref<1x96xf32, #tpu.memory_space<vmem>>, %arg6: memref<2x4x4xf32, #tpu.memory_space<vmem>>, %arg7: memref<4x4x4xf32, #tpu.memory_space<vmem>>, %arg8: memref<32x32xbf16, #tpu.memory_space<vmem>>, %arg9: memref<1x32xf32, #tpu.memory_space<vmem>>, %arg10: memref<16x32xf32, #tpu.memory_space<vmem>>, %arg11: memref<4x4x32xf32, #tpu.memory_space<vmem>>) attributes {dimension_semantics = [#tpu.dimension_semantics<parallel>], iteration_bounds = array<i64: 2>, scalar_prefetch = 0 : i64, scratch_operands = 1 : i64, tpu.core_type = #tpu.core_type<tc>, window_params = [{transform_indices = @transform_0, window_bounds = array<i64: 16, 32>}, {pipeline_mode = #tpu.pipeline_mode<synchronous>, transform_indices = @transform_1, window_bounds = array<i64: 1, 32>}, {pipeline_mode = #tpu.pipeline_mode<synchronous>, transform_indices = @transform_2, window_bounds = array<i64: 1, 32>}, {pipeline_mode = #tpu.pipeline_mode<synchronous>, transform_indices = @transform_3, window_bounds = array<i64: 32, 96>}, {pipeline_mode = #tpu.pipeline_mode<synchronous>, transform_indices = @transform_4, window_bounds = array<i64: 1, 96>}, {pipeline_mode = #tpu.pipeline_mode<synchronous>, transform_indices = @transform_5, window_bounds = array<i64: 2, 4, 4>}, {transform_indices = @transform_6, window_bounds = array<i64: 4, 4, 4>}, {pipeline_mode = #tpu.pipeline_mode<synchronous>, transform_indices = @transform_7, window_bounds = array<i64: 32, 32>}, {pipeline_mode = #tpu.pipeline_mode<synchronous>, transform_indices = @transform_8, window_bounds = array<i64: 1, 32>}, {transform_indices = @transform_9, window_bounds = array<i64: 16, 32>}]} {
    %c0 = arith.constant 0 : index
    %c0_0 = arith.constant 0 : index
    %0 = vector.load %arg1[%c0, %c0_0] : memref<16x32xf32, #tpu.memory_space<vmem>>, vector<16x32xf32>
    %c0_1 = arith.constant 0 : index
    %c0_2 = arith.constant 0 : index
    %1 = vector.load %arg2[%c0_1, %c0_2] : memref<1x32xf32, #tpu.memory_space<vmem>>, vector<1x32xf32>
    %c0_3 = arith.constant 0 : index
    %c0_4 = arith.constant 0 : index
    %2 = vector.load %arg3[%c0_3, %c0_4] : memref<1x32xf32, #tpu.memory_space<vmem>>, vector<1x32xf32>
    %cst = arith.constant dense<0.000000e+00> : vector<16xf32>
    %3 = vector.multi_reduction <add>, %0, %cst [1] : vector<16x32xf32> to vector<16xf32>
    %4 = vector.shape_cast %3 : vector<16xf32> to vector<16x1xf32>
    %cst_5 = arith.constant 3.200000e+01 : f32
    %5 = vector.broadcast %cst_5 : f32 to vector<16x1xf32>
    %6 = arith.divf %4, %5 : vector<16x1xf32>
    %7 = vector.broadcast %6 : vector<16x1xf32> to vector<16x32xf32>
    %8 = arith.subf %0, %7 : vector<16x32xf32>
    %9 = arith.mulf %8, %8 : vector<16x32xf32>
    %cst_6 = arith.constant dense<0.000000e+00> : vector<16xf32>
    %10 = vector.multi_reduction <add>, %9, %cst_6 [1] : vector<16x32xf32> to vector<16xf32>
    %11 = vector.shape_cast %10 : vector<16xf32> to vector<16x1xf32>
    %cst_7 = arith.constant 3.200000e+01 : f32
    %12 = vector.broadcast %cst_7 : f32 to vector<16x1xf32>
    %13 = arith.divf %11, %12 : vector<16x1xf32>
    %14 = vector.broadcast %6 : vector<16x1xf32> to vector<16x32xf32>
    %15 = arith.subf %0, %14 : vector<16x32xf32>
    %cst_8 = arith.constant 9.99999974E-6 : f32
    %16 = vector.broadcast %cst_8 : f32 to vector<16x1xf32>
    %17 = arith.addf %13, %16 : vector<16x1xf32>
    %18 = math.rsqrt %17 : vector<16x1xf32>
    %19 = vector.broadcast %18 : vector<16x1xf32> to vector<16x32xf32>
    %20 = arith.mulf %15, %19 : vector<16x32xf32>
    %21 = vector.broadcast %1 : vector<1x32xf32> to vector<16x32xf32>
    %22 = arith.mulf %20, %21 : vector<16x32xf32>
    %23 = vector.broadcast %2 : vector<1x32xf32> to vector<16x32xf32>
    %24 = arith.addf %22, %23 : vector<16x32xf32>
    %c0_9 = arith.constant 0 : index
    %c0_10 = arith.constant 0 : index
    %25 = vector.load %arg4[%c0_9, %c0_10] : memref<32x96xbf16, #tpu.memory_space<vmem>>, vector<32x96xbf16>
    %26 = arith.truncf %24 : vector<16x32xf32> to vector<16x32xbf16>
    %cst_11 = arith.constant dense<0.000000e+00> : vector<16x96xf32>
    %27 = tpu.matmul %26, %25, %cst_11 {dimension_numbers = #tpu.dot_dimension_numbers<[1], [0], [0], [1], [0, 0, 1, 1], [], []>} : vector<16x32xbf16>, vector<32x96xbf16>, vector<16x96xf32> -> vector<16x96xf32>
    %c0_12 = arith.constant 0 : index
    %c0_13 = arith.constant 0 : index
    %28 = vector.load %arg5[%c0_12, %c0_13] : memref<1x96xf32, #tpu.memory_space<vmem>>, vector<1x96xf32>
    %29 = vector.broadcast %28 : vector<1x96xf32> to vector<16x96xf32>
    %30 = arith.addf %27, %29 : vector<16x96xf32>
    %31 = vector.shape_cast %30 : vector<16x96xf32> to vector<4x4x96xf32>
    %c0_14 = arith.constant 0 : index
    %c0_15 = arith.constant 0 : index
    %c0_16 = arith.constant 0 : index
    %32 = vector.load %arg7[%c0_14, %c0_15, %c0_16] : memref<4x4x4xf32, #tpu.memory_space<vmem>>, vector<4x4x4xf32>
    %33 = vector.extract_strided_slice %31 {offsets = [0, 0, 0], sizes = [4, 4, 16], strides = [1, 1, 1]} : vector<4x4x96xf32> to vector<4x4x16xf32>
    %cst_17 = arith.constant 2.500000e-01 : f32
    %34 = vector.broadcast %cst_17 : f32 to vector<4x4x16xf32>
    %35 = arith.mulf %33, %34 : vector<4x4x16xf32>
    %36 = vector.extract_strided_slice %31 {offsets = [0, 0, 32], sizes = [4, 4, 16], strides = [1, 1, 1]} : vector<4x4x96xf32> to vector<4x4x16xf32>
    %37 = vector.extract_strided_slice %31 {offsets = [0, 0, 64], sizes = [4, 4, 16], strides = [1, 1, 1]} : vector<4x4x96xf32> to vector<4x4x16xf32>
    %38 = arith.truncf %35 : vector<4x4x16xf32> to vector<4x4x16xbf16>
    %39 = arith.truncf %36 : vector<4x4x16xf32> to vector<4x4x16xbf16>
    "tpu.trace_start"() <{level = 10 : i32, message = "gnd,gmd->gnm"}> : () -> ()
    %cst_18 = arith.constant dense<0.000000e+00> : vector<4x4x4xf32>
    %40 = tpu.matmul %38, %39, %cst_18 {dimension_numbers = #tpu.dot_dimension_numbers<[2], [2], [1], [1], [0, 0, 0, 1, 1, 1], [0], [0]>} : vector<4x4x16xbf16>, vector<4x4x16xbf16>, vector<4x4x4xf32> -> vector<4x4x4xf32>
    "tpu.trace_stop"() : () -> ()
    %c0_19 = arith.constant 0 : index
    %c0_20 = arith.constant 0 : index
    %c0_21 = arith.constant 0 : index
    %41 = vector.load %arg6[%c0_19, %c0_20, %c0_21] : memref<2x4x4xf32, #tpu.memory_space<vmem>>, vector<1x4x4xf32>
    %42 = vector.shape_cast %41 : vector<1x4x4xf32> to vector<4x4xf32>
    %43 = vector.shape_cast %42 : vector<4x4xf32> to vector<1x4x4xf32>
    %44 = vector.broadcast %43 : vector<1x4x4xf32> to vector<4x4x4xf32>
    %45 = arith.addf %40, %44 : vector<4x4x4xf32>
    %46 = arith.addf %45, %32 : vector<4x4x4xf32>
    %cst_22 = arith.constant dense<0xFF800000> : vector<4x4xf32>
    %47 = vector.multi_reduction <maximumf>, %46, %cst_22 [2] : vector<4x4x4xf32> to vector<4x4xf32>
    %48 = vector.shape_cast %47 : vector<4x4xf32> to vector<4x4x1xf32>
    %49 = vector.broadcast %48 : vector<4x4x1xf32> to vector<4x4x4xf32>
    %50 = arith.subf %46, %49 : vector<4x4x4xf32>
    %51 = math.exp %50 : vector<4x4x4xf32>
    %cst_23 = arith.constant dense<0.000000e+00> : vector<4x4xf32>
    %52 = vector.multi_reduction <add>, %51, %cst_23 [2] : vector<4x4x4xf32> to vector<4x4xf32>
    %53 = vector.shape_cast %52 : vector<4x4xf32> to vector<4x4x1xf32>
    %54 = tpu.reciprocal %53 {approx = true} : vector<4x4x1xf32> -> vector<4x4x1xf32>
    %55 = vector.broadcast %54 : vector<4x4x1xf32> to vector<4x4x4xf32>
    %56 = arith.mulf %51, %55 : vector<4x4x4xf32>
    %57 = arith.truncf %56 : vector<4x4x4xf32> to vector<4x4x4xbf16>
    %58 = arith.truncf %37 : vector<4x4x16xf32> to vector<4x4x16xbf16>
    "tpu.trace_start"() <{level = 10 : i32, message = "gnm,gmd->gnd"}> : () -> ()
    %cst_24 = arith.constant dense<0.000000e+00> : vector<4x4x16xf32>
    %59 = tpu.matmul %57, %58, %cst_24 {dimension_numbers = #tpu.dot_dimension_numbers<[2], [1], [1], [2], [0, 0, 0, 1, 1, 2], [0], [0]>} : vector<4x4x4xbf16>, vector<4x4x16xbf16>, vector<4x4x16xf32> -> vector<4x4x16xf32>
    "tpu.trace_stop"() : () -> ()
    %c0_25 = arith.constant 0 : index
    %c0_26 = arith.constant 0 : index
    %c0_27 = arith.constant 0 : index
    %60 = vector.load %arg11[%c0_25, %c0_26, %c0_27] : memref<4x4x32xf32, #tpu.memory_space<vmem>>, vector<4x4x16xf32>
    tpu.vector_store %arg11[%c0_25, %c0_26, %c0_27], %59 {strides = array<i32>} : memref<4x4x32xf32, #tpu.memory_space<vmem>>, vector<4x4x16xf32>,
    %61 = vector.extract_strided_slice %31 {offsets = [0, 0, 16], sizes = [4, 4, 16], strides = [1, 1, 1]} : vector<4x4x96xf32> to vector<4x4x16xf32>
    %cst_28 = arith.constant 2.500000e-01 : f32
    %62 = vector.broadcast %cst_28 : f32 to vector<4x4x16xf32>
    %63 = arith.mulf %61, %62 : vector<4x4x16xf32>
    %64 = vector.extract_strided_slice %31 {offsets = [0, 0, 48], sizes = [4, 4, 16], strides = [1, 1, 1]} : vector<4x4x96xf32> to vector<4x4x16xf32>
    %65 = vector.extract_strided_slice %31 {offsets = [0, 0, 80], sizes = [4, 4, 16], strides = [1, 1, 1]} : vector<4x4x96xf32> to vector<4x4x16xf32>
    %66 = arith.truncf %63 : vector<4x4x16xf32> to vector<4x4x16xbf16>
    %67 = arith.truncf %64 : vector<4x4x16xf32> to vector<4x4x16xbf16>
    "tpu.trace_start"() <{level = 10 : i32, message = "gnd,gmd->gnm"}> : () -> ()
    %cst_29 = arith.constant dense<0.000000e+00> : vector<4x4x4xf32>
    %68 = tpu.matmul %66, %67, %cst_29 {dimension_numbers = #tpu.dot_dimension_numbers<[2], [2], [1], [1], [0, 0, 0, 1, 1, 1], [0], [0]>} : vector<4x4x16xbf16>, vector<4x4x16xbf16>, vector<4x4x4xf32> -> vector<4x4x4xf32>
    "tpu.trace_stop"() : () -> ()
    %c1 = arith.constant 1 : index
    %c0_30 = arith.constant 0 : index
    %c0_31 = arith.constant 0 : index
    %69 = vector.load %arg6[%c1, %c0_30, %c0_31] : memref<2x4x4xf32, #tpu.memory_space<vmem>>, vector<1x4x4xf32>
    %70 = vector.shape_cast %69 : vector<1x4x4xf32> to vector<4x4xf32>
    %71 = vector.shape_cast %70 : vector<4x4xf32> to vector<1x4x4xf32>
    %72 = vector.broadcast %71 : vector<1x4x4xf32> to vector<4x4x4xf32>
    %73 = arith.addf %68, %72 : vector<4x4x4xf32>
    %74 = arith.addf %73, %32 : vector<4x4x4xf32>
    %cst_32 = arith.constant dense<0xFF800000> : vector<4x4xf32>
    %75 = vector.multi_reduction <maximumf>, %74, %cst_32 [2] : vector<4x4x4xf32> to vector<4x4xf32>
    %76 = vector.shape_cast %75 : vector<4x4xf32> to vector<4x4x1xf32>
    %77 = vector.broadcast %76 : vector<4x4x1xf32> to vector<4x4x4xf32>
    %78 = arith.subf %74, %77 : vector<4x4x4xf32>
    %79 = math.exp %78 : vector<4x4x4xf32>
    %cst_33 = arith.constant dense<0.000000e+00> : vector<4x4xf32>
    %80 = vector.multi_reduction <add>, %79, %cst_33 [2] : vector<4x4x4xf32> to vector<4x4xf32>
    %81 = vector.shape_cast %80 : vector<4x4xf32> to vector<4x4x1xf32>
    %82 = tpu.reciprocal %81 {approx = true} : vector<4x4x1xf32> -> vector<4x4x1xf32>
    %83 = vector.broadcast %82 : vector<4x4x1xf32> to vector<4x4x4xf32>
    %84 = arith.mulf %79, %83 : vector<4x4x4xf32>
    %85 = arith.truncf %84 : vector<4x4x4xf32> to vector<4x4x4xbf16>
    %86 = arith.truncf %65 : vector<4x4x16xf32> to vector<4x4x16xbf16>
    "tpu.trace_start"() <{level = 10 : i32, message = "gnm,gmd->gnd"}> : () -> ()
    %cst_34 = arith.constant dense<0.000000e+00> : vector<4x4x16xf32>
    %87 = tpu.matmul %85, %86, %cst_34 {dimension_numbers = #tpu.dot_dimension_numbers<[2], [1], [1], [2], [0, 0, 0, 1, 1, 2], [0], [0]>} : vector<4x4x4xbf16>, vector<4x4x16xbf16>, vector<4x4x16xf32> -> vector<4x4x16xf32>
    "tpu.trace_stop"() : () -> ()
    %c0_35 = arith.constant 0 : index
    %c0_36 = arith.constant 0 : index
    %c16 = arith.constant 16 : index
    %88 = vector.load %arg11[%c0_35, %c0_36, %c16] : memref<4x4x32xf32, #tpu.memory_space<vmem>>, vector<4x4x16xf32>
    tpu.vector_store %arg11[%c0_35, %c0_36, %c16], %87 {strides = array<i32>} : memref<4x4x32xf32, #tpu.memory_space<vmem>>, vector<4x4x16xf32>,
    %c0_37 = arith.constant 0 : index
    %c0_38 = arith.constant 0 : index
    %c0_39 = arith.constant 0 : index
    %89 = vector.load %arg11[%c0_37, %c0_38, %c0_39] : memref<4x4x32xf32, #tpu.memory_space<vmem>>, vector<4x4x32xf32>
    %90 = vector.shape_cast %89 : vector<4x4x32xf32> to vector<16x32xf32>
    %c0_40 = arith.constant 0 : index
    %c0_41 = arith.constant 0 : index
    %91 = vector.load %arg8[%c0_40, %c0_41] : memref<32x32xbf16, #tpu.memory_space<vmem>>, vector<32x32xbf16>
    %92 = arith.truncf %90 : vector<16x32xf32> to vector<16x32xbf16>
    %cst_42 = arith.constant dense<0.000000e+00> : vector<16x32xf32>
    %93 = tpu.matmul %92, %91, %cst_42 {dimension_numbers = #tpu.dot_dimension_numbers<[1], [0], [0], [1], [0, 0, 1, 1], [], []>} : vector<16x32xbf16>, vector<32x32xbf16>, vector<16x32xf32> -> vector<16x32xf32>
    %c0_43 = arith.constant 0 : index
    %c0_44 = arith.constant 0 : index
    %94 = vector.load %arg9[%c0_43, %c0_44] : memref<1x32xf32, #tpu.memory_space<vmem>>, vector<1x32xf32>
    %95 = vector.broadcast %94 : vector<1x32xf32> to vector<16x32xf32>
    %96 = arith.addf %93, %95 : vector<16x32xf32>
    %97 = arith.addf %0, %96 : vector<16x32xf32>
    %c0_45 = arith.constant 0 : index
    %c0_46 = arith.constant 0 : index
    %98 = vector.load %arg10[%c0_45, %c0_46] : memref<16x32xf32, #tpu.memory_space<vmem>>, vector<16x32xf32>
    tpu.vector_store %arg10[%c0_45, %c0_46], %97 {strides = array<i32>} : memref<16x32xf32, #tpu.memory_space<vmem>>, vector<16x32xf32>,
    return
  }
  func.func @transform_0(%arg0: i32) -> (i32, i32) {
    %c0_i32 = arith.constant 0 : i32
    %c0_i32_0 = arith.constant 0 : i32
    return %arg0, %c0_i32 : i32, i32
  }
  func.func @transform_1(%arg0: i32) -> (i32, i32) {
    %c0_i32 = arith.constant 0 : i32
    %c0_i32_0 = arith.constant 0 : i32
    %c0_i32_1 = arith.constant 0 : i32
    return %c0_i32, %c0_i32_0 : i32, i32
  }
  func.func @transform_2(%arg0: i32) -> (i32, i32) {
    %c0_i32 = arith.constant 0 : i32
    %c0_i32_0 = arith.constant 0 : i32
    %c0_i32_1 = arith.constant 0 : i32
    return %c0_i32, %c0_i32_0 : i32, i32
  }
  func.func @transform_3(%arg0: i32) -> (i32, i32) {
    %c0_i32 = arith.constant 0 : i32
    %c0_i32_0 = arith.constant 0 : i32
    %c0_i32_1 = arith.constant 0 : i32
    return %c0_i32, %c0_i32_0 : i32, i32
  }
  func.func @transform_4(%arg0: i32) -> (i32, i32) {
    %c0_i32 = arith.constant 0 : i32
    %c0_i32_0 = arith.constant 0 : i32
    %c0_i32_1 = arith.constant 0 : i32
    return %c0_i32, %c0_i32_0 : i32, i32
  }
  func.func @transform_5(%arg0: i32) -> (i32, i32, i32) {
    %c0_i32 = arith.constant 0 : i32
    %c0_i32_0 = arith.constant 0 : i32
    %c0_i32_1 = arith.constant 0 : i32
    %c0_i32_2 = arith.constant 0 : i32
    return %c0_i32, %c0_i32_0, %c0_i32_1 : i32, i32, i32
  }
  func.func @transform_6(%arg0: i32) -> (i32, i32, i32) {
    %c1_i32 = arith.constant 1 : i32
    %c0_i32 = arith.constant 0 : i32
    %0 = arith.cmpi eq, %c1_i32, %c0_i32 : i32
    %c1_i32_0 = arith.constant 1 : i32
    %1 = arith.select %0, %c1_i32_0, %c1_i32 : i32
    %2 = arith.remsi %arg0, %1 : i32
    %c0_i32_1 = arith.constant 0 : i32
    %3 = arith.cmpi ne, %2, %c0_i32_1 : i32
    %c0_i32_2 = arith.constant 0 : i32
    %4 = arith.cmpi slt, %2, %c0_i32_2 : i32
    %c0_i32_3 = arith.constant 0 : i32
    %5 = arith.cmpi slt, %1, %c0_i32_3 : i32
    %6 = arith.xori %4, %5 : i1
    %7 = arith.andi %6, %3 : i1
    %8 = arith.addi %2, %1 : i32
    %9 = arith.select %7, %8, %2 : i32
    %c0_i32_4 = arith.constant 0 : i32
    %c0_i32_5 = arith.constant 0 : i32
    %c0_i32_6 = arith.constant 0 : i32
    return %9, %c0_i32_4, %c0_i32_5 : i32, i32, i32
  }
  func.func @transform_7(%arg0: i32) -> (i32, i32) {
    %c0_i32 = arith.constant 0 : i32
    %c0_i32_0 = arith.constant 0 : i32
    %c0_i32_1 = arith.constant 0 : i32
    return %c0_i32, %c0_i32_0 : i32, i32
  }
  func.func @transform_8(%arg0: i32) -> (i32, i32) {
    %c0_i32 = arith.constant 0 : i32
    %c0_i32_0 = arith.constant 0 : i32
    %c0_i32_1 = arith.constant 0 : i32
    return %c0_i32, %c0_i32_0 : i32, i32
  }
  func.func @transform_9(%arg0: i32) -> (i32, i32) {
    %c0_i32 = arith.constant 0 : i32
    %c0_i32_0 = arith.constant 0 : i32
    return %arg0, %c0_i32 : i32, i32
  }
}

module attributes {stable_mosaic.version = 11 : i64} {
  func.func @_ln_matmul_kernel(%arg0: i32, %arg1: memref<8x128xf32, #tpu.memory_space<vmem>>, %arg2: memref<1x128xf32, #tpu.memory_space<vmem>>, %arg3: memref<1x128xf32, #tpu.memory_space<vmem>>, %arg4: memref<128x64xbf16, #tpu.memory_space<vmem>>, %arg5: memref<1x64xf32, #tpu.memory_space<vmem>>, %arg6: memref<8x64xf32, #tpu.memory_space<vmem>>) attributes {dimension_semantics = [#tpu.dimension_semantics<parallel>], iteration_bounds = array<i64: 1>, scalar_prefetch = 0 : i64, scratch_operands = 0 : i64, tpu.core_type = #tpu.core_type<tc>, window_params = [{transform_indices = @transform_0, window_bounds = array<i64: 8, 128>}, {pipeline_mode = #tpu.pipeline_mode<synchronous>, transform_indices = @transform_1, window_bounds = array<i64: 1, 128>}, {pipeline_mode = #tpu.pipeline_mode<synchronous>, transform_indices = @transform_2, window_bounds = array<i64: 1, 128>}, {pipeline_mode = #tpu.pipeline_mode<synchronous>, transform_indices = @transform_3, window_bounds = array<i64: 128, 64>}, {pipeline_mode = #tpu.pipeline_mode<synchronous>, transform_indices = @transform_4, window_bounds = array<i64: 1, 64>}, {transform_indices = @transform_5, window_bounds = array<i64: 8, 64>}]} {
    %c0 = arith.constant 0 : index
    %c0_0 = arith.constant 0 : index
    %0 = vector.load %arg1[%c0, %c0_0] : memref<8x128xf32, #tpu.memory_space<vmem>>, vector<8x128xf32>
    %c0_1 = arith.constant 0 : index
    %c0_2 = arith.constant 0 : index
    %1 = vector.load %arg2[%c0_1, %c0_2] : memref<1x128xf32, #tpu.memory_space<vmem>>, vector<1x128xf32>
    %c0_3 = arith.constant 0 : index
    %c0_4 = arith.constant 0 : index
    %2 = vector.load %arg3[%c0_3, %c0_4] : memref<1x128xf32, #tpu.memory_space<vmem>>, vector<1x128xf32>
    %cst = arith.constant dense<0.000000e+00> : vector<8xf32>
    %3 = vector.multi_reduction <add>, %0, %cst [1] : vector<8x128xf32> to vector<8xf32>
    %4 = vector.shape_cast %3 : vector<8xf32> to vector<8x1xf32>
    %cst_5 = arith.constant 1.280000e+02 : f32
    %5 = vector.broadcast %cst_5 : f32 to vector<8x1xf32>
    %6 = arith.divf %4, %5 : vector<8x1xf32>
    %7 = vector.broadcast %6 : vector<8x1xf32> to vector<8x128xf32>
    %8 = arith.subf %0, %7 : vector<8x128xf32>
    %9 = arith.mulf %8, %8 : vector<8x128xf32>
    %cst_6 = arith.constant dense<0.000000e+00> : vector<8xf32>
    %10 = vector.multi_reduction <add>, %9, %cst_6 [1] : vector<8x128xf32> to vector<8xf32>
    %11 = vector.shape_cast %10 : vector<8xf32> to vector<8x1xf32>
    %cst_7 = arith.constant 1.280000e+02 : f32
    %12 = vector.broadcast %cst_7 : f32 to vector<8x1xf32>
    %13 = arith.divf %11, %12 : vector<8x1xf32>
    %14 = vector.broadcast %6 : vector<8x1xf32> to vector<8x128xf32>
    %15 = arith.subf %0, %14 : vector<8x128xf32>
    %cst_8 = arith.constant 9.99999974E-6 : f32
    %16 = vector.broadcast %cst_8 : f32 to vector<8x1xf32>
    %17 = arith.addf %13, %16 : vector<8x1xf32>
    %18 = math.rsqrt %17 : vector<8x1xf32>
    %19 = vector.broadcast %18 : vector<8x1xf32> to vector<8x128xf32>
    %20 = arith.mulf %15, %19 : vector<8x128xf32>
    %21 = vector.broadcast %1 : vector<1x128xf32> to vector<8x128xf32>
    %22 = arith.mulf %20, %21 : vector<8x128xf32>
    %23 = vector.broadcast %2 : vector<1x128xf32> to vector<8x128xf32>
    %24 = arith.addf %22, %23 : vector<8x128xf32>
    %c0_9 = arith.constant 0 : index
    %c0_10 = arith.constant 0 : index
    %25 = vector.load %arg4[%c0_9, %c0_10] : memref<128x64xbf16, #tpu.memory_space<vmem>>, vector<128x64xbf16>
    %26 = arith.truncf %24 : vector<8x128xf32> to vector<8x128xbf16>
    %cst_11 = arith.constant dense<0.000000e+00> : vector<8x64xf32>
    %27 = tpu.matmul %26, %25, %cst_11 {dimension_numbers = #tpu.dot_dimension_numbers<[1], [0], [0], [1], [0, 0, 1, 1], [], []>} : vector<8x128xbf16>, vector<128x64xbf16>, vector<8x64xf32> -> vector<8x64xf32>
    %c0_12 = arith.constant 0 : index
    %c0_13 = arith.constant 0 : index
    %28 = vector.load %arg5[%c0_12, %c0_13] : memref<1x64xf32, #tpu.memory_space<vmem>>, vector<1x64xf32>
    %29 = vector.broadcast %28 : vector<1x64xf32> to vector<8x64xf32>
    %30 = arith.addf %27, %29 : vector<8x64xf32>
    %c0_14 = arith.constant 0 : index
    %c0_15 = arith.constant 0 : index
    %31 = vector.load %arg6[%c0_14, %c0_15] : memref<8x64xf32, #tpu.memory_space<vmem>>, vector<8x64xf32>
    tpu.vector_store %arg6[%c0_14, %c0_15], %30 {strides = array<i32>} : memref<8x64xf32, #tpu.memory_space<vmem>>, vector<8x64xf32>,
    return
  }
  func.func @transform_0(%arg0: i32) -> (i32, i32) {
    %c0_i32 = arith.constant 0 : i32
    %c0_i32_0 = arith.constant 0 : i32
    return %arg0, %c0_i32 : i32, i32
  }
  func.func @transform_1(%arg0: i32) -> (i32, i32) {
    %c0_i32 = arith.constant 0 : i32
    %c0_i32_0 = arith.constant 0 : i32
    %c0_i32_1 = arith.constant 0 : i32
    return %c0_i32, %c0_i32_0 : i32, i32
  }
  func.func @transform_2(%arg0: i32) -> (i32, i32) {
    %c0_i32 = arith.constant 0 : i32
    %c0_i32_0 = arith.constant 0 : i32
    %c0_i32_1 = arith.constant 0 : i32
    return %c0_i32, %c0_i32_0 : i32, i32
  }
  func.func @transform_3(%arg0: i32) -> (i32, i32) {
    %c0_i32 = arith.constant 0 : i32
    %c0_i32_0 = arith.constant 0 : i32
    %c0_i32_1 = arith.constant 0 : i32
    return %c0_i32, %c0_i32_0 : i32, i32
  }
  func.func @transform_4(%arg0: i32) -> (i32, i32) {
    %c0_i32 = arith.constant 0 : i32
    %c0_i32_0 = arith.constant 0 : i32
    %c0_i32_1 = arith.constant 0 : i32
    return %c0_i32, %c0_i32_0 : i32, i32
  }
  func.func @transform_5(%arg0: i32) -> (i32, i32) {
    %c0_i32 = arith.constant 0 : i32
    %c0_i32_0 = arith.constant 0 : i32
    return %arg0, %c0_i32 : i32, i32
  }
}

module attributes {stable_mosaic.version = 11 : i64} {
  func.func @_window_attn_kernel(%arg0: i32, %arg1: memref<8x64xf32, #tpu.memory_space<vmem>>, %arg2: memref<1x64xf32, #tpu.memory_space<vmem>>, %arg3: memref<1x64xf32, #tpu.memory_space<vmem>>, %arg4: memref<64x192xbf16, #tpu.memory_space<vmem>>, %arg5: memref<1x192xf32, #tpu.memory_space<vmem>>, %arg6: memref<4x4x4xf32, #tpu.memory_space<vmem>>, %arg7: memref<1x4x4xf32, #tpu.memory_space<vmem>>, %arg8: memref<64x64xbf16, #tpu.memory_space<vmem>>, %arg9: memref<1x64xf32, #tpu.memory_space<vmem>>, %arg10: memref<8x64xf32, #tpu.memory_space<vmem>>, %arg11: memref<2x4x64xf32, #tpu.memory_space<vmem>>) attributes {dimension_semantics = [#tpu.dimension_semantics<parallel>], iteration_bounds = array<i64: 1>, scalar_prefetch = 0 : i64, scratch_operands = 1 : i64, tpu.core_type = #tpu.core_type<tc>, window_params = [{transform_indices = @transform_0, window_bounds = array<i64: 8, 64>}, {pipeline_mode = #tpu.pipeline_mode<synchronous>, transform_indices = @transform_1, window_bounds = array<i64: 1, 64>}, {pipeline_mode = #tpu.pipeline_mode<synchronous>, transform_indices = @transform_2, window_bounds = array<i64: 1, 64>}, {pipeline_mode = #tpu.pipeline_mode<synchronous>, transform_indices = @transform_3, window_bounds = array<i64: 64, 192>}, {pipeline_mode = #tpu.pipeline_mode<synchronous>, transform_indices = @transform_4, window_bounds = array<i64: 1, 192>}, {pipeline_mode = #tpu.pipeline_mode<synchronous>, transform_indices = @transform_5, window_bounds = array<i64: 4, 4, 4>}, {pipeline_mode = #tpu.pipeline_mode<synchronous>, transform_indices = @transform_6, window_bounds = array<i64: 1, 4, 4>}, {pipeline_mode = #tpu.pipeline_mode<synchronous>, transform_indices = @transform_7, window_bounds = array<i64: 64, 64>}, {pipeline_mode = #tpu.pipeline_mode<synchronous>, transform_indices = @transform_8, window_bounds = array<i64: 1, 64>}, {transform_indices = @transform_9, window_bounds = array<i64: 8, 64>}]} {
    %c0 = arith.constant 0 : index
    %c0_0 = arith.constant 0 : index
    %0 = vector.load %arg1[%c0, %c0_0] : memref<8x64xf32, #tpu.memory_space<vmem>>, vector<8x64xf32>
    %c0_1 = arith.constant 0 : index
    %c0_2 = arith.constant 0 : index
    %1 = vector.load %arg2[%c0_1, %c0_2] : memref<1x64xf32, #tpu.memory_space<vmem>>, vector<1x64xf32>
    %c0_3 = arith.constant 0 : index
    %c0_4 = arith.constant 0 : index
    %2 = vector.load %arg3[%c0_3, %c0_4] : memref<1x64xf32, #tpu.memory_space<vmem>>, vector<1x64xf32>
    %cst = arith.constant dense<0.000000e+00> : vector<8xf32>
    %3 = vector.multi_reduction <add>, %0, %cst [1] : vector<8x64xf32> to vector<8xf32>
    %4 = vector.shape_cast %3 : vector<8xf32> to vector<8x1xf32>
    %cst_5 = arith.constant 6.400000e+01 : f32
    %5 = vector.broadcast %cst_5 : f32 to vector<8x1xf32>
    %6 = arith.divf %4, %5 : vector<8x1xf32>
    %7 = vector.broadcast %6 : vector<8x1xf32> to vector<8x64xf32>
    %8 = arith.subf %0, %7 : vector<8x64xf32>
    %9 = arith.mulf %8, %8 : vector<8x64xf32>
    %cst_6 = arith.constant dense<0.000000e+00> : vector<8xf32>
    %10 = vector.multi_reduction <add>, %9, %cst_6 [1] : vector<8x64xf32> to vector<8xf32>
    %11 = vector.shape_cast %10 : vector<8xf32> to vector<8x1xf32>
    %cst_7 = arith.constant 6.400000e+01 : f32
    %12 = vector.broadcast %cst_7 : f32 to vector<8x1xf32>
    %13 = arith.divf %11, %12 : vector<8x1xf32>
    %14 = vector.broadcast %6 : vector<8x1xf32> to vector<8x64xf32>
    %15 = arith.subf %0, %14 : vector<8x64xf32>
    %cst_8 = arith.constant 9.99999974E-6 : f32
    %16 = vector.broadcast %cst_8 : f32 to vector<8x1xf32>
    %17 = arith.addf %13, %16 : vector<8x1xf32>
    %18 = math.rsqrt %17 : vector<8x1xf32>
    %19 = vector.broadcast %18 : vector<8x1xf32> to vector<8x64xf32>
    %20 = arith.mulf %15, %19 : vector<8x64xf32>
    %21 = vector.broadcast %1 : vector<1x64xf32> to vector<8x64xf32>
    %22 = arith.mulf %20, %21 : vector<8x64xf32>
    %23 = vector.broadcast %2 : vector<1x64xf32> to vector<8x64xf32>
    %24 = arith.addf %22, %23 : vector<8x64xf32>
    %c0_9 = arith.constant 0 : index
    %c0_10 = arith.constant 0 : index
    %25 = vector.load %arg4[%c0_9, %c0_10] : memref<64x192xbf16, #tpu.memory_space<vmem>>, vector<64x192xbf16>
    %26 = arith.truncf %24 : vector<8x64xf32> to vector<8x64xbf16>
    %cst_11 = arith.constant dense<0.000000e+00> : vector<8x192xf32>
    %27 = tpu.matmul %26, %25, %cst_11 {dimension_numbers = #tpu.dot_dimension_numbers<[1], [0], [0], [1], [0, 0, 1, 1], [], []>} : vector<8x64xbf16>, vector<64x192xbf16>, vector<8x192xf32> -> vector<8x192xf32>
    %c0_12 = arith.constant 0 : index
    %c0_13 = arith.constant 0 : index
    %28 = vector.load %arg5[%c0_12, %c0_13] : memref<1x192xf32, #tpu.memory_space<vmem>>, vector<1x192xf32>
    %29 = vector.broadcast %28 : vector<1x192xf32> to vector<8x192xf32>
    %30 = arith.addf %27, %29 : vector<8x192xf32>
    %31 = vector.shape_cast %30 : vector<8x192xf32> to vector<2x4x192xf32>
    %c0_14 = arith.constant 0 : index
    %c0_15 = arith.constant 0 : index
    %c0_16 = arith.constant 0 : index
    %32 = vector.load %arg7[%c0_14, %c0_15, %c0_16] : memref<1x4x4xf32, #tpu.memory_space<vmem>>, vector<1x4x4xf32>
    %33 = vector.extract_strided_slice %31 {offsets = [0, 0, 0], sizes = [2, 4, 16], strides = [1, 1, 1]} : vector<2x4x192xf32> to vector<2x4x16xf32>
    %cst_17 = arith.constant 2.500000e-01 : f32
    %34 = vector.broadcast %cst_17 : f32 to vector<2x4x16xf32>
    %35 = arith.mulf %33, %34 : vector<2x4x16xf32>
    %36 = vector.extract_strided_slice %31 {offsets = [0, 0, 64], sizes = [2, 4, 16], strides = [1, 1, 1]} : vector<2x4x192xf32> to vector<2x4x16xf32>
    %37 = vector.extract_strided_slice %31 {offsets = [0, 0, 128], sizes = [2, 4, 16], strides = [1, 1, 1]} : vector<2x4x192xf32> to vector<2x4x16xf32>
    %38 = arith.truncf %35 : vector<2x4x16xf32> to vector<2x4x16xbf16>
    %39 = arith.truncf %36 : vector<2x4x16xf32> to vector<2x4x16xbf16>
    "tpu.trace_start"() <{level = 10 : i32, message = "gnd,gmd->gnm"}> : () -> ()
    %cst_18 = arith.constant dense<0.000000e+00> : vector<2x4x4xf32>
    %40 = tpu.matmul %38, %39, %cst_18 {dimension_numbers = #tpu.dot_dimension_numbers<[2], [2], [1], [1], [0, 0, 0, 1, 1, 1], [0], [0]>} : vector<2x4x16xbf16>, vector<2x4x16xbf16>, vector<2x4x4xf32> -> vector<2x4x4xf32>
    "tpu.trace_stop"() : () -> ()
    %c0_19 = arith.constant 0 : index
    %c0_20 = arith.constant 0 : index
    %c0_21 = arith.constant 0 : index
    %41 = vector.load %arg6[%c0_19, %c0_20, %c0_21] : memref<4x4x4xf32, #tpu.memory_space<vmem>>, vector<1x4x4xf32>
    %42 = vector.shape_cast %41 : vector<1x4x4xf32> to vector<4x4xf32>
    %43 = vector.shape_cast %42 : vector<4x4xf32> to vector<1x4x4xf32>
    %44 = vector.broadcast %43 : vector<1x4x4xf32> to vector<2x4x4xf32>
    %45 = arith.addf %40, %44 : vector<2x4x4xf32>
    %46 = vector.broadcast %32 : vector<1x4x4xf32> to vector<2x4x4xf32>
    %47 = arith.addf %45, %46 : vector<2x4x4xf32>
    %cst_22 = arith.constant dense<0xFF800000> : vector<2x4xf32>
    %48 = vector.multi_reduction <maximumf>, %47, %cst_22 [2] : vector<2x4x4xf32> to vector<2x4xf32>
    %49 = vector.shape_cast %48 : vector<2x4xf32> to vector<2x4x1xf32>
    %50 = vector.broadcast %49 : vector<2x4x1xf32> to vector<2x4x4xf32>
    %51 = arith.subf %47, %50 : vector<2x4x4xf32>
    %52 = math.exp %51 : vector<2x4x4xf32>
    %cst_23 = arith.constant dense<0.000000e+00> : vector<2x4xf32>
    %53 = vector.multi_reduction <add>, %52, %cst_23 [2] : vector<2x4x4xf32> to vector<2x4xf32>
    %54 = vector.shape_cast %53 : vector<2x4xf32> to vector<2x4x1xf32>
    %55 = tpu.reciprocal %54 {approx = true} : vector<2x4x1xf32> -> vector<2x4x1xf32>
    %56 = vector.broadcast %55 : vector<2x4x1xf32> to vector<2x4x4xf32>
    %57 = arith.mulf %52, %56 : vector<2x4x4xf32>
    %58 = arith.truncf %57 : vector<2x4x4xf32> to vector<2x4x4xbf16>
    %59 = arith.truncf %37 : vector<2x4x16xf32> to vector<2x4x16xbf16>
    "tpu.trace_start"() <{level = 10 : i32, message = "gnm,gmd->gnd"}> : () -> ()
    %cst_24 = arith.constant dense<0.000000e+00> : vector<2x4x16xf32>
    %60 = tpu.matmul %58, %59, %cst_24 {dimension_numbers = #tpu.dot_dimension_numbers<[2], [1], [1], [2], [0, 0, 0, 1, 1, 2], [0], [0]>} : vector<2x4x4xbf16>, vector<2x4x16xbf16>, vector<2x4x16xf32> -> vector<2x4x16xf32>
    "tpu.trace_stop"() : () -> ()
    %c0_25 = arith.constant 0 : index
    %c0_26 = arith.constant 0 : index
    %c0_27 = arith.constant 0 : index
    %61 = vector.load %arg11[%c0_25, %c0_26, %c0_27] : memref<2x4x64xf32, #tpu.memory_space<vmem>>, vector<2x4x16xf32>
    tpu.vector_store %arg11[%c0_25, %c0_26, %c0_27], %60 {strides = array<i32>} : memref<2x4x64xf32, #tpu.memory_space<vmem>>, vector<2x4x16xf32>,
    %62 = vector.extract_strided_slice %31 {offsets = [0, 0, 16], sizes = [2, 4, 16], strides = [1, 1, 1]} : vector<2x4x192xf32> to vector<2x4x16xf32>
    %cst_28 = arith.constant 2.500000e-01 : f32
    %63 = vector.broadcast %cst_28 : f32 to vector<2x4x16xf32>
    %64 = arith.mulf %62, %63 : vector<2x4x16xf32>
    %65 = vector.extract_strided_slice %31 {offsets = [0, 0, 80], sizes = [2, 4, 16], strides = [1, 1, 1]} : vector<2x4x192xf32> to vector<2x4x16xf32>
    %66 = vector.extract_strided_slice %31 {offsets = [0, 0, 144], sizes = [2, 4, 16], strides = [1, 1, 1]} : vector<2x4x192xf32> to vector<2x4x16xf32>
    %67 = arith.truncf %64 : vector<2x4x16xf32> to vector<2x4x16xbf16>
    %68 = arith.truncf %65 : vector<2x4x16xf32> to vector<2x4x16xbf16>
    "tpu.trace_start"() <{level = 10 : i32, message = "gnd,gmd->gnm"}> : () -> ()
    %cst_29 = arith.constant dense<0.000000e+00> : vector<2x4x4xf32>
    %69 = tpu.matmul %67, %68, %cst_29 {dimension_numbers = #tpu.dot_dimension_numbers<[2], [2], [1], [1], [0, 0, 0, 1, 1, 1], [0], [0]>} : vector<2x4x16xbf16>, vector<2x4x16xbf16>, vector<2x4x4xf32> -> vector<2x4x4xf32>
    "tpu.trace_stop"() : () -> ()
    %c1 = arith.constant 1 : index
    %c0_30 = arith.constant 0 : index
    %c0_31 = arith.constant 0 : index
    %70 = vector.load %arg6[%c1, %c0_30, %c0_31] : memref<4x4x4xf32, #tpu.memory_space<vmem>>, vector<1x4x4xf32>
    %71 = vector.shape_cast %70 : vector<1x4x4xf32> to vector<4x4xf32>
    %72 = vector.shape_cast %71 : vector<4x4xf32> to vector<1x4x4xf32>
    %73 = vector.broadcast %72 : vector<1x4x4xf32> to vector<2x4x4xf32>
    %74 = arith.addf %69, %73 : vector<2x4x4xf32>
    %75 = vector.broadcast %32 : vector<1x4x4xf32> to vector<2x4x4xf32>
    %76 = arith.addf %74, %75 : vector<2x4x4xf32>
    %cst_32 = arith.constant dense<0xFF800000> : vector<2x4xf32>
    %77 = vector.multi_reduction <maximumf>, %76, %cst_32 [2] : vector<2x4x4xf32> to vector<2x4xf32>
    %78 = vector.shape_cast %77 : vector<2x4xf32> to vector<2x4x1xf32>
    %79 = vector.broadcast %78 : vector<2x4x1xf32> to vector<2x4x4xf32>
    %80 = arith.subf %76, %79 : vector<2x4x4xf32>
    %81 = math.exp %80 : vector<2x4x4xf32>
    %cst_33 = arith.constant dense<0.000000e+00> : vector<2x4xf32>
    %82 = vector.multi_reduction <add>, %81, %cst_33 [2] : vector<2x4x4xf32> to vector<2x4xf32>
    %83 = vector.shape_cast %82 : vector<2x4xf32> to vector<2x4x1xf32>
    %84 = tpu.reciprocal %83 {approx = true} : vector<2x4x1xf32> -> vector<2x4x1xf32>
    %85 = vector.broadcast %84 : vector<2x4x1xf32> to vector<2x4x4xf32>
    %86 = arith.mulf %81, %85 : vector<2x4x4xf32>
    %87 = arith.truncf %86 : vector<2x4x4xf32> to vector<2x4x4xbf16>
    %88 = arith.truncf %66 : vector<2x4x16xf32> to vector<2x4x16xbf16>
    "tpu.trace_start"() <{level = 10 : i32, message = "gnm,gmd->gnd"}> : () -> ()
    %cst_34 = arith.constant dense<0.000000e+00> : vector<2x4x16xf32>
    %89 = tpu.matmul %87, %88, %cst_34 {dimension_numbers = #tpu.dot_dimension_numbers<[2], [1], [1], [2], [0, 0, 0, 1, 1, 2], [0], [0]>} : vector<2x4x4xbf16>, vector<2x4x16xbf16>, vector<2x4x16xf32> -> vector<2x4x16xf32>
    "tpu.trace_stop"() : () -> ()
    %c0_35 = arith.constant 0 : index
    %c0_36 = arith.constant 0 : index
    %c16 = arith.constant 16 : index
    %90 = vector.load %arg11[%c0_35, %c0_36, %c16] : memref<2x4x64xf32, #tpu.memory_space<vmem>>, vector<2x4x16xf32>
    tpu.vector_store %arg11[%c0_35, %c0_36, %c16], %89 {strides = array<i32>} : memref<2x4x64xf32, #tpu.memory_space<vmem>>, vector<2x4x16xf32>,
    %91 = vector.extract_strided_slice %31 {offsets = [0, 0, 32], sizes = [2, 4, 16], strides = [1, 1, 1]} : vector<2x4x192xf32> to vector<2x4x16xf32>
    %cst_37 = arith.constant 2.500000e-01 : f32
    %92 = vector.broadcast %cst_37 : f32 to vector<2x4x16xf32>
    %93 = arith.mulf %91, %92 : vector<2x4x16xf32>
    %94 = vector.extract_strided_slice %31 {offsets = [0, 0, 96], sizes = [2, 4, 16], strides = [1, 1, 1]} : vector<2x4x192xf32> to vector<2x4x16xf32>
    %95 = vector.extract_strided_slice %31 {offsets = [0, 0, 160], sizes = [2, 4, 16], strides = [1, 1, 1]} : vector<2x4x192xf32> to vector<2x4x16xf32>
    %96 = arith.truncf %93 : vector<2x4x16xf32> to vector<2x4x16xbf16>
    %97 = arith.truncf %94 : vector<2x4x16xf32> to vector<2x4x16xbf16>
    "tpu.trace_start"() <{level = 10 : i32, message = "gnd,gmd->gnm"}> : () -> ()
    %cst_38 = arith.constant dense<0.000000e+00> : vector<2x4x4xf32>
    %98 = tpu.matmul %96, %97, %cst_38 {dimension_numbers = #tpu.dot_dimension_numbers<[2], [2], [1], [1], [0, 0, 0, 1, 1, 1], [0], [0]>} : vector<2x4x16xbf16>, vector<2x4x16xbf16>, vector<2x4x4xf32> -> vector<2x4x4xf32>
    "tpu.trace_stop"() : () -> ()
    %c2 = arith.constant 2 : index
    %c0_39 = arith.constant 0 : index
    %c0_40 = arith.constant 0 : index
    %99 = vector.load %arg6[%c2, %c0_39, %c0_40] : memref<4x4x4xf32, #tpu.memory_space<vmem>>, vector<1x4x4xf32>
    %100 = vector.shape_cast %99 : vector<1x4x4xf32> to vector<4x4xf32>
    %101 = vector.shape_cast %100 : vector<4x4xf32> to vector<1x4x4xf32>
    %102 = vector.broadcast %101 : vector<1x4x4xf32> to vector<2x4x4xf32>
    %103 = arith.addf %98, %102 : vector<2x4x4xf32>
    %104 = vector.broadcast %32 : vector<1x4x4xf32> to vector<2x4x4xf32>
    %105 = arith.addf %103, %104 : vector<2x4x4xf32>
    %cst_41 = arith.constant dense<0xFF800000> : vector<2x4xf32>
    %106 = vector.multi_reduction <maximumf>, %105, %cst_41 [2] : vector<2x4x4xf32> to vector<2x4xf32>
    %107 = vector.shape_cast %106 : vector<2x4xf32> to vector<2x4x1xf32>
    %108 = vector.broadcast %107 : vector<2x4x1xf32> to vector<2x4x4xf32>
    %109 = arith.subf %105, %108 : vector<2x4x4xf32>
    %110 = math.exp %109 : vector<2x4x4xf32>
    %cst_42 = arith.constant dense<0.000000e+00> : vector<2x4xf32>
    %111 = vector.multi_reduction <add>, %110, %cst_42 [2] : vector<2x4x4xf32> to vector<2x4xf32>
    %112 = vector.shape_cast %111 : vector<2x4xf32> to vector<2x4x1xf32>
    %113 = tpu.reciprocal %112 {approx = true} : vector<2x4x1xf32> -> vector<2x4x1xf32>
    %114 = vector.broadcast %113 : vector<2x4x1xf32> to vector<2x4x4xf32>
    %115 = arith.mulf %110, %114 : vector<2x4x4xf32>
    %116 = arith.truncf %115 : vector<2x4x4xf32> to vector<2x4x4xbf16>
    %117 = arith.truncf %95 : vector<2x4x16xf32> to vector<2x4x16xbf16>
    "tpu.trace_start"() <{level = 10 : i32, message = "gnm,gmd->gnd"}> : () -> ()
    %cst_43 = arith.constant dense<0.000000e+00> : vector<2x4x16xf32>
    %118 = tpu.matmul %116, %117, %cst_43 {dimension_numbers = #tpu.dot_dimension_numbers<[2], [1], [1], [2], [0, 0, 0, 1, 1, 2], [0], [0]>} : vector<2x4x4xbf16>, vector<2x4x16xbf16>, vector<2x4x16xf32> -> vector<2x4x16xf32>
    "tpu.trace_stop"() : () -> ()
    %c0_44 = arith.constant 0 : index
    %c0_45 = arith.constant 0 : index
    %c32 = arith.constant 32 : index
    %119 = vector.load %arg11[%c0_44, %c0_45, %c32] : memref<2x4x64xf32, #tpu.memory_space<vmem>>, vector<2x4x16xf32>
    tpu.vector_store %arg11[%c0_44, %c0_45, %c32], %118 {strides = array<i32>} : memref<2x4x64xf32, #tpu.memory_space<vmem>>, vector<2x4x16xf32>,
    %120 = vector.extract_strided_slice %31 {offsets = [0, 0, 48], sizes = [2, 4, 16], strides = [1, 1, 1]} : vector<2x4x192xf32> to vector<2x4x16xf32>
    %cst_46 = arith.constant 2.500000e-01 : f32
    %121 = vector.broadcast %cst_46 : f32 to vector<2x4x16xf32>
    %122 = arith.mulf %120, %121 : vector<2x4x16xf32>
    %123 = vector.extract_strided_slice %31 {offsets = [0, 0, 112], sizes = [2, 4, 16], strides = [1, 1, 1]} : vector<2x4x192xf32> to vector<2x4x16xf32>
    %124 = vector.extract_strided_slice %31 {offsets = [0, 0, 176], sizes = [2, 4, 16], strides = [1, 1, 1]} : vector<2x4x192xf32> to vector<2x4x16xf32>
    %125 = arith.truncf %122 : vector<2x4x16xf32> to vector<2x4x16xbf16>
    %126 = arith.truncf %123 : vector<2x4x16xf32> to vector<2x4x16xbf16>
    "tpu.trace_start"() <{level = 10 : i32, message = "gnd,gmd->gnm"}> : () -> ()
    %cst_47 = arith.constant dense<0.000000e+00> : vector<2x4x4xf32>
    %127 = tpu.matmul %125, %126, %cst_47 {dimension_numbers = #tpu.dot_dimension_numbers<[2], [2], [1], [1], [0, 0, 0, 1, 1, 1], [0], [0]>} : vector<2x4x16xbf16>, vector<2x4x16xbf16>, vector<2x4x4xf32> -> vector<2x4x4xf32>
    "tpu.trace_stop"() : () -> ()
    %c3 = arith.constant 3 : index
    %c0_48 = arith.constant 0 : index
    %c0_49 = arith.constant 0 : index
    %128 = vector.load %arg6[%c3, %c0_48, %c0_49] : memref<4x4x4xf32, #tpu.memory_space<vmem>>, vector<1x4x4xf32>
    %129 = vector.shape_cast %128 : vector<1x4x4xf32> to vector<4x4xf32>
    %130 = vector.shape_cast %129 : vector<4x4xf32> to vector<1x4x4xf32>
    %131 = vector.broadcast %130 : vector<1x4x4xf32> to vector<2x4x4xf32>
    %132 = arith.addf %127, %131 : vector<2x4x4xf32>
    %133 = vector.broadcast %32 : vector<1x4x4xf32> to vector<2x4x4xf32>
    %134 = arith.addf %132, %133 : vector<2x4x4xf32>
    %cst_50 = arith.constant dense<0xFF800000> : vector<2x4xf32>
    %135 = vector.multi_reduction <maximumf>, %134, %cst_50 [2] : vector<2x4x4xf32> to vector<2x4xf32>
    %136 = vector.shape_cast %135 : vector<2x4xf32> to vector<2x4x1xf32>
    %137 = vector.broadcast %136 : vector<2x4x1xf32> to vector<2x4x4xf32>
    %138 = arith.subf %134, %137 : vector<2x4x4xf32>
    %139 = math.exp %138 : vector<2x4x4xf32>
    %cst_51 = arith.constant dense<0.000000e+00> : vector<2x4xf32>
    %140 = vector.multi_reduction <add>, %139, %cst_51 [2] : vector<2x4x4xf32> to vector<2x4xf32>
    %141 = vector.shape_cast %140 : vector<2x4xf32> to vector<2x4x1xf32>
    %142 = tpu.reciprocal %141 {approx = true} : vector<2x4x1xf32> -> vector<2x4x1xf32>
    %143 = vector.broadcast %142 : vector<2x4x1xf32> to vector<2x4x4xf32>
    %144 = arith.mulf %139, %143 : vector<2x4x4xf32>
    %145 = arith.truncf %144 : vector<2x4x4xf32> to vector<2x4x4xbf16>
    %146 = arith.truncf %124 : vector<2x4x16xf32> to vector<2x4x16xbf16>
    "tpu.trace_start"() <{level = 10 : i32, message = "gnm,gmd->gnd"}> : () -> ()
    %cst_52 = arith.constant dense<0.000000e+00> : vector<2x4x16xf32>
    %147 = tpu.matmul %145, %146, %cst_52 {dimension_numbers = #tpu.dot_dimension_numbers<[2], [1], [1], [2], [0, 0, 0, 1, 1, 2], [0], [0]>} : vector<2x4x4xbf16>, vector<2x4x16xbf16>, vector<2x4x16xf32> -> vector<2x4x16xf32>
    "tpu.trace_stop"() : () -> ()
    %c0_53 = arith.constant 0 : index
    %c0_54 = arith.constant 0 : index
    %c48 = arith.constant 48 : index
    %148 = vector.load %arg11[%c0_53, %c0_54, %c48] : memref<2x4x64xf32, #tpu.memory_space<vmem>>, vector<2x4x16xf32>
    tpu.vector_store %arg11[%c0_53, %c0_54, %c48], %147 {strides = array<i32>} : memref<2x4x64xf32, #tpu.memory_space<vmem>>, vector<2x4x16xf32>,
    %c0_55 = arith.constant 0 : index
    %c0_56 = arith.constant 0 : index
    %c0_57 = arith.constant 0 : index
    %149 = vector.load %arg11[%c0_55, %c0_56, %c0_57] : memref<2x4x64xf32, #tpu.memory_space<vmem>>, vector<2x4x64xf32>
    %150 = vector.shape_cast %149 : vector<2x4x64xf32> to vector<8x64xf32>
    %c0_58 = arith.constant 0 : index
    %c0_59 = arith.constant 0 : index
    %151 = vector.load %arg8[%c0_58, %c0_59] : memref<64x64xbf16, #tpu.memory_space<vmem>>, vector<64x64xbf16>
    %152 = arith.truncf %150 : vector<8x64xf32> to vector<8x64xbf16>
    %cst_60 = arith.constant dense<0.000000e+00> : vector<8x64xf32>
    %153 = tpu.matmul %152, %151, %cst_60 {dimension_numbers = #tpu.dot_dimension_numbers<[1], [0], [0], [1], [0, 0, 1, 1], [], []>} : vector<8x64xbf16>, vector<64x64xbf16>, vector<8x64xf32> -> vector<8x64xf32>
    %c0_61 = arith.constant 0 : index
    %c0_62 = arith.constant 0 : index
    %154 = vector.load %arg9[%c0_61, %c0_62] : memref<1x64xf32, #tpu.memory_space<vmem>>, vector<1x64xf32>
    %155 = vector.broadcast %154 : vector<1x64xf32> to vector<8x64xf32>
    %156 = arith.addf %153, %155 : vector<8x64xf32>
    %157 = arith.addf %0, %156 : vector<8x64xf32>
    %c0_63 = arith.constant 0 : index
    %c0_64 = arith.constant 0 : index
    %158 = vector.load %arg10[%c0_63, %c0_64] : memref<8x64xf32, #tpu.memory_space<vmem>>, vector<8x64xf32>
    tpu.vector_store %arg10[%c0_63, %c0_64], %157 {strides = array<i32>} : memref<8x64xf32, #tpu.memory_space<vmem>>, vector<8x64xf32>,
    return
  }
  func.func @transform_0(%arg0: i32) -> (i32, i32) {
    %c0_i32 = arith.constant 0 : i32
    %c0_i32_0 = arith.constant 0 : i32
    return %arg0, %c0_i32 : i32, i32
  }
  func.func @transform_1(%arg0: i32) -> (i32, i32) {
    %c0_i32 = arith.constant 0 : i32
    %c0_i32_0 = arith.constant 0 : i32
    %c0_i32_1 = arith.constant 0 : i32
    return %c0_i32, %c0_i32_0 : i32, i32
  }
  func.func @transform_2(%arg0: i32) -> (i32, i32) {
    %c0_i32 = arith.constant 0 : i32
    %c0_i32_0 = arith.constant 0 : i32
    %c0_i32_1 = arith.constant 0 : i32
    return %c0_i32, %c0_i32_0 : i32, i32
  }
  func.func @transform_3(%arg0: i32) -> (i32, i32) {
    %c0_i32 = arith.constant 0 : i32
    %c0_i32_0 = arith.constant 0 : i32
    %c0_i32_1 = arith.constant 0 : i32
    return %c0_i32, %c0_i32_0 : i32, i32
  }
  func.func @transform_4(%arg0: i32) -> (i32, i32) {
    %c0_i32 = arith.constant 0 : i32
    %c0_i32_0 = arith.constant 0 : i32
    %c0_i32_1 = arith.constant 0 : i32
    return %c0_i32, %c0_i32_0 : i32, i32
  }
  func.func @transform_5(%arg0: i32) -> (i32, i32, i32) {
    %c0_i32 = arith.constant 0 : i32
    %c0_i32_0 = arith.constant 0 : i32
    %c0_i32_1 = arith.constant 0 : i32
    %c0_i32_2 = arith.constant 0 : i32
    return %c0_i32, %c0_i32_0, %c0_i32_1 : i32, i32, i32
  }
  func.func @transform_6(%arg0: i32) -> (i32, i32, i32) {
    %c0_i32 = arith.constant 0 : i32
    %c0_i32_0 = arith.constant 0 : i32
    %c0_i32_1 = arith.constant 0 : i32
    %c0_i32_2 = arith.constant 0 : i32
    return %c0_i32, %c0_i32_0, %c0_i32_1 : i32, i32, i32
  }
  func.func @transform_7(%arg0: i32) -> (i32, i32) {
    %c0_i32 = arith.constant 0 : i32
    %c0_i32_0 = arith.constant 0 : i32
    %c0_i32_1 = arith.constant 0 : i32
    return %c0_i32, %c0_i32_0 : i32, i32
  }
  func.func @transform_8(%arg0: i32) -> (i32, i32) {
    %c0_i32 = arith.constant 0 : i32
    %c0_i32_0 = arith.constant 0 : i32
    %c0_i32_1 = arith.constant 0 : i32
    return %c0_i32, %c0_i32_0 : i32, i32
  }
  func.func @transform_9(%arg0: i32) -> (i32, i32) {
    %c0_i32 = arith.constant 0 : i32
    %c0_i32_0 = arith.constant 0 : i32
    return %arg0, %c0_i32 : i32, i32
  }
}

module attributes {stable_mosaic.version = 11 : i64} {
  func.func @_mlp_kernel(%arg0: i32, %arg1: memref<8x64xf32, #tpu.memory_space<vmem>>, %arg2: memref<1x64xf32, #tpu.memory_space<vmem>>, %arg3: memref<1x64xf32, #tpu.memory_space<vmem>>, %arg4: memref<64x256xbf16, #tpu.memory_space<vmem>>, %arg5: memref<1x256xf32, #tpu.memory_space<vmem>>, %arg6: memref<256x64xbf16, #tpu.memory_space<vmem>>, %arg7: memref<1x64xf32, #tpu.memory_space<vmem>>, %arg8: memref<8x64xf32, #tpu.memory_space<vmem>>) attributes {dimension_semantics = [#tpu.dimension_semantics<parallel>], iteration_bounds = array<i64: 1>, scalar_prefetch = 0 : i64, scratch_operands = 0 : i64, tpu.core_type = #tpu.core_type<tc>, window_params = [{transform_indices = @transform_0, window_bounds = array<i64: 8, 64>}, {pipeline_mode = #tpu.pipeline_mode<synchronous>, transform_indices = @transform_1, window_bounds = array<i64: 1, 64>}, {pipeline_mode = #tpu.pipeline_mode<synchronous>, transform_indices = @transform_2, window_bounds = array<i64: 1, 64>}, {pipeline_mode = #tpu.pipeline_mode<synchronous>, transform_indices = @transform_3, window_bounds = array<i64: 64, 256>}, {pipeline_mode = #tpu.pipeline_mode<synchronous>, transform_indices = @transform_4, window_bounds = array<i64: 1, 256>}, {pipeline_mode = #tpu.pipeline_mode<synchronous>, transform_indices = @transform_5, window_bounds = array<i64: 256, 64>}, {pipeline_mode = #tpu.pipeline_mode<synchronous>, transform_indices = @transform_6, window_bounds = array<i64: 1, 64>}, {transform_indices = @transform_7, window_bounds = array<i64: 8, 64>}]} {
    %c0 = arith.constant 0 : index
    %c0_0 = arith.constant 0 : index
    %0 = vector.load %arg1[%c0, %c0_0] : memref<8x64xf32, #tpu.memory_space<vmem>>, vector<8x64xf32>
    %c0_1 = arith.constant 0 : index
    %c0_2 = arith.constant 0 : index
    %1 = vector.load %arg2[%c0_1, %c0_2] : memref<1x64xf32, #tpu.memory_space<vmem>>, vector<1x64xf32>
    %c0_3 = arith.constant 0 : index
    %c0_4 = arith.constant 0 : index
    %2 = vector.load %arg3[%c0_3, %c0_4] : memref<1x64xf32, #tpu.memory_space<vmem>>, vector<1x64xf32>
    %cst = arith.constant dense<0.000000e+00> : vector<8xf32>
    %3 = vector.multi_reduction <add>, %0, %cst [1] : vector<8x64xf32> to vector<8xf32>
    %4 = vector.shape_cast %3 : vector<8xf32> to vector<8x1xf32>
    %cst_5 = arith.constant 6.400000e+01 : f32
    %5 = vector.broadcast %cst_5 : f32 to vector<8x1xf32>
    %6 = arith.divf %4, %5 : vector<8x1xf32>
    %7 = vector.broadcast %6 : vector<8x1xf32> to vector<8x64xf32>
    %8 = arith.subf %0, %7 : vector<8x64xf32>
    %9 = arith.mulf %8, %8 : vector<8x64xf32>
    %cst_6 = arith.constant dense<0.000000e+00> : vector<8xf32>
    %10 = vector.multi_reduction <add>, %9, %cst_6 [1] : vector<8x64xf32> to vector<8xf32>
    %11 = vector.shape_cast %10 : vector<8xf32> to vector<8x1xf32>
    %cst_7 = arith.constant 6.400000e+01 : f32
    %12 = vector.broadcast %cst_7 : f32 to vector<8x1xf32>
    %13 = arith.divf %11, %12 : vector<8x1xf32>
    %14 = vector.broadcast %6 : vector<8x1xf32> to vector<8x64xf32>
    %15 = arith.subf %0, %14 : vector<8x64xf32>
    %cst_8 = arith.constant 9.99999974E-6 : f32
    %16 = vector.broadcast %cst_8 : f32 to vector<8x1xf32>
    %17 = arith.addf %13, %16 : vector<8x1xf32>
    %18 = math.rsqrt %17 : vector<8x1xf32>
    %19 = vector.broadcast %18 : vector<8x1xf32> to vector<8x64xf32>
    %20 = arith.mulf %15, %19 : vector<8x64xf32>
    %21 = vector.broadcast %1 : vector<1x64xf32> to vector<8x64xf32>
    %22 = arith.mulf %20, %21 : vector<8x64xf32>
    %23 = vector.broadcast %2 : vector<1x64xf32> to vector<8x64xf32>
    %24 = arith.addf %22, %23 : vector<8x64xf32>
    %c0_9 = arith.constant 0 : index
    %c0_10 = arith.constant 0 : index
    %25 = vector.load %arg4[%c0_9, %c0_10] : memref<64x256xbf16, #tpu.memory_space<vmem>>, vector<64x256xbf16>
    %26 = arith.truncf %24 : vector<8x64xf32> to vector<8x64xbf16>
    %cst_11 = arith.constant dense<0.000000e+00> : vector<8x256xf32>
    %27 = tpu.matmul %26, %25, %cst_11 {dimension_numbers = #tpu.dot_dimension_numbers<[1], [0], [0], [1], [0, 0, 1, 1], [], []>} : vector<8x64xbf16>, vector<64x256xbf16>, vector<8x256xf32> -> vector<8x256xf32>
    %c0_12 = arith.constant 0 : index
    %c0_13 = arith.constant 0 : index
    %28 = vector.load %arg5[%c0_12, %c0_13] : memref<1x256xf32, #tpu.memory_space<vmem>>, vector<1x256xf32>
    %29 = vector.broadcast %28 : vector<1x256xf32> to vector<8x256xf32>
    %30 = arith.addf %27, %29 : vector<8x256xf32>
    %cst_14 = arith.constant 5.000000e-01 : f32
    %31 = vector.broadcast %cst_14 : f32 to vector<8x256xf32>
    %32 = arith.mulf %31, %30 : vector<8x256xf32>
    %cst_15 = arith.constant 0.707106769 : f32
    %33 = vector.broadcast %cst_15 : f32 to vector<8x256xf32>
    %34 = arith.mulf %30, %33 : vector<8x256xf32>
    %35 = math.absf %34 : vector<8x256xf32>
    %cst_16 = arith.constant 0.327591091 : f32
    %36 = vector.broadcast %cst_16 : f32 to vector<8x256xf32>
    %37 = arith.mulf %36, %35 : vector<8x256xf32>
    %cst_17 = arith.constant 1.000000e+00 : f32
    %38 = vector.broadcast %cst_17 : f32 to vector<8x256xf32>
    %39 = arith.addf %38, %37 : vector<8x256xf32>
    %cst_18 = arith.constant 1.000000e+00 : f32
    %40 = vector.broadcast %cst_18 : f32 to vector<8x256xf32>
    %41 = arith.divf %40, %39 : vector<8x256xf32>
    %cst_19 = arith.constant 1.06140542 : f32
    %42 = vector.broadcast %cst_19 : f32 to vector<8x256xf32>
    %43 = arith.mulf %42, %41 : vector<8x256xf32>
    %cst_20 = arith.constant -1.45315206 : f32
    %44 = vector.broadcast %cst_20 : f32 to vector<8x256xf32>
    %45 = arith.addf %43, %44 : vector<8x256xf32>
    %46 = arith.mulf %45, %41 : vector<8x256xf32>
    %cst_21 = arith.constant 1.42141378 : f32
    %47 = vector.broadcast %cst_21 : f32 to vector<8x256xf32>
    %48 = arith.addf %46, %47 : vector<8x256xf32>
    %49 = arith.mulf %48, %41 : vector<8x256xf32>
    %cst_22 = arith.constant -0.284496725 : f32
    %50 = vector.broadcast %cst_22 : f32 to vector<8x256xf32>
    %51 = arith.addf %49, %50 : vector<8x256xf32>
    %52 = arith.mulf %51, %41 : vector<8x256xf32>
    %cst_23 = arith.constant 0.254829586 : f32
    %53 = vector.broadcast %cst_23 : f32 to vector<8x256xf32>
    %54 = arith.addf %52, %53 : vector<8x256xf32>
    %55 = arith.mulf %54, %41 : vector<8x256xf32>
    %cst_24 = arith.constant 0.000000e+00 : f32
    %56 = vector.broadcast %cst_24 : f32 to vector<8x256xf32>
    %57 = arith.subf %56, %35 : vector<8x256xf32>
    %58 = arith.mulf %57, %35 : vector<8x256xf32>
    %59 = math.exp %58 : vector<8x256xf32>
    %60 = arith.mulf %55, %59 : vector<8x256xf32>
    %cst_25 = arith.constant 1.000000e+00 : f32
    %61 = vector.broadcast %cst_25 : f32 to vector<8x256xf32>
    %62 = arith.subf %61, %60 : vector<8x256xf32>
    %cst_26 = arith.constant 0.000000e+00 : f32
    %63 = vector.broadcast %cst_26 : f32 to vector<8x256xf32>
    %64 = arith.cmpf olt, %34, %63 : vector<8x256xf32>
    %cst_27 = arith.constant 0.000000e+00 : f32
    %65 = vector.broadcast %cst_27 : f32 to vector<8x256xf32>
    %66 = arith.subf %65, %62 : vector<8x256xf32>
    %67 = arith.select %64, %66, %62 : vector<8x256xi1>, vector<8x256xf32>
    %cst_28 = arith.constant 1.000000e+00 : f32
    %68 = vector.broadcast %cst_28 : f32 to vector<8x256xf32>
    %69 = arith.addf %68, %67 : vector<8x256xf32>
    %70 = arith.mulf %32, %69 : vector<8x256xf32>
    %c0_29 = arith.constant 0 : index
    %c0_30 = arith.constant 0 : index
    %71 = vector.load %arg6[%c0_29, %c0_30] : memref<256x64xbf16, #tpu.memory_space<vmem>>, vector<256x64xbf16>
    %72 = arith.truncf %70 : vector<8x256xf32> to vector<8x256xbf16>
    %cst_31 = arith.constant dense<0.000000e+00> : vector<8x64xf32>
    %73 = tpu.matmul %72, %71, %cst_31 {dimension_numbers = #tpu.dot_dimension_numbers<[1], [0], [0], [1], [0, 0, 1, 1], [], []>} : vector<8x256xbf16>, vector<256x64xbf16>, vector<8x64xf32> -> vector<8x64xf32>
    %c0_32 = arith.constant 0 : index
    %c0_33 = arith.constant 0 : index
    %74 = vector.load %arg7[%c0_32, %c0_33] : memref<1x64xf32, #tpu.memory_space<vmem>>, vector<1x64xf32>
    %75 = vector.broadcast %74 : vector<1x64xf32> to vector<8x64xf32>
    %76 = arith.addf %73, %75 : vector<8x64xf32>
    %77 = arith.addf %0, %76 : vector<8x64xf32>
    %c0_34 = arith.constant 0 : index
    %c0_35 = arith.constant 0 : index
    %78 = vector.load %arg8[%c0_34, %c0_35] : memref<8x64xf32, #tpu.memory_space<vmem>>, vector<8x64xf32>
    tpu.vector_store %arg8[%c0_34, %c0_35], %77 {strides = array<i32>} : memref<8x64xf32, #tpu.memory_space<vmem>>, vector<8x64xf32>,
    return
  }
  func.func @transform_0(%arg0: i32) -> (i32, i32) {
    %c0_i32 = arith.constant 0 : i32
    %c0_i32_0 = arith.constant 0 : i32
    return %arg0, %c0_i32 : i32, i32
  }
  func.func @transform_1(%arg0: i32) -> (i32, i32) {
    %c0_i32 = arith.constant 0 : i32
    %c0_i32_0 = arith.constant 0 : i32
    %c0_i32_1 = arith.constant 0 : i32
    return %c0_i32, %c0_i32_0 : i32, i32
  }
  func.func @transform_2(%arg0: i32) -> (i32, i32) {
    %c0_i32 = arith.constant 0 : i32
    %c0_i32_0 = arith.constant 0 : i32
    %c0_i32_1 = arith.constant 0 : i32
    return %c0_i32, %c0_i32_0 : i32, i32
  }
  func.func @transform_3(%arg0: i32) -> (i32, i32) {
    %c0_i32 = arith.constant 0 : i32
    %c0_i32_0 = arith.constant 0 : i32
    %c0_i32_1 = arith.constant 0 : i32
    return %c0_i32, %c0_i32_0 : i32, i32
  }
  func.func @transform_4(%arg0: i32) -> (i32, i32) {
    %c0_i32 = arith.constant 0 : i32
    %c0_i32_0 = arith.constant 0 : i32
    %c0_i32_1 = arith.constant 0 : i32
    return %c0_i32, %c0_i32_0 : i32, i32
  }
  func.func @transform_5(%arg0: i32) -> (i32, i32) {
    %c0_i32 = arith.constant 0 : i32
    %c0_i32_0 = arith.constant 0 : i32
    %c0_i32_1 = arith.constant 0 : i32
    return %c0_i32, %c0_i32_0 : i32, i32
  }
  func.func @transform_6(%arg0: i32) -> (i32, i32) {
    %c0_i32 = arith.constant 0 : i32
    %c0_i32_0 = arith.constant 0 : i32
    %c0_i32_1 = arith.constant 0 : i32
    return %c0_i32, %c0_i32_0 : i32, i32
  }
  func.func @transform_7(%arg0: i32) -> (i32, i32) {
    %c0_i32 = arith.constant 0 : i32
    %c0_i32_0 = arith.constant 0 : i32
    return %arg0, %c0_i32 : i32, i32
  }
}

</mosaic_0001>

<bundles_post_ra>
// kernel: _lambda_.10
= control target key start
LH: loop header
LB: loop body
LE: loop exit
PB: predicated region body
PF: predicated region fallthrough
CT: control target
= control target key end

     0   :  { %s501_s18 = smov 0   ;;  %s549_s0 = inlined_call_operand.vmem [shape: f32[32,48], index: 0, kind: input, shape index: {}]   ;;  %s550_s1 = inlined_call_operand.vmem [shape: bf16[48,32], index: 1, kind: input, shape index: {}]   ;;  %s551_s2 = inlined_call_operand.vmem [shape: f32[1,32], index: 2, kind: input, shape index: {}, may-alias: {2,4}]   ;;  %s552_s3 = inlined_call_operand.vmem [shape: f32[1,32], index: 3, kind: input, shape index: {}]   ;;  %s553_s4 = inlined_call_operand.vmem [shape: f32[1,32], index: 4, kind: input, shape index: {}, may-alias: {2,4}]   ;;  %s554_s5 = inlined_call_operand.vmem [shape: f32[32,32], index: 5, kind: output, shape index: {}]  }
   0x1 LB: > { %s412_s19 = sadd.s32 4294967295, %s467_s18   ;;  %p416_p0 = scmp.ge.s32.totalorder %s467_s18, 1  ;;  %s467_s18 = sphi %s501_s18, %s15_s18  }
   0x2   : > { %p188_p1 = scmp.lt.s32.totalorder %s467_s18, 3 }
   0x4   : > { %p189_p2 = pnand %p416_p0, %p188_p1 }
   0x5   : > { %s417_s24 = sshll.u32 (!%p189_p2), %s412_s19, 1 }
   0x6   : > { %192 = sbr.rel (%p189_p2) target bundleno = 532 (0x214), region = 40  ;;  %p217_p3 = scmp.lt.s32.totalorder (!%p189_p2), %s417_s24, 3 }
   0xb   : > { %v454_v0 = vld [vmem:[%s550_s1 + $0x10] sm:$0xff]   ;;  %v469_v1 = vmov 0.0   ;;  %v455_v2 = vld [vmem:[%s550_s1 + $0x8] sm:$0xff]   ;;  %vm470_vm0 = vmmov 0   ;;  %s556_s24 = smov (!%p217_p3, %s417_s24), 3  ;;  %v456_v3 = vld [vmem:[%s550_s1] sm:$0xff]  }
   0xc   : > { %434 = vmatprep.subr.bf16.mxu0 %v469_v1  ;;  %440 = vmatprep.mubr.msk.bf16.mxu0 %vm470_vm0, %v469_v1  ;;  %s418_s27 = sshll.u32 %s556_s24, 3  ;;  %vm263_vm1 = vcmask 392192   ;;  %v421_v7 = vld [vmem:[%s551_s2] ss:$0 sm:$0xff]  ;;  %vm310_vm2 = vcmask 261120  }
   0xd   : > { %435 = vmatpush3.bf16.msra.mxu0 %v454_v0  ;;  %s220_s30 = scalar_lea.vmem %s549_s0, %s418_s27  ;;  %v426_v33 = vld [vmem:[%s552_s3] ss:$0 sm:$0xff]  ;;  %s226_s14 = scalar_lea.vmem %s554_s5, %s418_s27 }
   0xe   : > { %436 = vmatprep.subr.bf16.mxu0 %v469_v1  ;;  %v229_v4 = vld [vmem:[%s220_s30] sm:$0xff]  ;;  %v230_v5 = vld [vmem:[%s220_s30 + $0x8] sm:$0xff] }
   0xf   : > { %v237_v6 = vpack.c.bf16 %v230_v5, %v229_v4  ;;  %v427_v35 = vld [vmem:[%s553_s4] ss:$0 sm:$0xff] }
  0x11   : > { %437 = vmatpush3.bf16.msra.mxu0 %v455_v2 }
  0x12   : > { %438 = vmatprep.subr.bf16.mxu0 %v469_v1 }
  0x15   : > { %439 = vmatpush3.bf16.msra.mxu0 %v456_v3 }
  0x18   : > { %441 = vmatmul.mubr.msk.bf16.vlgmr.msra.gmra.mxu0 %vm263_vm1, %v237_v6 }
  0xd8   : > { %v301_v8 = vpop.f32.mrf.mxu0 }
  0xd9   : > { %v302_v9 = vadd.f32 %v421_v7, %v301_v8 }
  0xda   : > { %v442_v10 = vpop.f32.mrf.mxu0 }
  0xdb   : > { %v311_v11 = vsel %vm310_vm2, %v302_v9, 0.0 }
  0xdc   : > { %312 = vadd.xlane.f32.xlu0 %v311_v11  ;;  %v304_v12 = vpop.f32.mrf.mxu0 }
  0xdd   : > { %v305_v13 = vadd.f32 %v421_v7, %v304_v12 }
  0xde   : > { %v443_v14 = vpop.f32.mrf.mxu0 }
  0xdf   : > { %v314_v15 = vsel %vm310_vm2, %v305_v13, 0.0 }
  0xe0   : > { %315 = vadd.xlane.f32.xlu0 %v314_v15 }
 0x165   : > { %v313_v16 = vpop.xlane.xlu0 %312 }
 0x166   : > { %v318_v17 = vmul.f32 0.03125, %v313_v16 }
 0x168   : > { %v320_v18 = vsub.f32 %v302_v9, %v318_v17 }
 0x169   : > { %v316_v19 = vpop.xlane.xlu0 %315 }
 0x16a   : > { %v319_v20 = vmul.f32 0.03125, %v316_v19  ;;  %v322_v21 = vmul.f32 %v320_v18, %v320_v18 }
 0x16c   : > { %v321_v22 = vsub.f32 %v305_v13, %v319_v20  ;;  %v324_v23 = vsel %vm310_vm2, %v322_v21, 0.0 }
 0x16d   : > { %325 = vadd.xlane.f32.xlu1 %v324_v23 }
 0x16e   : > { %v323_v24 = vmul.f32 %v321_v22, %v321_v22 }
 0x170   : > { %v327_v25 = vsel %vm310_vm2, %v323_v24, 0.0 }
 0x171   : > { %328 = vadd.xlane.f32.xlu1 %v327_v25 }
 0x1f6   : > { %v326_v26 = vpop.xlane.xlu1 %325 }
 0x1f7   : > { %v330_v27 = vmul.f32 0.03125, %v326_v26 }
 0x1f9   : > { %v332_v28 = vadd.f32 1e-05, %v330_v27 }
 0x1fa   : > { %v329_v29 = vpop.xlane.xlu1 %328 }
 0x1fb   : > { %457 = vrsqrt.f32 %v332_v28  ;;  %v331_v30 = vmul.f32 0.03125, %v329_v29 }
 0x1fd   : > { %v333_v31 = vadd.f32 1e-05, %v331_v30 }
 0x1ff   : > { %459 = vrsqrt.f32 %v333_v31 }
 0x208   : > { %v458_v32 = vpop.eup %457 }
 0x209   : > { %v336_v34 = vmul.f32 %v458_v32, %v320_v18 }
 0x20b   : > { %v344_v36 = vmul.f32 %v426_v33, %v336_v34 }
 0x20c   : > { %v460_v37 = vpop.eup %459 }
 0x20d   : > { %v352_v38 = vadd.f32 %v427_v35, %v344_v36  ;;  %v337_v39 = vmul.f32 %v460_v37, %v321_v22 }
 0x20f   : > { %354 = vst.msk [vmem:[%s226_s14] sm:$0xff] %vm310_vm2, %v352_v38  ;;  %v345_v40 = vmul.f32 %v426_v33, %v337_v39 }
 0x211   : > { %v353_v41 = vadd.f32 %v427_v35, %v345_v40 }
 0x213   : > { %355 = vst.msk [vmem:[%s226_s14 + $0x8] sm:$0xff] %vm310_vm2, %v353_v41 }
 0x214 PF: > { %s15_s18 = sadd.s32 1, %s467_s18  }
 0x215   : > { %p12_p4 = scmp.ge.s32.totalorder %s15_s18, 4  }
 0x217   :  { %14 = sbr.rel (!%p12_p4) target bundleno = 1 (0x1), region = 70 }

// kernel: _lambda_.12
= control target key start
LH: loop header
LB: loop body
LE: loop exit
PB: predicated region body
PF: predicated region fallthrough
CT: control target
= control target key end

     0   :  { %s774_s24 = smov 0   ;;  %s857_s0 = inlined_call_operand.vmem [shape: f32[32,32], index: 0, kind: input, shape index: {}]   ;;  %s858_s1 = inlined_call_operand.vmem [shape: f32[1,32], index: 1, kind: input, shape index: {}]   ;;  %s859_s2 = inlined_call_operand.vmem [shape: f32[1,32], index: 2, kind: input, shape index: {}, may-alias: {2,6}]   ;;  %s860_s3 = inlined_call_operand.vmem [shape: bf16[32,128], index: 3, kind: input, shape index: {}]   ;;  %s861_s4 = inlined_call_operand.vmem [shape: f32[1,128], index: 4, kind: input, shape index: {}]   ;;  %s862_s5 = inlined_call_operand.vmem [shape: bf16[128,32], index: 5, kind: input, shape index: {}]   ;;  %s863_s6 = inlined_call_operand.vmem [shape: f32[1,32], index: 6, kind: input, shape index: {}, may-alias: {2,6}]   ;;  %s864_s7 = inlined_call_operand.vmem [shape: f32[32,32], index: 7, kind: output, shape index: {}]  }
   0x1 LB: > { %s626_s25 = sadd.s32 4294967295, %s730_s24   ;;  %p630_p0 = scmp.ge.s32.totalorder %s730_s24, 1  ;;  %s730_s24 = sphi %s774_s24, %s17_s24  }
   0x2   : > { %p238_p1 = scmp.lt.s32.totalorder %s730_s24, 3 }
   0x4   : > { %p239_p2 = pnand %p630_p0, %p238_p1 }
   0x5   : > { %s631_s26 = sshll.u32 (!%p239_p2), %s626_s25, 1 }
   0x6   : > { %242 = sbr.rel (%p239_p2) target bundleno = 783 (0x30f), region = 48  ;;  %p271_p3 = scmp.lt.s32.totalorder (!%p239_p2), %s631_s26, 3 }
   0xb   : > { %s866_s26 = smov (!%p271_p3, %s631_s26), 3  ;;  %vm287_vm0 = vcmask 261120   ;;  %v702_v14 = vld [vmem:[%s860_s3 + $0x8] sm:$0xff]   ;;  %v732_v15 = vmov 0.0   ;;  %vm733_vm1 = vmmov 0   ;;  %v703_v16 = vld [vmem:[%s860_s3] sm:$0xff]  }
   0xc   : > { %s632_s27 = sshll.u32 %s866_s26, 3  ;;  %664 = vmatprep.subr.bf16.mxu0 %v732_v15  ;;  %668 = vmatprep.mubr.msk.bf16.mxu0 %vm733_vm1, %v732_v15  ;;  %v635_v25 = vld [vmem:[%s858_s1] ss:$0 sm:$0xff]  ;;  %v704_v34 = vld [vmem:[%s862_s5 + $0x38] sm:$0xff]   ;;  %v705_v35 = vld [vmem:[%s862_s5 + $0x30] sm:$0xff]  }
   0xd   : > { %s274_s30 = scalar_lea.vmem %s857_s0, %s632_s27  ;;  %665 = vmatpush3.bf16.msra.mxu0 %v702_v14  ;;  %672 = vmatprep.subr.bf16.mxu1 %v732_v15  ;;  %v636_v29 = vld [vmem:[%s859_s2] ss:$0 sm:$0xff]  ;;  %v706_v36 = vld [vmem:[%s862_s5 + $0x28] sm:$0xff]   ;;  %v708_v38 = vld [vmem:[%s862_s5 + $0x18] sm:$0xff]   ;;  %s280_s18 = scalar_lea.vmem %s864_s7, %s632_s27 }
   0xe   : > { %v790_v0 = vld [vmem:[%s274_s30] sm:$0xff]  ;;  %v792_v1 = vld [vmem:[%s274_s30 + $0x8] sm:$0xff]  ;;  %666 = vmatprep.subr.bf16.mxu0 %v732_v15  ;;  %688 = vmatprep.mubr.msk.bf16.mxu1 %vm733_vm1, %v732_v15  ;;  %v709_v39 = vld [vmem:[%s862_s5 + $0x10] sm:$0xff]  }
   0xf   : > { %v288_v2 = vsel %vm287_vm0, %v790_v0, 0.0  ;;  %v291_v3 = vsel %vm287_vm0, %v792_v1, 0.0  ;;  %673 = vmatpush3.bf16.msra.mxu1 %v704_v34  ;;  %v707_v37 = vld [vmem:[%s862_s5 + $0x20] sm:$0xff]   ;;  %v710_v40 = vld [vmem:[%s862_s5 + $0x8] sm:$0xff]  }
  0x10   : > { %289 = vadd.xlane.f32.xlu0 %v288_v2  ;;  %674 = vmatprep.subr.bf16.mxu1 %v732_v15  ;;  %v711_v41 = vld [vmem:[%s862_s5] sm:$0xff]  }
  0x11   : > { %667 = vmatpush3.bf16.msra.mxu0 %v703_v16  ;;  %v637_v42 = vld [vmem:[%s861_s4] ss:$0 sm:$0xff] }
  0x13   : > { %675 = vmatpush3.bf16.msra.mxu1 %v705_v35 }
  0x14   : > { %292 = vadd.xlane.f32.xlu0 %v291_v3  ;;  %676 = vmatprep.subr.bf16.mxu1 %v732_v15 }
  0x17   : > { %677 = vmatpush3.bf16.msra.mxu1 %v706_v36 }
  0x18   : > { %678 = vmatprep.subr.bf16.mxu1 %v732_v15 }
  0x1b   : > { %679 = vmatpush3.bf16.msra.mxu1 %v707_v37 }
  0x1c   : > { %680 = vmatprep.subr.bf16.mxu1 %v732_v15 }
  0x1f   : > { %681 = vmatpush3.bf16.msra.mxu1 %v708_v38  ;;  %v641_v38 = vld [vmem:[%s863_s6] ss:$0 sm:$0xff] }
  0x20   : > { %682 = vmatprep.subr.bf16.mxu1 %v732_v15 }
  0x23   : > { %683 = vmatpush3.bf16.msra.mxu1 %v709_v39 }
  0x24   : > { %684 = vmatprep.subr.bf16.mxu1 %v732_v15 }
  0x27   : > { %685 = vmatpush3.bf16.msra.mxu1 %v710_v40 }
  0x28   : > { %686 = vmatprep.subr.bf16.mxu1 %v732_v15 }
  0x2b   : > { %687 = vmatpush3.bf16.msra.mxu1 %v711_v41 }
  0x99   : > { %v290_v4 = vpop.xlane.xlu0 %289 }
  0x9a   : > { %v295_v5 = vmul.f32 0.03125, %v290_v4 }
  0x9c   : > { %v297_v6 = vsub.f32 %v790_v0, %v295_v5 }
  0x9d   : > { %v293_v7 = vpop.xlane.xlu0 %292 }
  0x9e   : > { %v296_v8 = vmul.f32 0.03125, %v293_v7  ;;  %v299_v9 = vmul.f32 %v297_v6, %v297_v6 }
  0xa0   : > { %v298_v10 = vsub.f32 %v792_v1, %v296_v8  ;;  %v301_v11 = vsel %vm287_vm0, %v299_v9, 0.0 }
  0xa1   : > { %302 = vadd.xlane.f32.xlu1 %v301_v11 }
  0xa2   : > { %v300_v12 = vmul.f32 %v298_v10, %v298_v10 }
  0xa4   : > { %v304_v13 = vsel %vm287_vm0, %v300_v12, 0.0 }
  0xa5   : > { %305 = vadd.xlane.f32.xlu1 %v304_v13 }
 0x12a   : > { %v303_v17 = vpop.xlane.xlu1 %302 }
 0x12b   : > { %v307_v18 = vmul.f32 0.03125, %v303_v17 }
 0x12d   : > { %v309_v19 = vadd.f32 1e-05, %v307_v18 }
 0x12e   : > { %v306_v20 = vpop.xlane.xlu1 %305 }
 0x12f   : > { %712 = vrsqrt.f32 %v309_v19  ;;  %v308_v21 = vmul.f32 0.03125, %v306_v20 }
 0x131   : > { %v310_v22 = vadd.f32 1e-05, %v308_v21 }
 0x133   : > { %714 = vrsqrt.f32 %v310_v22 }
 0x13c   : > { %v713_v23 = vpop.eup %712 }
 0x13d   : > { %v313_v24 = vmul.f32 %v713_v23, %v297_v6 }
 0x13f   : > { %v321_v28 = vmul.f32 %v635_v25, %v313_v24 }
 0x140   : > { %v715_v26 = vpop.eup %714 }
 0x141   : > { %v314_v27 = vmul.f32 %v715_v26, %v298_v10  ;;  %v329_v31 = vadd.f32 %v636_v29, %v321_v28 }
 0x143   : > { %v322_v30 = vmul.f32 %v635_v25, %v314_v27 }
 0x145   : > { %v330_v32 = vadd.f32 %v636_v29, %v322_v30 }
 0x147   : > { %v335_v33 = vpack.c.bf16 %v330_v32, %v329_v31 }
 0x149   : > { %669 = vmatmul.mubr.msk.bf16.vlgmr.msra.gmra.mxu0 %vm287_vm0, %v335_v33 }
 0x209   : > { %v392_v43 = vpop.f32.mrf.mxu0 }
 0x20a   : > { %v393_v44 = vadd.f32 %v637_v42, %v392_v43 }
 0x20b   : > { %v670_v45 = vpop.f32.mrf.mxu0 }
 0x20c   : > { %v401_v46 = vmul.f32 0.70710677, %v393_v44  ;;  %v399_v32 = vmul.f32 0.5, %v393_v44 }
 0x20d   : > { %v395_v47 = vpop.f32.mrf.mxu0 }
 0x20e   : > { %v403_v48 = vand.u32 2147483647, %v401_v46  ;;  %v396_v49 = vadd.f32 %v637_v42, %v395_v47  ;;  %vm443_vm2 = vcmp.lt.f32.partialorder %v401_v46, 0.0 }
 0x20f   : > { %v671_v50 = vpop.f32.mrf.mxu0 }
 0x210   : > { %v405_v51 = vmul.f32 0.3275911, %v403_v48  ;;  %v402_v52 = vmul.f32 0.70710677, %v396_v49  ;;  %v431_v57 = vsub.f32 0.0, %v403_v48  ;;  %v400_v33 = vmul.f32 0.5, %v396_v49 }
 0x212   : > { %v407_v53 = vadd.f32 1.0, %v405_v51  ;;  %v404_v54 = vand.u32 2147483647, %v402_v52  ;;  %v433_v58 = vmul.f32 %v431_v57, %v403_v48  ;;  %vm444_vm3 = vcmp.lt.f32.partialorder %v402_v52, 0.0 }
 0x214   : > { %716 = vrcp.f32 %v407_v53  ;;  %v406_v55 = vmul.f32 0.3275911, %v404_v54  ;;  %v432_v59 = vsub.f32 0.0, %v404_v54  ;;  %v435_v62 = vmul.f32 1.442695, %v433_v58 }
 0x216   : > { %v408_v56 = vadd.f32 1.0, %v406_v55  ;;  %v434_v63 = vmul.f32 %v432_v59, %v404_v54 }
 0x218   : > { %718 = vrcp.f32 %v408_v56  ;;  %v437_v6 = vmul.f32 1.442695, %v434_v63 }
 0x219   : > { %720 = vpow2.f32 %v435_v62 }
 0x21a   : > { %722 = vpow2.f32 %v437_v6 }
 0x221   : > { %v717_v60 = vpop.eup %716 }
 0x222   : > { %v413_v61 = vmul.f32 1.0614054, %v717_v60 }
 0x224   : > { %v415_v2 = vadd.f32 -1.4531521, %v413_v61 }
 0x225   : > { %v719_v3 = vpop.eup %718 }
 0x226   : > { %v417_v4 = vmul.f32 %v717_v60, %v415_v2  ;;  %v414_v5 = vmul.f32 1.0614054, %v719_v3  ;;  %v721_v19 = vpop.eup %720 }
 0x227   : > { %v723_v24 = vpop.eup %722 }
 0x228   : > { %v419_v7 = vadd.f32 1.4214138, %v417_v4  ;;  %v416_v8 = vadd.f32 -1.4531521, %v414_v5 }
 0x22a   : > { %v421_v9 = vmul.f32 %v717_v60, %v419_v7  ;;  %v418_v10 = vmul.f32 %v719_v3, %v416_v8 }
 0x22c   : > { %v423_v11 = vadd.f32 -0.28449672, %v421_v9  ;;  %v420_v12 = vadd.f32 1.4214138, %v418_v10 }
 0x22e   : > { %v425_v13 = vmul.f32 %v717_v60, %v423_v11  ;;  %v422_v14 = vmul.f32 %v719_v3, %v420_v12 }
 0x230   : > { %v427_v15 = vadd.f32 0.2548296, %v425_v13  ;;  %v424_v16 = vadd.f32 -0.28449672, %v422_v14 }
 0x232   : > { %v429_v17 = vmul.f32 %v717_v60, %v427_v15  ;;  %v426_v18 = vmul.f32 %v719_v3, %v424_v16 }
 0x234   : > { %v439_v20 = vmul.f32 %v721_v19, %v429_v17  ;;  %v428_v21 = vadd.f32 0.2548296, %v426_v18 }
 0x236   : > { %v441_v22 = vsub.f32 1.0, %v439_v20  ;;  %v430_v23 = vmul.f32 %v719_v3, %v428_v21 }
 0x238   : > { %v445_v25 = vsub.f32 0.0, %v441_v22  ;;  %v440_v26 = vmul.f32 %v723_v24, %v430_v23 }
 0x23a   : > { %v447_v27 = vsel %vm443_vm2, %v445_v25, %v441_v22  ;;  %v442_v28 = vsub.f32 1.0, %v440_v26 }
 0x23b   : > { %v449_v30 = vadd.f32 1.0, %v447_v27 }
 0x23c   : > { %v446_v29 = vsub.f32 0.0, %v442_v28 }
 0x23d   : > { %v451_v35 = vmul.f32 %v449_v30, %v399_v32 }
 0x23e   : > { %v448_v31 = vsel %vm444_vm3, %v446_v29, %v442_v28 }
 0x23f   : > { %v450_v34 = vadd.f32 1.0, %v448_v31 }
 0x241   : > { %v452_v36 = vmul.f32 %v450_v34, %v400_v33 }
 0x243   : > { %v469_v37 = vpack.c.bf16 %v452_v36, %v451_v35 }
 0x245   : > { %689 = vmatmul.mubr.bf16.vlgmr.msra.gmra.mxu1 %v469_v37 }
 0x305   : > { %v559_v39 = vpop.f32.mrf.mxu1 }
 0x306   : > { %v560_v40 = vadd.f32 %v641_v38, %v559_v39 }
 0x307   : > { %v690_v41 = vpop.f32.mrf.mxu1 }
 0x308   : > { %v566_v42 = vadd.f32 %v560_v40, %v790_v0 }
 0x309   : > { %v562_v43 = vpop.f32.mrf.mxu1 }
 0x30a   : > { %568 = vst.msk [vmem:[%s280_s18] sm:$0xff] %vm287_vm0, %v566_v42  ;;  %v563_v44 = vadd.f32 %v641_v38, %v562_v43 }
 0x30b   : > { %v691_v45 = vpop.f32.mrf.mxu1 }
 0x30c   : > { %v567_v46 = vadd.f32 %v563_v44, %v792_v1 }
 0x30e   : > { %569 = vst.msk [vmem:[%s280_s18 + $0x8] sm:$0xff] %vm287_vm0, %v567_v46 }
 0x30f PF: > { %s17_s24 = sadd.s32 1, %s730_s24  }
 0x310   : > { %p14_p4 = scmp.ge.s32.totalorder %s17_s24, 4  }
 0x312   :  { %16 = sbr.rel (!%p14_p4) target bundleno = 1 (0x1), region = 78 }

// kernel: _lambda_.11
= control target key start
LH: loop header
LB: loop body
LE: loop exit
PB: predicated region body
PF: predicated region fallthrough
CT: control target
= control target key end

     0   :  { %s1845_s30 = smov 0   ;;  %s2074_s0 = inlined_call_operand.vmem [shape: f32[32,32], index: 0, kind: input, shape index: {}]   ;;  %s2075_s1 = inlined_call_operand.vmem [shape: f32[1,32], index: 1, kind: input, shape index: {}]   ;;  %s2076_s2 = inlined_call_operand.vmem [shape: f32[1,32], index: 2, kind: input, shape index: {}, may-alias: {2,8}]   ;;  %s2077_s3 = inlined_call_operand.vmem [shape: bf16[32,96], index: 3, kind: input, shape index: {}]   ;;  %s2078_s4 = inlined_call_operand.vmem [shape: f32[1,96], index: 4, kind: input, shape index: {}]   ;;  %s2079_s5 = inlined_call_operand.vmem [shape: f32[2,4,4], index: 5, kind: input, shape index: {}]   ;;  %s2080_s6 = inlined_call_operand.vmem [shape: f32[1,4,4], index: 6, kind: input, shape index: {}]   ;;  %s2081_s7 = inlined_call_operand.vmem [shape: bf16[32,32], index: 7, kind: input, shape index: {}]   ;;  %s2082_s8 = inlined_call_operand.vmem [shape: f32[1,32], index: 8, kind: input, shape index: {}, may-alias: {2,8}]   ;;  %s2083_s9 = inlined_call_operand.vmem [shape: f32[32,32], index: 9, kind: output, shape index: {}]  }
   0x1 LB: > { %s1533_s10 = sadd.s32 4294967295, %s1785_s30   ;;  %p1537_p0 = scmp.ge.s32.totalorder %s1785_s30, 1  ;;  %s1785_s30 = sphi %s1845_s30, %s19_s30  }
   0x2   : > { %p288_p1 = scmp.lt.s32.totalorder %s1785_s30, 3 }
   0x4   : > { %p289_p2 = pnand %p1537_p0, %p288_p1 }
   0x5   : > { %s1538_s11 = sshll.u32 (!%p289_p2), %s1533_s10, 1  ;;  %s1789_s26 = smov (!%p289_p2), 96  }
   0x6   : > { %292 = sbr.rel (%p289_p2) target bundleno = 2311 (0x907), region = 56  ;;  %p325_p3 = scmp.lt.s32.totalorder (!%p289_p2), %s1538_s11, 3 }
   0x7   : > { %s1790_s13 = smov (!%p289_p2), 64   ;;  %s1791_s14 = smov (!%p289_p2), 80  }
   0x8   : > { %s1793_s18 = smov (!%p289_p2), 48   ;;  %s1794_s19 = smov (!%p289_p2), 16  }
   0xb   : > { %s2085_s11 = smov (!%p325_p3, %s1538_s11), 3  ;;  %vm341_vm0 = vcmask 261120   ;;  %v1737_v14 = vld [vmem:[%s2077_s3 + $0x8] sm:$0xff]   ;;  %v1787_v15 = vmov 0.0   ;;  %vm1788_vm1 = vmmov 0   ;;  %v1738_v16 = vld [vmem:[%s2077_s3] sm:$0xff]  }
   0xc   : > { %s1539_s12 = sshll.u32 %s2085_s11, 3  ;;  %1609 = vmatprep.subr.bf16.mxu0 %v1787_v15  ;;  %1613 = vmatprep.mubr.msk.bf16.mxu0 %vm1788_vm1, %v1787_v15  ;;  %v1542_v25 = vld [vmem:[%s2075_s1] ss:$0 sm:$0xff]  ;;  %vm476_vm2 = vcmask 130048   ;;  %vm674_vm3 = vcmask 27648   ;;  %vm729_vm4 = vcmask 1041408  }
   0xd   : > { %s328_s15 = scalar_lea.vmem %s2074_s0, %s1539_s12  ;;  %1610 = vmatpush3.bf16.msra.mxu0 %v1737_v14  ;;  %1617 = vmatprep.subr.bf16.mxu1 %v1787_v15  ;;  %v1543_v29 = vld [vmem:[%s2076_s2] ss:$0 sm:$0xff]  ;;  %vm725_vm5 = vcmask 31744   ;;  %vm917_vm6 = vcmask 125952   ;;  %vm1388_vm7 = vcmask 257152   ;;  %s334_s28 = scalar_lea.vmem %s2083_s9, %s1539_s12 }
   0xe   : > { %v1861_v0 = vld [vmem:[%s328_s15] sm:$0xff]  ;;  %v1863_v1 = vld [vmem:[%s328_s15 + $0x8] sm:$0xff]  ;;  %1611 = vmatprep.subr.bf16.mxu0 %v1787_v15  ;;  %1619 = vmatprep.mubr.msk.bf16.mxu1 %vm1788_vm1, %v1787_v15  ;;  %s1792_s15 = smov 112  }
   0xf   : > { %v342_v2 = vsel %vm341_vm0, %v1861_v0, 0.0  ;;  %v345_v3 = vsel %vm341_vm0, %v1863_v1, 0.0  ;;  %v1544_v34 = vld [vmem:[%s2078_s4] ss:$0 sm:$0xff] }
  0x10   : > { %343 = vadd.xlane.f32.xlu0 %v342_v2  ;;  %v472_v63 = vld [vmem:[%s2079_s5] sm:$0xf] }
  0x11   : > { %1612 = vmatpush3.bf16.msra.mxu0 %v1738_v16 }
  0x12   : > { %1623 = vmatprep.subr.bf16.mxu0 %v1787_v15 }
  0x14   : > { %346 = vadd.xlane.f32.xlu0 %v345_v3  ;;  %v1949_v3 = vld [vmem:[%s2080_s6] sm:$0xf] }
  0x99   : > { %v344_v4 = vpop.xlane.xlu0 %343 }
  0x9a   : > { %v349_v5 = vmul.f32 0.03125, %v344_v4 }
  0x9c   : > { %v351_v6 = vsub.f32 %v1861_v0, %v349_v5 }
  0x9d   : > { %v347_v7 = vpop.xlane.xlu0 %346 }
  0x9e   : > { %v350_v8 = vmul.f32 0.03125, %v347_v7  ;;  %v353_v9 = vmul.f32 %v351_v6, %v351_v6 }
  0xa0   : > { %v352_v10 = vsub.f32 %v1863_v1, %v350_v8  ;;  %v355_v11 = vsel %vm341_vm0, %v353_v9, 0.0 }
  0xa1   : > { %356 = vadd.xlane.f32.xlu1 %v355_v11 }
  0xa2   : > { %v354_v12 = vmul.f32 %v352_v10, %v352_v10 }
  0xa4   : > { %v358_v13 = vsel %vm341_vm0, %v354_v12, 0.0 }
  0xa5   : > { %359 = vadd.xlane.f32.xlu1 %v358_v13 }
 0x12a   : > { %v357_v17 = vpop.xlane.xlu1 %356 }
 0x12b   : > { %v361_v18 = vmul.f32 0.03125, %v357_v17 }
 0x12d   : > { %v363_v19 = vadd.f32 1e-05, %v361_v18 }
 0x12e   : > { %v360_v20 = vpop.xlane.xlu1 %359 }
 0x12f   : > { %1743 = vrsqrt.f32 %v363_v19  ;;  %v362_v21 = vmul.f32 0.03125, %v360_v20 }
 0x131   : > { %v364_v22 = vadd.f32 1e-05, %v362_v21 }
 0x133   : > { %1745 = vrsqrt.f32 %v364_v22 }
 0x13c   : > { %v1744_v23 = vpop.eup %1743 }
 0x13d   : > { %v367_v24 = vmul.f32 %v1744_v23, %v351_v6 }
 0x13f   : > { %v375_v28 = vmul.f32 %v1542_v25, %v367_v24 }
 0x140   : > { %v1746_v26 = vpop.eup %1745 }
 0x141   : > { %v368_v27 = vmul.f32 %v1746_v26, %v352_v10  ;;  %v383_v31 = vadd.f32 %v1543_v29, %v375_v28 }
 0x143   : > { %v376_v30 = vmul.f32 %v1542_v25, %v368_v27 }
 0x145   : > { %v384_v32 = vadd.f32 %v1543_v29, %v376_v30 }
 0x147   : > { %v389_v33 = vpack.c.bf16 %v384_v32, %v383_v31 }
 0x149   : > { %1614 = vmatmul.mubr.msk.bf16.vlgmr.msra.gmra.mxu0 %vm341_vm0, %v389_v33 }
 0x14a   : > { %1625 = vmatprep.mubr.msk.bf16.mxu0 %vm1788_vm1, %v1787_v15 }
 0x209   : > { %v446_v35 = vpop.f32.mrf.mxu0 }
 0x20a   : > { %v447_v36 = vadd.f32 %v1544_v34, %v446_v35 }
 0x20b   : > { %v1615_v37 = vpop.f32.mrf.mxu0 }
 0x20c   : > { %v455_v38 = vcombine.high %v447_v36, %v447_v36  ;;  %v1899_v39 = vpack.c.bf16 %v447_v36, %v447_v36  ;;  %v460_v50 = vmul.f32 0.25, %v447_v36 }
 0x20d   : > { %v449_v40 = vpop.f32.mrf.mxu0 }
 0x20e   : > { %v1901_v41 = vpack.c.bf16 %v455_v38, %v455_v38  ;;  %v450_v42 = vadd.f32 %v1544_v34, %v449_v40  ;;  %474 = vrot.lane.b32.xlu0 %v1899_v39, %s1789_s26  ;;  %v461_v52 = vmul.f32 0.25, %v455_v38  ;;  %v1915_v54 = vpack.c.bf16 %v460_v50, %v460_v50 }
 0x20f   : > { %v1616_v43 = vpop.f32.mrf.mxu0 }
 0x210   : > { %524 = vrot.lane.b32.xlu1 %v1901_v41, %s1789_s26  ;;  %v456_v44 = vcombine.high %v450_v42, %v450_v42  ;;  %v1905_v45 = vpack.c.bf16 %v450_v42, %v450_v42  ;;  %v1917_v55 = vpack.c.bf16 %v461_v52, %v461_v52  ;;  %v462_v58 = vmul.f32 0.25, %v450_v42 }
 0x212   : > { %v1908_v46 = vpack.c.bf16 %v456_v44, %v456_v44  ;;  %v463_v60 = vmul.f32 0.25, %v456_v44  ;;  %v1931_v61 = vpack.c.bf16 %v462_v58, %v462_v58 }
 0x214   : > { %573 = vrot.lane.b32.xlu1 %v1905_v45, %s1789_s26  ;;  %v1933_v62 = vpack.c.bf16 %v463_v60, %v463_v60 }
 0x218   : > { %622 = vrot.lane.b32.xlu1 %v1908_v46, %s1789_s26 }
 0x280   : > { %v475_v47 = vpop.permute.xlu0 %474 }
 0x281   : > { %v481_v48 = vsel %vm476_vm2, %v475_v47, 0 }
 0x282   : > { %1618 = vmatpush3.bf16.xpose.msra.mxu1 %v481_v48  ;;  %v525_v49 = vpop.permute.xlu1 %524 }
 0x283   : > { %v530_v51 = vsel %vm476_vm2, %v525_v49, 0  ;;  %1629 = vmatprep.subr.bf16.mxu1 %v1787_v15 }
 0x284   : > { %1624 = vmatpush3.bf16.xpose.msra.mxu0 %v530_v51 }
 0x285   : > { %1635 = vmatprep.subr.bf16.mxu0 %v1787_v15 }
 0x286   : > { %v574_v53 = vpop.permute.xlu1 %573 }
 0x287   : > { %v579_v56 = vsel %vm476_vm2, %v574_v53, 0 }
 0x289   : > { %1620 = vmatmul.mubr.msk.bf16.vlgmr.msra.gmra.mxu1 %vm476_vm2, %v1915_v54 }
 0x28a   : > { %1630 = vmatpush3.bf16.xpose.msra.mxu1 %v579_v56  ;;  %v623_v57 = vpop.permute.xlu1 %622  ;;  %1631 = vmatprep.mubr.msk.bf16.mxu1 %vm1788_vm1, %v1787_v15 }
 0x28b   : > { %v628_v59 = vsel %vm476_vm2, %v623_v57, 0  ;;  %1626 = vmatmul.mubr.msk.bf16.vlgmr.msra.gmra.mxu0 %vm476_vm2, %v1917_v55  ;;  %1641 = vmatprep.subr.bf16.mxu1 %v1787_v15 }
 0x28c   : > { %1636 = vmatpush3.bf16.xpose.msra.mxu0 %v628_v59  ;;  %1637 = vmatprep.mubr.msk.bf16.mxu0 %vm1788_vm1, %v1787_v15 }
 0x28d   : > { %1647 = vmatprep.subr.bf16.mxu0 %v1787_v15 }
 0x291   : > { %1632 = vmatmul.mubr.msk.bf16.vlgmr.msra.gmra.mxu1 %vm476_vm2, %v1931_v61 }
 0x292   : > { %1643 = vmatprep.mubr.msk.bf16.mxu1 %vm1788_vm1, %v1787_v15 }
 0x293   : > { %1638 = vmatmul.mubr.msk.bf16.vlgmr.msra.gmra.mxu0 %vm476_vm2, %v1933_v62 }
 0x294   : > { %1649 = vmatprep.mubr.msk.bf16.mxu0 %vm1788_vm1, %v1787_v15 }
 0x349   : > { %v517_v2 = vpop.f32.mrf.mxu1 }
 0x34a   : > { %v518_v4 = vadd.f32 %v517_v2, %v472_v63 }
 0x34b   : > { %v1621_v5 = vpop.f32.mrf.mxu1  ;;  %v566_v6 = vpop.f32.mrf.mxu0 }
 0x34c   : > { %v567_v7 = vadd.f32 %v566_v6, %v472_v63  ;;  %v670_v8 = vadd.f32 %v518_v4, %v1949_v3 }
 0x34d   : > { %v520_v9 = vpop.f32.mrf.mxu1  ;;  %v1627_v10 = vpop.f32.mrf.mxu0 }
 0x34e   : > { %v675_v11 = vsel %vm674_vm3, %v670_v8, -inf  ;;  %v671_v12 = vadd.f32 %v567_v7, %v1949_v3 }
 0x34f   : > { %676 = vmax.xlane.f32.xlu0 %v675_v11  ;;  %v1622_v13 = vpop.f32.mrf.mxu1  ;;  %v569_v14 = vpop.f32.mrf.mxu0 }
 0x350   : > { %v678_v16 = vsel %vm674_vm3, %v671_v12, -inf }
 0x351   : > { %v615_v17 = vpop.f32.mrf.mxu1  ;;  %679 = vmax.xlane.f32.xlu1 %v678_v16  ;;  %v1628_v18 = vpop.f32.mrf.mxu0 }
 0x352   : > { %v616_v19 = vadd.f32 %v615_v17, %v472_v63 }
 0x353   : > { %v1633_v20 = vpop.f32.mrf.mxu1  ;;  %v664_v21 = vpop.f32.mrf.mxu0 }
 0x354   : > { %v665_v22 = vadd.f32 %v664_v21, %v472_v63  ;;  %v672_v23 = vadd.f32 %v616_v19, %v1949_v3 }
 0x355   : > { %v618_v24 = vpop.f32.mrf.mxu1  ;;  %v1639_v25 = vpop.f32.mrf.mxu0 }
 0x356   : > { %v681_v26 = vsel %vm674_vm3, %v672_v23, -inf  ;;  %v673_v27 = vadd.f32 %v665_v22, %v1949_v3 }
 0x357   : > { %682 = vmax.xlane.f32.xlu0 %v681_v26  ;;  %v1634_v28 = vpop.f32.mrf.mxu1  ;;  %v667_v29 = vpop.f32.mrf.mxu0 }
 0x358   : > { %v684_v31 = vsel %vm674_vm3, %v673_v27, -inf }
 0x359   : > { %v1640_v30 = vpop.f32.mrf.mxu0 }
 0x35b   : > { %685 = vmax.xlane.f32.xlu0 %v684_v31 }
 0x362   : > { %773 = vrot.lane.b32.xlu1 %v1901_v41, %s1790_s13 }
 0x366   : > { %821 = vrot.lane.b32.xlu1 %v1905_v45, %s1790_s13 }
 0x36a   : > { %869 = vrot.lane.b32.xlu1 %v1908_v46, %s1790_s13 }
 0x3d8   : > { %v677_v32 = vpop.xlane.xlu0 %676 }
 0x3d9   : > { %v687_v33 = vsub.f32 %v670_v8, %v677_v32 }
 0x3da   : > { %v680_v34 = vpop.xlane.xlu1 %679 }
 0x3db   : > { %v691_v35 = vmul.f32 1.442695, %v687_v33  ;;  %v688_v36 = vsub.f32 %v671_v12, %v680_v34 }
 0x3dd   : > { %1747 = vpow2.f32 %v691_v35  ;;  %v693_v37 = vmul.f32 1.442695, %v688_v36 }
 0x3de   : > { %v774_v38 = vpop.permute.xlu1 %773 }
 0x3df   : > { %1749 = vpow2.f32 %v693_v37  ;;  %v779_v40 = vsel %vm729_vm4, %v774_v38, 0 }
 0x3e0   : > { %1648 = vmatpush3.bf16.msra.mxu0 %v779_v40  ;;  %v683_v48 = vpop.xlane.xlu0 %682 }
 0x3e1   : > { %1659 = vmatprep.subr.bf16.mxu0 %v1787_v15  ;;  %v689_v50 = vsub.f32 %v672_v23, %v683_v48 }
 0x3e2   : > { %v822_v60 = vpop.permute.xlu1 %821 }
 0x3e3   : > { %v695_v52 = vmul.f32 1.442695, %v689_v50 }
 0x3e4   : > { %v686_v49 = vpop.xlane.xlu0 %685 }
 0x3e5   : > { %v690_v51 = vsub.f32 %v673_v27, %v686_v49  ;;  %1751 = vpow2.f32 %v695_v52 }
 0x3e6   : > { %v870_v63 = vpop.permute.xlu1 %869 }
 0x3e7   : > { %v697_v53 = vmul.f32 1.442695, %v690_v51  ;;  %v875_v10 = vsel %vm729_vm4, %v870_v63, 0  ;;  %v1556_v51 = vld [vmem:[%s2079_s5 + $0x4] sm:$0xf] }
 0x3e9   : > { %1753 = vpow2.f32 %v697_v53 }
 0x3ea   : > { %v1748_v42 = vpop.eup %1747 }
 0x3eb   : > { %v699_v43 = vsel %vm674_vm3, %v1748_v42, 0.0 }
 0x3ec   : > { %v1750_v44 = vpop.eup %1749  ;;  %700 = vadd.xlane.f32.xlu0 %v699_v43 }
 0x3ed   : > { %v702_v47 = vsel %vm674_vm3, %v1750_v44, 0.0 }
 0x3ee   : > { %703 = vadd.xlane.f32.xlu1 %v702_v47 }
 0x3f2   : > { %v1752_v56 = vpop.eup %1751 }
 0x3f3   : > { %v705_v58 = vsel %vm674_vm3, %v1752_v56, 0.0 }
 0x3f6   : > { %v1754_v57 = vpop.eup %1753 }
 0x3f7   : > { %v708_v59 = vsel %vm674_vm3, %v1754_v57, 0.0 }
 0x3ff   : > { %978 = vrot.lane.b32.xlu1 %v1901_v41, %s1791_s14 }
 0x402   : > { %723 = vrot.lane.b32.xlu0 %v1899_v39, %s1790_s13 }
 0x421   : > { %706 = vadd.xlane.f32.xlu0 %v705_v58 }
 0x423   : > { %709 = vadd.xlane.f32.xlu1 %v708_v59 }
 0x434   : > { %976 = vrot.lane.b32.xlu1 %v1917_v55, %s1792_s15 }
 0x437   : > { %927 = vrot.lane.b32.xlu0 %v1899_v39, %s1791_s14 }
 0x438   : > { %1080 = vrot.lane.b32.xlu1 %v1908_v46, %s1791_s14 }
 0x43b   : > { %925 = vrot.lane.b32.xlu0 %v1915_v54, %s1792_s15 }
 0x43c   : > { %1078 = vrot.lane.b32.xlu1 %v1933_v62, %s1792_s15 }
 0x43f   : > { %1029 = vrot.lane.b32.xlu0 %v1905_v45, %s1791_s14 }
 0x443   : > { %1027 = vrot.lane.b32.xlu0 %v1931_v61, %s1792_s15  ;;  %v827_v61 = vsel %vm729_vm4, %v822_v60, 0 }
 0x475   : > { %v701_v2 = vpop.xlane.xlu0 %700 }
 0x476   : > { %1755 = vrcp.f32 %v701_v2 }
 0x477   : > { %v704_v4 = vpop.xlane.xlu1 %703 }
 0x478   : > { %1757 = vrcp.f32 %v704_v4 }
 0x479   : > { %v724_v5 = vpop.permute.xlu0 %723 }
 0x47a   : > { %v731_v55 = vsel %vm729_vm4, %v724_v5, 0 }
 0x47b   : > { %1642 = vmatpush3.bf16.msra.mxu1 %v731_v55  ;;  %v979_v11 = vpop.permute.xlu1 %978 }
 0x47c   : > { %1653 = vmatprep.subr.bf16.mxu1 %v1787_v15  ;;  %v984_v25 = vsel %vm476_vm2, %v979_v11, 0 }
 0x483   : > { %v1756_v6 = vpop.eup %1755 }
 0x484   : > { %v715_v54 = vmul.f32 %v1756_v6, %v1748_v42 }
 0x485   : > { %v1758_v7 = vpop.eup %1757 }
 0x486   : > { %v719_v62 = vpack.c.bf16 %v715_v54, %v715_v54  ;;  %v716_v8 = vmul.f32 %v1758_v7, %v1750_v44 }
 0x488   : > { %1644 = vmatmul.mubr.msk.bf16.vlgmr.msra.gmra.mxu1 %vm725_vm5, %v719_v62  ;;  %v720_v9 = vpack.c.bf16 %v716_v8, %v716_v8 }
 0x489   : > { %1654 = vmatpush3.bf16.msra.mxu1 %v827_v61  ;;  %1655 = vmatprep.mubr.msk.bf16.mxu1 %vm1788_vm1, %v1787_v15 }
 0x48a   : > { %1650 = vmatmul.mubr.msk.bf16.vlgmr.msra.gmra.mxu0 %vm725_vm5, %v720_v9  ;;  %1665 = vmatprep.subr.bf16.mxu1 %v1787_v15 }
 0x48b   : > { %1660 = vmatpush3.bf16.msra.mxu0 %v875_v10  ;;  %1661 = vmatprep.mubr.msk.bf16.mxu0 %vm1788_vm1, %v1787_v15 }
 0x48c   : > { %1671 = vmatprep.subr.bf16.mxu0 %v1787_v15 }
 0x4aa   : > { %v707_v12 = vpop.xlane.xlu0 %706 }
 0x4ab   : > { %1759 = vrcp.f32 %v707_v12 }
 0x4ac   : > { %v710_v13 = vpop.xlane.xlu1 %709 }
 0x4ad   : > { %1761 = vrcp.f32 %v710_v13 }
 0x4ae   : > { %v928_v14 = vpop.permute.xlu0 %927 }
 0x4af   : > { %v933_v22 = vsel %vm476_vm2, %v928_v14, 0 }
 0x4b0   : > { %v977_v24 = vpop.permute.xlu1 %976 }
 0x4b2   : > { %v926_v21 = vpop.permute.xlu0 %925 }
 0x4b4   : > { %v1081_v27 = vpop.permute.xlu1 %1080 }
 0x4b5   : > { %v1086_v29 = vsel %vm476_vm2, %v1081_v27, 0 }
 0x4b6   : > { %v1030_v26 = vpop.permute.xlu0 %1029 }
 0x4b7   : > { %v1035_v28 = vsel %vm476_vm2, %v1030_v26, 0 }
 0x4b8   : > { %v1760_v16 = vpop.eup %1759  ;;  %v1079_v31 = vpop.permute.xlu1 %1078 }
 0x4b9   : > { %v717_v17 = vmul.f32 %v1760_v16, %v1752_v56 }
 0x4ba   : > { %v1762_v18 = vpop.eup %1761  ;;  %v1028_v30 = vpop.permute.xlu0 %1027 }
 0x4bb   : > { %v721_v19 = vpack.c.bf16 %v717_v17, %v717_v17  ;;  %v718_v20 = vmul.f32 %v1762_v18, %v1754_v57 }
 0x4bd   : > { %1656 = vmatmul.mubr.msk.bf16.vlgmr.msra.gmra.mxu1 %vm725_vm5, %v721_v19  ;;  %v722_v23 = vpack.c.bf16 %v718_v20, %v718_v20 }
 0x4be   : > { %1666 = vmatpush3.bf16.xpose.msra.mxu1 %v933_v22  ;;  %1667 = vmatprep.mubr.msk.bf16.mxu1 %vm1788_vm1, %v1787_v15 }
 0x4bf   : > { %1662 = vmatmul.mubr.msk.bf16.vlgmr.msra.gmra.mxu0 %vm725_vm5, %v722_v23  ;;  %1677 = vmatprep.subr.bf16.mxu1 %v1787_v15 }
 0x4c0   : > { %1672 = vmatpush3.bf16.xpose.msra.mxu0 %v984_v25  ;;  %1673 = vmatprep.mubr.msk.bf16.mxu0 %vm1788_vm1, %v1787_v15 }
 0x4c1   : > { %1683 = vmatprep.subr.bf16.mxu0 %v1787_v15 }
 0x4c5   : > { %1668 = vmatmul.mubr.msk.bf16.vlgmr.msra.gmra.mxu1 %vm476_vm2, %v926_v21 }
 0x4c6   : > { %1678 = vmatpush3.bf16.xpose.msra.mxu1 %v1035_v28  ;;  %1679 = vmatprep.mubr.msk.bf16.mxu1 %vm1788_vm1, %v1787_v15 }
 0x4c7   : > { %1674 = vmatmul.mubr.msk.bf16.vlgmr.msra.gmra.mxu0 %vm476_vm2, %v977_v24  ;;  %1689 = vmatprep.subr.bf16.mxu1 %v1787_v15 }
 0x4c8   : > { %1684 = vmatpush3.bf16.xpose.msra.mxu0 %v1086_v29  ;;  %1685 = vmatprep.mubr.msk.bf16.mxu0 %vm1788_vm1, %v1787_v15 }
 0x4c9   : > { %1695 = vmatprep.subr.bf16.mxu0 %v1787_v15 }
 0x4cd   : > { %1680 = vmatmul.mubr.msk.bf16.vlgmr.msra.gmra.mxu1 %vm476_vm2, %v1028_v30 }
 0x4ce   : > { %1691 = vmatprep.mubr.msk.bf16.mxu1 %vm1788_vm1, %v1787_v15 }
 0x4cf   : > { %1686 = vmatmul.mubr.msk.bf16.vlgmr.msra.gmra.mxu0 %vm476_vm2, %v1079_v31 }
 0x4d0   : > { %1697 = vmatprep.mubr.msk.bf16.mxu0 %vm1788_vm1, %v1787_v15 }
 0x548   : > { %v767_v32 = vpop.f32.mrf.mxu1 }
 0x549   : > { %918 = vst.msk [vmem:[#allocation2] sm:$0xf] %vm917_vm6, %v767_v32 }
 0x54a   : > { %v1645_v33 = vpop.f32.mrf.mxu1  ;;  %v815_v34 = vpop.f32.mrf.mxu0 }
 0x54b   : > { %919 = vst.msk [vmem:[#allocation2 + $0x4] sm:$0xf] %vm917_vm6, %v815_v34 }
 0x54c   : > { %v770_v35 = vpop.f32.mrf.mxu1  ;;  %v1651_v36 = vpop.f32.mrf.mxu0 }
 0x54e   : > { %v1646_v37 = vpop.f32.mrf.mxu1  ;;  %v818_v38 = vpop.f32.mrf.mxu0 }
 0x550   : > { %v1652_v40 = vpop.f32.mrf.mxu0 }
 0x57d   : > { %v863_v42 = vpop.f32.mrf.mxu1 }
 0x57e   : > { %920 = vst.msk [vmem:[#allocation2 + $0x8] sm:$0xf] %vm917_vm6, %v863_v42 }
 0x57f   : > { %v1657_v43 = vpop.f32.mrf.mxu1  ;;  %v911_v44 = vpop.f32.mrf.mxu0 }
 0x580   : > { %921 = vst.msk [vmem:[#allocation2 + $0xc] sm:$0xf] %vm917_vm6, %v911_v44 }
 0x581   : > { %v866_v47 = vpop.f32.mrf.mxu1  ;;  %v1663_v48 = vpop.f32.mrf.mxu0 }
 0x583   : > { %v1658_v49 = vpop.f32.mrf.mxu1  ;;  %v914_v50 = vpop.f32.mrf.mxu0 }
 0x585   : > { %v1664_v52 = vpop.f32.mrf.mxu0  ;;  %v969_v53 = vpop.f32.mrf.mxu1 }
 0x586   : > { %v970_v56 = vadd.f32 %v1556_v51, %v969_v53 }
 0x587   : > { %v1669_v57 = vpop.f32.mrf.mxu1  ;;  %v1020_v58 = vpop.f32.mrf.mxu0 }
 0x588   : > { %v1021_v59 = vadd.f32 %v1556_v51, %v1020_v58  ;;  %v1128_v60 = vadd.f32 %v970_v56, %v1949_v3 }
 0x589   : > { %v972_v63 = vpop.f32.mrf.mxu1  ;;  %v1675_v2 = vpop.f32.mrf.mxu0 }
 0x58a   : > { %v1132_v4 = vsel %vm674_vm3, %v1128_v60, -inf  ;;  %v1129_v5 = vadd.f32 %v1021_v59, %v1949_v3 }
 0x58b   : > { %1133 = vmax.xlane.f32.xlu0 %v1132_v4  ;;  %v1670_v55 = vpop.f32.mrf.mxu1  ;;  %v1023_v6 = vpop.f32.mrf.mxu0 }
 0x58c   : > { %v1135_v54 = vsel %vm674_vm3, %v1129_v5, -inf }
 0x58d   : > { %v1071_v7 = vpop.f32.mrf.mxu1  ;;  %1136 = vmax.xlane.f32.xlu1 %v1135_v54  ;;  %v1676_v62 = vpop.f32.mrf.mxu0 }
 0x58e   : > { %v1072_v8 = vadd.f32 %v1556_v51, %v1071_v7 }
 0x58f   : > { %v1681_v61 = vpop.f32.mrf.mxu1  ;;  %v1122_v9 = vpop.f32.mrf.mxu0 }
 0x590   : > { %v1123_v10 = vadd.f32 %v1556_v51, %v1122_v9  ;;  %v1130_v11 = vadd.f32 %v1072_v8, %v1949_v3 }
 0x591   : > { %v1074_v12 = vpop.f32.mrf.mxu1  ;;  %v1687_v13 = vpop.f32.mrf.mxu0 }
 0x592   : > { %v1138_v14 = vsel %vm674_vm3, %v1130_v11, -inf  ;;  %v1131_v16 = vadd.f32 %v1123_v10, %v1949_v3 }
 0x593   : > { %1139 = vmax.xlane.f32.xlu0 %v1138_v14  ;;  %v1682_v17 = vpop.f32.mrf.mxu1  ;;  %v1125_v18 = vpop.f32.mrf.mxu0 }
 0x594   : > { %v1141_v20 = vsel %vm674_vm3, %v1131_v16, -inf  ;;  %v1740_v17 = vld [vmem:[%s2081_s7] sm:$0xff]  }
 0x595   : > { %v1688_v19 = vpop.f32.mrf.mxu0 }
 0x597   : > { %1142 = vmax.xlane.f32.xlu0 %v1141_v20 }
 0x614   : > { %v1134_v21 = vpop.xlane.xlu0 %1133 }
 0x615   : > { %v1144_v22 = vsub.f32 %v1128_v60, %v1134_v21 }
 0x616   : > { %v1137_v23 = vpop.xlane.xlu1 %1136 }
 0x617   : > { %v1148_v24 = vmul.f32 1.442695, %v1144_v22  ;;  %v1145_v25 = vsub.f32 %v1129_v5, %v1137_v23 }
 0x619   : > { %1763 = vpow2.f32 %v1148_v24  ;;  %v1150_v26 = vmul.f32 1.442695, %v1145_v25 }
 0x61b   : > { %1765 = vpow2.f32 %v1150_v26 }
 0x61c   : > { %v1140_v27 = vpop.xlane.xlu0 %1139 }
 0x61d   : > { %v1146_v28 = vsub.f32 %v1130_v11, %v1140_v27 }
 0x61f   : > { %v1152_v29 = vmul.f32 1.442695, %v1146_v28 }
 0x620   : > { %v1143_v35 = vpop.xlane.xlu0 %1142 }
 0x621   : > { %1767 = vpow2.f32 %v1152_v29  ;;  %v1147_v36 = vsub.f32 %v1131_v16, %v1143_v35  ;;  %v1739_v16 = vld [vmem:[%s2081_s7 + $0x8] sm:$0xff]  }
 0x623   : > { %v1154_v37 = vmul.f32 1.442695, %v1147_v36 }
 0x625   : > { %1769 = vpow2.f32 %v1154_v37 }
 0x626   : > { %v1764_v3 = vpop.eup %1763 }
 0x627   : > { %v1156_v30 = vsel %vm674_vm3, %v1764_v3, 0.0 }
 0x628   : > { %v1766_v31 = vpop.eup %1765  ;;  %1157 = vadd.xlane.f32.xlu0 %v1156_v30 }
 0x629   : > { %v1159_v32 = vsel %vm674_vm3, %v1766_v31, 0.0 }
 0x62a   : > { %1160 = vadd.xlane.f32.xlu1 %v1159_v32 }
 0x62e   : > { %v1768_v33 = vpop.eup %1767 }
 0x62f   : > { %v1162_v34 = vsel %vm674_vm3, %v1768_v33, 0.0 }
 0x630   : > { %1163 = vadd.xlane.f32.xlu0 %v1162_v34 }
 0x632   : > { %v1770_v38 = vpop.eup %1769 }
 0x633   : > { %v1165_v40 = vsel %vm674_vm3, %v1770_v38, 0.0 }
 0x63b   : > { %1228 = vrot.lane.b32.xlu1 %v1901_v41, %s1793_s18 }
 0x63f   : > { %1276 = vrot.lane.b32.xlu1 %v1905_v45, %s1793_s18 }
 0x646   : > { %1180 = vrot.lane.b32.xlu0 %v1899_v39, %s1793_s18 }
 0x663   : > { %1166 = vadd.xlane.f32.xlu1 %v1165_v40 }
 0x674   : > { %1324 = vrot.lane.b32.xlu1 %v1908_v46, %s1793_s18 }
 0x6b1   : > { %v1158_v42 = vpop.xlane.xlu0 %1157 }
 0x6b2   : > { %1771 = vrcp.f32 %v1158_v42 }
 0x6b3   : > { %v1161_v43 = vpop.xlane.xlu1 %1160 }
 0x6b4   : > { %1773 = vrcp.f32 %v1161_v43 }
 0x6b7   : > { %v1229_v44 = vpop.permute.xlu1 %1228 }
 0x6b8   : > { %v1234_v41 = vsel %vm729_vm4, %v1229_v44, 0 }
 0x6b9   : > { %1696 = vmatpush3.bf16.msra.mxu0 %v1234_v41  ;;  %v1164_v45 = vpop.xlane.xlu0 %1163 }
 0x6ba   : > { %1775 = vrcp.f32 %v1164_v45  ;;  %1707 = vmatprep.subr.bf16.mxu0 %v1787_v15 }
 0x6bb   : > { %v1277_v50 = vpop.permute.xlu1 %1276 }
 0x6bc   : > { %v1282_v53 = vsel %vm729_vm4, %v1277_v50, 0 }
 0x6bd   : > { %v1181_v39 = vpop.permute.xlu0 %1180 }
 0x6be   : > { %v1186_v47 = vsel %vm729_vm4, %v1181_v39, 0 }
 0x6bf   : > { %v1772_v48 = vpop.eup %1771  ;;  %1690 = vmatpush3.bf16.msra.mxu1 %v1186_v47 }
 0x6c0   : > { %1701 = vmatprep.subr.bf16.mxu1 %v1787_v15  ;;  %v1172_v46 = vmul.f32 %v1772_v48, %v1764_v3 }
 0x6c1   : > { %v1774_v49 = vpop.eup %1773 }
 0x6c2   : > { %v1176_v51 = vpack.c.bf16 %v1172_v46, %v1172_v46  ;;  %v1173_v52 = vmul.f32 %v1774_v49, %v1766_v31 }
 0x6c4   : > { %1692 = vmatmul.mubr.msk.bf16.vlgmr.msra.gmra.mxu1 %vm725_vm5, %v1176_v51  ;;  %v1177_v56 = vpack.c.bf16 %v1173_v52, %v1173_v52 }
 0x6c5   : > { %1702 = vmatpush3.bf16.msra.mxu1 %v1282_v53  ;;  %1703 = vmatprep.mubr.msk.bf16.mxu1 %vm1788_vm1, %v1787_v15 }
 0x6c6   : > { %1698 = vmatmul.mubr.msk.bf16.vlgmr.msra.gmra.mxu0 %vm725_vm5, %v1177_v56  ;;  %1713 = vmatprep.subr.bf16.mxu1 %v1787_v15 }
 0x6c7   : > { %v1776_v57 = vpop.eup %1775  ;;  %1709 = vmatprep.mubr.msk.bf16.mxu0 %vm1788_vm1, %v1787_v15 }
 0x6c8   : > { %v1174_v58 = vmul.f32 %v1776_v57, %v1768_v33 }
 0x6ca   : > { %v1178_v59 = vpack.c.bf16 %v1174_v58, %v1174_v58 }
 0x6cc   : > { %1704 = vmatmul.mubr.msk.bf16.vlgmr.msra.gmra.mxu1 %vm725_vm5, %v1178_v59 }
 0x6cd   : > { %1717 = vmatprep.mubr.msk.bf16.mxu1 %vm1788_vm1, %v1787_v15  ;;  %1714 = vmatpush3.bf16.msra.mxu1 %v1739_v16 }
 0x6ce   : > { %1715 = vmatprep.subr.bf16.mxu1 %v1787_v15  ;;  %v1565_v15 = vld [vmem:[%s2082_s8] ss:$0 sm:$0xff] }
 0x6d1   : > { %1716 = vmatpush3.bf16.msra.mxu1 %v1740_v17 }
 0x6ec   : > { %v1167_v60 = vpop.xlane.xlu1 %1166 }
 0x6ed   : > { %1777 = vrcp.f32 %v1167_v60 }
 0x6f0   : > { %v1325_v63 = vpop.permute.xlu1 %1324 }
 0x6f1   : > { %v1330_v2 = vsel %vm729_vm4, %v1325_v63, 0 }
 0x6f2   : > { %1708 = vmatpush3.bf16.msra.mxu0 %v1330_v2 }
 0x6fa   : > { %v1778_v4 = vpop.eup %1777 }
 0x6fb   : > { %v1175_v5 = vmul.f32 %v1778_v4, %v1770_v38 }
 0x6fd   : > { %v1179_v55 = vpack.c.bf16 %v1175_v5, %v1175_v5 }
 0x6ff   : > { %1710 = vmatmul.mubr.msk.bf16.vlgmr.msra.gmra.mxu0 %vm725_vm5, %v1179_v55 }
 0x784   : > { %v1222_v6 = vpop.f32.mrf.mxu1 }
 0x785   : > { %1376 = vrot.lane.b32.xlu0 %v1222_v6, %s1794_s19 }
 0x786   : > { %v1693_v54 = vpop.f32.mrf.mxu1  ;;  %v1270_v7 = vpop.f32.mrf.mxu0 }
 0x787   : > { %1378 = vrot.lane.b32.xlu1 %v1270_v7, %s1794_s19 }
 0x788   : > { %v1225_v62 = vpop.f32.mrf.mxu1  ;;  %v1699_v8 = vpop.f32.mrf.mxu0 }
 0x78a   : > { %v1694_v61 = vpop.f32.mrf.mxu1  ;;  %v1273_v9 = vpop.f32.mrf.mxu0 }
 0x78c   : > { %v1700_v10 = vpop.f32.mrf.mxu0  ;;  %v1318_v11 = vpop.f32.mrf.mxu1 }
 0x78d   : > { %1380 = vrot.lane.b32.xlu0 %v1318_v11, %s1794_s19 }
 0x78e   : > { %v1705_v12 = vpop.f32.mrf.mxu1 }
 0x790   : > { %v1321_v13 = vpop.f32.mrf.mxu1 }
 0x792   : > { %v1706_v14 = vpop.f32.mrf.mxu1 }
 0x7bf   : > { %v1366_v18 = vpop.f32.mrf.mxu0 }
 0x7c0   : > { %1382 = vrot.lane.b32.xlu1 %v1366_v18, %s1794_s19 }
 0x7c1   : > { %v1711_v19 = vpop.f32.mrf.mxu0 }
 0x7c3   : > { %v1369_v20 = vpop.f32.mrf.mxu0 }
 0x7c5   : > { %v1712_v21 = vpop.f32.mrf.mxu0 }
 0x7f7   : > { %v1377_v22 = vpop.permute.xlu0 %1376 }
 0x7f8   : > { %1389 = vst.msk [vmem:[#allocation2] sm:$0xf] %vm1388_vm7, %v1377_v22 }
 0x7f9   : > { %v1379_v23 = vpop.permute.xlu1 %1378 }
 0x7fa   : > { %1390 = vst.msk [vmem:[#allocation2 + $0x4] sm:$0xf] %vm1388_vm7, %v1379_v23 }
 0x7ff   : > { %v1381_v24 = vpop.permute.xlu0 %1380 }
 0x800   : > { %1391 = vst.msk [vmem:[#allocation2 + $0x8] sm:$0xf] %vm1388_vm7, %v1381_v24 }
 0x801   : > { %v1741_v26 = vld [vmem:[#allocation2] sm:$0xff]  }
 0x832   : > { %v1383_v25 = vpop.permute.xlu1 %1382 }
 0x833   : > { %1392 = vst.msk [vmem:[#allocation2 + $0xc] sm:$0xf] %vm1388_vm7, %v1383_v25 }
 0x83a   : > { %v1742_v27 = vld [vmem:[#allocation2 + $0x8] sm:$0xff]  }
 0x83b   : > { %v1409_v28 = vpack.c.bf16 %v1742_v27, %v1741_v26 }
 0x83d   : > { %1718 = vmatmul.mubr.msk.bf16.vlgmr.msra.gmra.mxu1 %vm341_vm0, %v1409_v28 }
 0x8fd   : > { %v1466_v29 = vpop.f32.mrf.mxu1 }
 0x8fe   : > { %v1467_v3 = vadd.f32 %v1565_v15, %v1466_v29 }
 0x8ff   : > { %v1719_v30 = vpop.f32.mrf.mxu1 }
 0x900   : > { %v1473_v31 = vadd.f32 %v1467_v3, %v1861_v0 }
 0x901   : > { %v1469_v32 = vpop.f32.mrf.mxu1 }
 0x902   : > { %1475 = vst.msk [vmem:[%s334_s28] sm:$0xff] %vm341_vm0, %v1473_v31  ;;  %v1470_v33 = vadd.f32 %v1565_v15, %v1469_v32 }
 0x903   : > { %v1720_v34 = vpop.f32.mrf.mxu1 }
 0x904   : > { %v1474_v35 = vadd.f32 %v1470_v33, %v1863_v1 }
 0x906   : > { %1476 = vst.msk [vmem:[%s334_s28 + $0x8] sm:$0xff] %vm341_vm0, %v1474_v35 }
 0x907 PF: > { %s19_s30 = sadd.s32 1, %s1785_s30  }
 0x908   : > { %p16_p4 = scmp.ge.s32.totalorder %s19_s30, 4  }
 0x90a   :  { %18 = sbr.rel (!%p16_p4) target bundleno = 1 (0x1), region = 87 }

// kernel: _lambda_.13
= control target key start
LH: loop header
LB: loop body
LE: loop exit
PB: predicated region body
PF: predicated region fallthrough
CT: control target
= control target key end

     0   :  { %s1848_s30 = smov 0   ;;  %s2092_s0 = inlined_call_operand.vmem [shape: f32[32,32], index: 0, kind: input, shape index: {}]   ;;  %s2093_s1 = inlined_call_operand.vmem [shape: f32[1,32], index: 1, kind: input, shape index: {}]   ;;  %s2094_s2 = inlined_call_operand.vmem [shape: f32[1,32], index: 2, kind: input, shape index: {}, may-alias: {2,8}]   ;;  %s2095_s3 = inlined_call_operand.vmem [shape: bf16[32,96], index: 3, kind: input, shape index: {}]   ;;  %s2096_s4 = inlined_call_operand.vmem [shape: f32[1,96], index: 4, kind: input, shape index: {}]   ;;  %s2097_s5 = inlined_call_operand.vmem [shape: f32[2,4,4], index: 5, kind: input, shape index: {}]   ;;  %s2098_s6 = inlined_call_operand.vmem [shape: f32[4,4,4], index: 6, kind: input, shape index: {}]   ;;  %s2099_s7 = inlined_call_operand.vmem [shape: bf16[32,32], index: 7, kind: input, shape index: {}]   ;;  %s2100_s8 = inlined_call_operand.vmem [shape: f32[1,32], index: 8, kind: input, shape index: {}, may-alias: {2,8}]   ;;  %s2101_s9 = inlined_call_operand.vmem [shape: f32[32,32], index: 9, kind: output, shape index: {}]  }
   0x1 LB: > { %s1536_s10 = sadd.s32 4294967295, %s1788_s30   ;;  %p1540_p0 = scmp.ge.s32.totalorder %s1788_s30, 1  ;;  %s1788_s30 = sphi %s1848_s30, %s19_s30  }
   0x2   : > { %p288_p1 = scmp.lt.s32.totalorder %s1788_s30, 3 }
   0x4   : > { %p289_p2 = pnand %p1540_p0, %p288_p1 }
   0x5   : > { %s1541_s11 = sshll.u32 (!%p289_p2), %s1536_s10, 1  ;;  %s1792_s26 = smov (!%p289_p2), 96  }
   0x6   : > { %292 = sbr.rel (%p289_p2) target bundleno = 2311 (0x907), region = 56  ;;  %p325_p3 = scmp.lt.s32.totalorder (!%p289_p2), %s1541_s11, 3 }
   0x7   : > { %s1793_s19 = smov (!%p289_p2), 64   ;;  %s1794_s20 = smov (!%p289_p2), 80  }
   0x8   : > { %s1795_s21 = smov (!%p289_p2), 112   ;;  %s1796_s24 = smov (!%p289_p2), 48  }
   0x9   : > { %s1797_s25 = smov (!%p289_p2), 16  }
   0xb   : > { %s2103_s11 = smov (!%p325_p3, %s1541_s11), 3  ;;  %vm341_vm0 = vcmask 261120   ;;  %v1740_v14 = vld [vmem:[%s2095_s3 + $0x8] sm:$0xff]   ;;  %v1790_v15 = vmov 0.0   ;;  %vm1791_vm1 = vmmov 0   ;;  %v1741_v16 = vld [vmem:[%s2095_s3] sm:$0xff]  }
   0xc   : > { %s1542_s12 = sshll.u32 %s2103_s11, 3  ;;  %1612 = vmatprep.subr.bf16.mxu0 %v1790_v15  ;;  %1616 = vmatprep.mubr.msk.bf16.mxu0 %vm1791_vm1, %v1790_v15  ;;  %v1545_v25 = vld [vmem:[%s2093_s1] ss:$0 sm:$0xff]  ;;  %vm479_vm2 = vcmask 130048   ;;  %vm677_vm3 = vcmask 27648   ;;  %vm732_vm4 = vcmask 1041408  }
   0xd   : > { %s328_s15 = scalar_lea.vmem %s2092_s0, %s1542_s12  ;;  %1613 = vmatpush3.bf16.msra.mxu0 %v1740_v14  ;;  %1620 = vmatprep.subr.bf16.mxu1 %v1790_v15  ;;  %v1546_v29 = vld [vmem:[%s2094_s2] ss:$0 sm:$0xff]  ;;  %vm728_vm5 = vcmask 31744   ;;  %vm920_vm6 = vcmask 125952   ;;  %vm1391_vm7 = vcmask 257152   ;;  %s334_s16 = scalar_lea.vmem %s2101_s9, %s1542_s12 }
   0xe   : > { %v1864_v0 = vld [vmem:[%s328_s15] sm:$0xff]  ;;  %v1866_v1 = vld [vmem:[%s328_s15 + $0x8] sm:$0xff]  ;;  %1614 = vmatprep.subr.bf16.mxu0 %v1790_v15  ;;  %1622 = vmatprep.mubr.msk.bf16.mxu1 %vm1791_vm1, %v1790_v15 }
   0xf   : > { %v342_v2 = vsel %vm341_vm0, %v1864_v0, 0.0  ;;  %v345_v3 = vsel %vm341_vm0, %v1866_v1, 0.0  ;;  %v1547_v34 = vld [vmem:[%s2096_s4] ss:$0 sm:$0xff] }
  0x10   : > { %343 = vadd.xlane.f32.xlu0 %v342_v2  ;;  %v475_v63 = vld [vmem:[%s2097_s5] sm:$0xf] }
  0x11   : > { %1615 = vmatpush3.bf16.msra.mxu0 %v1741_v16 }
  0x12   : > { %1626 = vmatprep.subr.bf16.mxu0 %v1790_v15 }
  0x14   : > { %346 = vadd.xlane.f32.xlu0 %v345_v3  ;;  %v1952_v3 = vld [vmem:[%s2098_s6] sm:$0xf] }
  0x99   : > { %v344_v4 = vpop.xlane.xlu0 %343 }
  0x9a   : > { %v349_v5 = vmul.f32 0.03125, %v344_v4 }
  0x9c   : > { %v351_v6 = vsub.f32 %v1864_v0, %v349_v5 }
  0x9d   : > { %v347_v7 = vpop.xlane.xlu0 %346 }
  0x9e   : > { %v350_v8 = vmul.f32 0.03125, %v347_v7  ;;  %v353_v9 = vmul.f32 %v351_v6, %v351_v6  ;;  %v1957_v7 = vld [vmem:[%s2098_s6 + $0x4] sm:$0xf] }
  0xa0   : > { %v352_v10 = vsub.f32 %v1866_v1, %v350_v8  ;;  %v355_v11 = vsel %vm341_vm0, %v353_v9, 0.0 }
  0xa1   : > { %356 = vadd.xlane.f32.xlu1 %v355_v11 }
  0xa2   : > { %v354_v12 = vmul.f32 %v352_v10, %v352_v10 }
  0xa4   : > { %v358_v13 = vsel %vm341_vm0, %v354_v12, 0.0 }
  0xa5   : > { %359 = vadd.xlane.f32.xlu1 %v358_v13 }
 0x12a   : > { %v357_v17 = vpop.xlane.xlu1 %356 }
 0x12b   : > { %v361_v18 = vmul.f32 0.03125, %v357_v17 }
 0x12d   : > { %v363_v19 = vadd.f32 1e-05, %v361_v18 }
 0x12e   : > { %v360_v20 = vpop.xlane.xlu1 %359 }
 0x12f   : > { %1746 = vrsqrt.f32 %v363_v19  ;;  %v362_v21 = vmul.f32 0.03125, %v360_v20  ;;  %v1966_v20 = vld [vmem:[%s2098_s6 + $0x8] sm:$0xf] }
 0x131   : > { %v364_v22 = vadd.f32 1e-05, %v362_v21 }
 0x133   : > { %1748 = vrsqrt.f32 %v364_v22 }
 0x13c   : > { %v1747_v23 = vpop.eup %1746 }
 0x13d   : > { %v367_v24 = vmul.f32 %v1747_v23, %v351_v6 }
 0x13f   : > { %v375_v28 = vmul.f32 %v1545_v25, %v367_v24  ;;  %v1971_v24 = vld [vmem:[%s2098_s6 + $0xc] sm:$0xf] }
 0x140   : > { %v1749_v26 = vpop.eup %1748 }
 0x141   : > { %v368_v27 = vmul.f32 %v1749_v26, %v352_v10  ;;  %v383_v31 = vadd.f32 %v1546_v29, %v375_v28 }
 0x143   : > { %v376_v30 = vmul.f32 %v1545_v25, %v368_v27 }
 0x145   : > { %v384_v32 = vadd.f32 %v1546_v29, %v376_v30 }
 0x147   : > { %v389_v33 = vpack.c.bf16 %v384_v32, %v383_v31 }
 0x149   : > { %1617 = vmatmul.mubr.msk.bf16.vlgmr.msra.gmra.mxu0 %vm341_vm0, %v389_v33 }
 0x14a   : > { %1628 = vmatprep.mubr.msk.bf16.mxu0 %vm1791_vm1, %v1790_v15 }
 0x209   : > { %v446_v35 = vpop.f32.mrf.mxu0 }
 0x20a   : > { %v447_v36 = vadd.f32 %v1547_v34, %v446_v35 }
 0x20b   : > { %v1618_v37 = vpop.f32.mrf.mxu0 }
 0x20c   : > { %v455_v38 = vcombine.high %v447_v36, %v447_v36  ;;  %v1902_v39 = vpack.c.bf16 %v447_v36, %v447_v36  ;;  %v463_v50 = vmul.f32 0.25, %v447_v36 }
 0x20d   : > { %v449_v40 = vpop.f32.mrf.mxu0 }
 0x20e   : > { %v1904_v41 = vpack.c.bf16 %v455_v38, %v455_v38  ;;  %v450_v42 = vadd.f32 %v1547_v34, %v449_v40  ;;  %477 = vrot.lane.b32.xlu0 %v1902_v39, %s1792_s26  ;;  %v464_v52 = vmul.f32 0.25, %v455_v38  ;;  %v1918_v54 = vpack.c.bf16 %v463_v50, %v463_v50 }
 0x20f   : > { %v1619_v43 = vpop.f32.mrf.mxu0 }
 0x210   : > { %527 = vrot.lane.b32.xlu1 %v1904_v41, %s1792_s26  ;;  %v456_v44 = vcombine.high %v450_v42, %v450_v42  ;;  %v1908_v45 = vpack.c.bf16 %v450_v42, %v450_v42  ;;  %v1920_v55 = vpack.c.bf16 %v464_v52, %v464_v52  ;;  %v465_v58 = vmul.f32 0.25, %v450_v42 }
 0x212   : > { %v1911_v46 = vpack.c.bf16 %v456_v44, %v456_v44  ;;  %v466_v60 = vmul.f32 0.25, %v456_v44  ;;  %v1934_v61 = vpack.c.bf16 %v465_v58, %v465_v58 }
 0x214   : > { %576 = vrot.lane.b32.xlu1 %v1908_v45, %s1792_s26  ;;  %v1936_v62 = vpack.c.bf16 %v466_v60, %v466_v60 }
 0x218   : > { %625 = vrot.lane.b32.xlu1 %v1911_v46, %s1792_s26 }
 0x280   : > { %v478_v47 = vpop.permute.xlu0 %477 }
 0x281   : > { %v484_v48 = vsel %vm479_vm2, %v478_v47, 0 }
 0x282   : > { %1621 = vmatpush3.bf16.xpose.msra.mxu1 %v484_v48  ;;  %v528_v49 = vpop.permute.xlu1 %527 }
 0x283   : > { %v533_v51 = vsel %vm479_vm2, %v528_v49, 0  ;;  %1632 = vmatprep.subr.bf16.mxu1 %v1790_v15 }
 0x284   : > { %1627 = vmatpush3.bf16.xpose.msra.mxu0 %v533_v51 }
 0x285   : > { %1638 = vmatprep.subr.bf16.mxu0 %v1790_v15 }
 0x286   : > { %v577_v53 = vpop.permute.xlu1 %576 }
 0x287   : > { %v582_v56 = vsel %vm479_vm2, %v577_v53, 0 }
 0x289   : > { %1623 = vmatmul.mubr.msk.bf16.vlgmr.msra.gmra.mxu1 %vm479_vm2, %v1918_v54 }
 0x28a   : > { %1633 = vmatpush3.bf16.xpose.msra.mxu1 %v582_v56  ;;  %v626_v57 = vpop.permute.xlu1 %625  ;;  %1634 = vmatprep.mubr.msk.bf16.mxu1 %vm1791_vm1, %v1790_v15 }
 0x28b   : > { %v631_v59 = vsel %vm479_vm2, %v626_v57, 0  ;;  %1629 = vmatmul.mubr.msk.bf16.vlgmr.msra.gmra.mxu0 %vm479_vm2, %v1920_v55  ;;  %1644 = vmatprep.subr.bf16.mxu1 %v1790_v15 }
 0x28c   : > { %1639 = vmatpush3.bf16.xpose.msra.mxu0 %v631_v59  ;;  %1640 = vmatprep.mubr.msk.bf16.mxu0 %vm1791_vm1, %v1790_v15 }
 0x28d   : > { %1650 = vmatprep.subr.bf16.mxu0 %v1790_v15 }
 0x291   : > { %1635 = vmatmul.mubr.msk.bf16.vlgmr.msra.gmra.mxu1 %vm479_vm2, %v1934_v61 }
 0x292   : > { %1646 = vmatprep.mubr.msk.bf16.mxu1 %vm1791_vm1, %v1790_v15 }
 0x293   : > { %1641 = vmatmul.mubr.msk.bf16.vlgmr.msra.gmra.mxu0 %vm479_vm2, %v1936_v62 }
 0x294   : > { %1652 = vmatprep.mubr.msk.bf16.mxu0 %vm1791_vm1, %v1790_v15 }
 0x349   : > { %v520_v2 = vpop.f32.mrf.mxu1 }
 0x34a   : > { %v521_v4 = vadd.f32 %v520_v2, %v475_v63 }
 0x34b   : > { %v1624_v5 = vpop.f32.mrf.mxu1  ;;  %v569_v6 = vpop.f32.mrf.mxu0 }
 0x34c   : > { %v570_v8 = vadd.f32 %v569_v6, %v475_v63  ;;  %v673_v9 = vadd.f32 %v521_v4, %v1952_v3 }
 0x34d   : > { %v523_v10 = vpop.f32.mrf.mxu1  ;;  %v1630_v11 = vpop.f32.mrf.mxu0 }
 0x34e   : > { %v678_v12 = vsel %vm677_vm3, %v673_v9, -inf  ;;  %v674_v13 = vadd.f32 %v570_v8, %v1957_v7 }
 0x34f   : > { %679 = vmax.xlane.f32.xlu0 %v678_v12  ;;  %v1625_v14 = vpop.f32.mrf.mxu1  ;;  %v572_v16 = vpop.f32.mrf.mxu0 }
 0x350   : > { %v681_v17 = vsel %vm677_vm3, %v674_v13, -inf }
 0x351   : > { %v618_v18 = vpop.f32.mrf.mxu1  ;;  %682 = vmax.xlane.f32.xlu1 %v681_v17  ;;  %v1631_v19 = vpop.f32.mrf.mxu0 }
 0x352   : > { %v619_v21 = vadd.f32 %v618_v18, %v475_v63 }
 0x353   : > { %v1636_v22 = vpop.f32.mrf.mxu1  ;;  %v667_v23 = vpop.f32.mrf.mxu0 }
 0x354   : > { %v668_v25 = vadd.f32 %v667_v23, %v475_v63  ;;  %v675_v26 = vadd.f32 %v619_v21, %v1966_v20 }
 0x355   : > { %v621_v27 = vpop.f32.mrf.mxu1  ;;  %v1642_v28 = vpop.f32.mrf.mxu0 }
 0x356   : > { %v684_v29 = vsel %vm677_vm3, %v675_v26, -inf  ;;  %v676_v30 = vadd.f32 %v668_v25, %v1971_v24 }
 0x357   : > { %685 = vmax.xlane.f32.xlu0 %v684_v29  ;;  %v1637_v31 = vpop.f32.mrf.mxu1  ;;  %v670_v32 = vpop.f32.mrf.mxu0 }
 0x358   : > { %v687_v34 = vsel %vm677_vm3, %v676_v30, -inf }
 0x359   : > { %v1643_v33 = vpop.f32.mrf.mxu0 }
 0x35b   : > { %688 = vmax.xlane.f32.xlu0 %v687_v34 }
 0x362   : > { %776 = vrot.lane.b32.xlu1 %v1904_v41, %s1793_s19 }
 0x366   : > { %824 = vrot.lane.b32.xlu1 %v1908_v45, %s1793_s19 }
 0x36a   : > { %872 = vrot.lane.b32.xlu1 %v1911_v46, %s1793_s19 }
 0x3d8   : > { %v680_v35 = vpop.xlane.xlu0 %679 }
 0x3d9   : > { %v690_v36 = vsub.f32 %v673_v9, %v680_v35 }
 0x3da   : > { %v683_v37 = vpop.xlane.xlu1 %682 }
 0x3db   : > { %v694_v38 = vmul.f32 1.442695, %v690_v36  ;;  %v691_v40 = vsub.f32 %v674_v13, %v683_v37 }
 0x3dd   : > { %1750 = vpow2.f32 %v694_v38  ;;  %v696_v42 = vmul.f32 1.442695, %v691_v40 }
 0x3de   : > { %v777_v43 = vpop.permute.xlu1 %776 }
 0x3df   : > { %1752 = vpow2.f32 %v696_v42  ;;  %v782_v44 = vsel %vm732_vm4, %v777_v43, 0 }
 0x3e0   : > { %1651 = vmatpush3.bf16.msra.mxu0 %v782_v44  ;;  %v686_v51 = vpop.xlane.xlu0 %685 }
 0x3e1   : > { %1662 = vmatprep.subr.bf16.mxu0 %v1790_v15  ;;  %v692_v53 = vsub.f32 %v675_v26, %v686_v51 }
 0x3e2   : > { %v825_v4 = vpop.permute.xlu1 %824 }
 0x3e3   : > { %v698_v57 = vmul.f32 1.442695, %v692_v53 }
 0x3e4   : > { %v689_v52 = vpop.xlane.xlu0 %688 }
 0x3e5   : > { %v693_v56 = vsub.f32 %v676_v30, %v689_v52  ;;  %1754 = vpow2.f32 %v698_v57 }
 0x3e6   : > { %v873_v5 = vpop.permute.xlu1 %872 }
 0x3e7   : > { %v700_v58 = vmul.f32 1.442695, %v693_v56  ;;  %v878_v14 = vsel %vm732_vm4, %v873_v5, 0 }
 0x3e9   : > { %1756 = vpow2.f32 %v700_v58 }
 0x3ea   : > { %v1751_v47 = vpop.eup %1750 }
 0x3eb   : > { %v702_v48 = vsel %vm677_vm3, %v1751_v47, 0.0 }
 0x3ec   : > { %v1753_v49 = vpop.eup %1752  ;;  %703 = vadd.xlane.f32.xlu0 %v702_v48 }
 0x3ed   : > { %v705_v50 = vsel %vm677_vm3, %v1753_v49, 0.0 }
 0x3ee   : > { %706 = vadd.xlane.f32.xlu1 %v705_v50 }
 0x3f2   : > { %v1755_v59 = vpop.eup %1754 }
 0x3f3   : > { %v708_v63 = vsel %vm677_vm3, %v1755_v59, 0.0 }
 0x3f6   : > { %v1757_v60 = vpop.eup %1756 }
 0x3f7   : > { %v711_v2 = vsel %vm677_vm3, %v1757_v60, 0.0 }
 0x3ff   : > { %981 = vrot.lane.b32.xlu1 %v1904_v41, %s1794_s20 }
 0x402   : > { %726 = vrot.lane.b32.xlu0 %v1902_v39, %s1793_s19 }
 0x421   : > { %709 = vadd.xlane.f32.xlu0 %v708_v63 }
 0x423   : > { %712 = vadd.xlane.f32.xlu1 %v711_v2 }
 0x434   : > { %979 = vrot.lane.b32.xlu1 %v1920_v55, %s1795_s21 }
 0x437   : > { %930 = vrot.lane.b32.xlu0 %v1902_v39, %s1794_s20 }
 0x438   : > { %1083 = vrot.lane.b32.xlu1 %v1911_v46, %s1794_s20 }
 0x43b   : > { %928 = vrot.lane.b32.xlu0 %v1918_v54, %s1795_s21 }
 0x43c   : > { %1081 = vrot.lane.b32.xlu1 %v1936_v62, %s1795_s21 }
 0x43f   : > { %1032 = vrot.lane.b32.xlu0 %v1908_v45, %s1794_s20 }
 0x443   : > { %1030 = vrot.lane.b32.xlu0 %v1934_v61, %s1795_s21  ;;  %v830_v61 = vsel %vm732_vm4, %v825_v4, 0 }
 0x475   : > { %v704_v6 = vpop.xlane.xlu0 %703 }
 0x476   : > { %1758 = vrcp.f32 %v704_v6 }
 0x477   : > { %v707_v8 = vpop.xlane.xlu1 %706 }
 0x478   : > { %1760 = vrcp.f32 %v707_v8 }
 0x479   : > { %v727_v9 = vpop.permute.xlu0 %726 }
 0x47a   : > { %v734_v55 = vsel %vm732_vm4, %v727_v9, 0 }
 0x47b   : > { %1645 = vmatpush3.bf16.msra.mxu1 %v734_v55  ;;  %v982_v16 = vpop.permute.xlu1 %981 }
 0x47c   : > { %1656 = vmatprep.subr.bf16.mxu1 %v1790_v15  ;;  %v987_v31 = vsel %vm479_vm2, %v982_v16, 0 }
 0x483   : > { %v1759_v10 = vpop.eup %1758 }
 0x484   : > { %v718_v54 = vmul.f32 %v1759_v10, %v1751_v47 }
 0x485   : > { %v1761_v11 = vpop.eup %1760 }
 0x486   : > { %v722_v62 = vpack.c.bf16 %v718_v54, %v718_v54  ;;  %v719_v12 = vmul.f32 %v1761_v11, %v1753_v49 }
 0x488   : > { %1647 = vmatmul.mubr.msk.bf16.vlgmr.msra.gmra.mxu1 %vm728_vm5, %v722_v62  ;;  %v723_v13 = vpack.c.bf16 %v719_v12, %v719_v12 }
 0x489   : > { %1657 = vmatpush3.bf16.msra.mxu1 %v830_v61  ;;  %1658 = vmatprep.mubr.msk.bf16.mxu1 %vm1791_vm1, %v1790_v15 }
 0x48a   : > { %1653 = vmatmul.mubr.msk.bf16.vlgmr.msra.gmra.mxu0 %vm728_vm5, %v723_v13  ;;  %1668 = vmatprep.subr.bf16.mxu1 %v1790_v15 }
 0x48b   : > { %1663 = vmatpush3.bf16.msra.mxu0 %v878_v14  ;;  %1664 = vmatprep.mubr.msk.bf16.mxu0 %vm1791_vm1, %v1790_v15 }
 0x48c   : > { %1674 = vmatprep.subr.bf16.mxu0 %v1790_v15 }
 0x4aa   : > { %v710_v17 = vpop.xlane.xlu0 %709 }
 0x4ab   : > { %1762 = vrcp.f32 %v710_v17 }
 0x4ac   : > { %v713_v18 = vpop.xlane.xlu1 %712 }
 0x4ad   : > { %1764 = vrcp.f32 %v713_v18 }
 0x4ae   : > { %v931_v19 = vpop.permute.xlu0 %930 }
 0x4af   : > { %v936_v28 = vsel %vm479_vm2, %v931_v19, 0 }
 0x4b0   : > { %v980_v30 = vpop.permute.xlu1 %979 }
 0x4b2   : > { %v929_v27 = vpop.permute.xlu0 %928 }
 0x4b4   : > { %v1084_v33 = vpop.permute.xlu1 %1083 }
 0x4b5   : > { %v1089_v35 = vsel %vm479_vm2, %v1084_v33, 0 }
 0x4b6   : > { %v1033_v32 = vpop.permute.xlu0 %1032 }
 0x4b7   : > { %v1038_v34 = vsel %vm479_vm2, %v1033_v32, 0 }
 0x4b8   : > { %v1763_v21 = vpop.eup %1762  ;;  %v1082_v37 = vpop.permute.xlu1 %1081 }
 0x4b9   : > { %v720_v22 = vmul.f32 %v1763_v21, %v1755_v59  ;;  %v1559_v59 = vld [vmem:[%s2097_s5 + $0x4] sm:$0xf] }
 0x4ba   : > { %v1765_v23 = vpop.eup %1764  ;;  %v1031_v36 = vpop.permute.xlu0 %1030 }
 0x4bb   : > { %v724_v25 = vpack.c.bf16 %v720_v22, %v720_v22  ;;  %v721_v26 = vmul.f32 %v1765_v23, %v1757_v60 }
 0x4bd   : > { %1659 = vmatmul.mubr.msk.bf16.vlgmr.msra.gmra.mxu1 %vm728_vm5, %v724_v25  ;;  %v725_v29 = vpack.c.bf16 %v721_v26, %v721_v26 }
 0x4be   : > { %1669 = vmatpush3.bf16.xpose.msra.mxu1 %v936_v28  ;;  %1670 = vmatprep.mubr.msk.bf16.mxu1 %vm1791_vm1, %v1790_v15 }
 0x4bf   : > { %1665 = vmatmul.mubr.msk.bf16.vlgmr.msra.gmra.mxu0 %vm728_vm5, %v725_v29  ;;  %1680 = vmatprep.subr.bf16.mxu1 %v1790_v15 }
 0x4c0   : > { %1675 = vmatpush3.bf16.xpose.msra.mxu0 %v987_v31  ;;  %1676 = vmatprep.mubr.msk.bf16.mxu0 %vm1791_vm1, %v1790_v15 }
 0x4c1   : > { %1686 = vmatprep.subr.bf16.mxu0 %v1790_v15 }
 0x4c5   : > { %1671 = vmatmul.mubr.msk.bf16.vlgmr.msra.gmra.mxu1 %vm479_vm2, %v929_v27 }
 0x4c6   : > { %1681 = vmatpush3.bf16.xpose.msra.mxu1 %v1038_v34  ;;  %1682 = vmatprep.mubr.msk.bf16.mxu1 %vm1791_vm1, %v1790_v15 }
 0x4c7   : > { %1677 = vmatmul.mubr.msk.bf16.vlgmr.msra.gmra.mxu0 %vm479_vm2, %v980_v30  ;;  %1692 = vmatprep.subr.bf16.mxu1 %v1790_v15 }
 0x4c8   : > { %1687 = vmatpush3.bf16.xpose.msra.mxu0 %v1089_v35  ;;  %1688 = vmatprep.mubr.msk.bf16.mxu0 %vm1791_vm1, %v1790_v15 }
 0x4c9   : > { %1698 = vmatprep.subr.bf16.mxu0 %v1790_v15 }
 0x4cd   : > { %1683 = vmatmul.mubr.msk.bf16.vlgmr.msra.gmra.mxu1 %vm479_vm2, %v1031_v36 }
 0x4ce   : > { %1694 = vmatprep.mubr.msk.bf16.mxu1 %vm1791_vm1, %v1790_v15 }
 0x4cf   : > { %1689 = vmatmul.mubr.msk.bf16.vlgmr.msra.gmra.mxu0 %vm479_vm2, %v1082_v37 }
 0x4d0   : > { %1700 = vmatprep.mubr.msk.bf16.mxu0 %vm1791_vm1, %v1790_v15 }
 0x548   : > { %v770_v38 = vpop.f32.mrf.mxu1 }
 0x549   : > { %921 = vst.msk [vmem:[#allocation2] sm:$0xf] %vm920_vm6, %v770_v38 }
 0x54a   : > { %v1648_v40 = vpop.f32.mrf.mxu1  ;;  %v818_v42 = vpop.f32.mrf.mxu0 }
 0x54b   : > { %922 = vst.msk [vmem:[#allocation2 + $0x4] sm:$0xf] %vm920_vm6, %v818_v42 }
 0x54c   : > { %v773_v43 = vpop.f32.mrf.mxu1  ;;  %v1654_v44 = vpop.f32.mrf.mxu0 }
 0x54e   : > { %v1649_v47 = vpop.f32.mrf.mxu1  ;;  %v821_v48 = vpop.f32.mrf.mxu0 }
 0x550   : > { %v1655_v49 = vpop.f32.mrf.mxu0 }
 0x57d   : > { %v866_v50 = vpop.f32.mrf.mxu1 }
 0x57e   : > { %923 = vst.msk [vmem:[#allocation2 + $0x8] sm:$0xf] %vm920_vm6, %v866_v50 }
 0x57f   : > { %v1660_v51 = vpop.f32.mrf.mxu1  ;;  %v914_v52 = vpop.f32.mrf.mxu0 }
 0x580   : > { %924 = vst.msk [vmem:[#allocation2 + $0xc] sm:$0xf] %vm920_vm6, %v914_v52 }
 0x581   : > { %v869_v53 = vpop.f32.mrf.mxu1  ;;  %v1666_v56 = vpop.f32.mrf.mxu0 }
 0x583   : > { %v1661_v57 = vpop.f32.mrf.mxu1  ;;  %v917_v58 = vpop.f32.mrf.mxu0 }
 0x585   : > { %v1667_v60 = vpop.f32.mrf.mxu0  ;;  %v972_v63 = vpop.f32.mrf.mxu1 }
 0x586   : > { %v973_v2 = vadd.f32 %v1559_v59, %v972_v63 }
 0x587   : > { %v1672_v4 = vpop.f32.mrf.mxu1  ;;  %v1023_v5 = vpop.f32.mrf.mxu0 }
 0x588   : > { %v1024_v6 = vadd.f32 %v1559_v59, %v1023_v5  ;;  %v1131_v8 = vadd.f32 %v973_v2, %v1952_v3 }
 0x589   : > { %v975_v9 = vpop.f32.mrf.mxu1  ;;  %v1678_v55 = vpop.f32.mrf.mxu0 }
 0x58a   : > { %v1135_v10 = vsel %vm677_vm3, %v1131_v8, -inf  ;;  %v1132_v54 = vadd.f32 %v1024_v6, %v1957_v7 }
 0x58b   : > { %1136 = vmax.xlane.f32.xlu0 %v1135_v10  ;;  %v1673_v11 = vpop.f32.mrf.mxu1  ;;  %v1026_v62 = vpop.f32.mrf.mxu0 }
 0x58c   : > { %v1138_v12 = vsel %vm677_vm3, %v1132_v54, -inf }
 0x58d   : > { %v1074_v61 = vpop.f32.mrf.mxu1  ;;  %1139 = vmax.xlane.f32.xlu1 %v1138_v12  ;;  %v1679_v13 = vpop.f32.mrf.mxu0 }
 0x58e   : > { %v1075_v14 = vadd.f32 %v1559_v59, %v1074_v61 }
 0x58f   : > { %v1684_v16 = vpop.f32.mrf.mxu1  ;;  %v1125_v17 = vpop.f32.mrf.mxu0 }
 0x590   : > { %v1126_v18 = vadd.f32 %v1559_v59, %v1125_v17  ;;  %v1133_v3 = vadd.f32 %v1075_v14, %v1966_v20 }
 0x591   : > { %v1077_v19 = vpop.f32.mrf.mxu1  ;;  %v1690_v21 = vpop.f32.mrf.mxu0 }
 0x592   : > { %v1141_v22 = vsel %vm677_vm3, %v1133_v3, -inf  ;;  %v1134_v7 = vadd.f32 %v1126_v18, %v1971_v24 }
 0x593   : > { %1142 = vmax.xlane.f32.xlu0 %v1141_v22  ;;  %v1685_v23 = vpop.f32.mrf.mxu1  ;;  %v1128_v25 = vpop.f32.mrf.mxu0 }
 0x594   : > { %v1144_v27 = vsel %vm677_vm3, %v1134_v7, -inf  ;;  %v1743_v23 = vld [vmem:[%s2099_s7] sm:$0xff]  }
 0x595   : > { %v1691_v26 = vpop.f32.mrf.mxu0 }
 0x597   : > { %1145 = vmax.xlane.f32.xlu0 %v1144_v27 }
 0x614   : > { %v1137_v28 = vpop.xlane.xlu0 %1136 }
 0x615   : > { %v1147_v29 = vsub.f32 %v1131_v8, %v1137_v28 }
 0x616   : > { %v1140_v30 = vpop.xlane.xlu1 %1139 }
 0x617   : > { %v1151_v31 = vmul.f32 1.442695, %v1147_v29  ;;  %v1148_v32 = vsub.f32 %v1132_v54, %v1140_v30 }
 0x619   : > { %1766 = vpow2.f32 %v1151_v31  ;;  %v1153_v20 = vmul.f32 1.442695, %v1148_v32 }
 0x61b   : > { %1768 = vpow2.f32 %v1153_v20 }
 0x61c   : > { %v1143_v33 = vpop.xlane.xlu0 %1142 }
 0x61d   : > { %v1149_v34 = vsub.f32 %v1133_v3, %v1143_v33 }
 0x61f   : > { %v1155_v35 = vmul.f32 1.442695, %v1149_v34 }
 0x620   : > { %v1146_v43 = vpop.xlane.xlu0 %1145 }
 0x621   : > { %1770 = vpow2.f32 %v1155_v35  ;;  %v1150_v44 = vsub.f32 %v1134_v7, %v1146_v43  ;;  %v1742_v7 = vld [vmem:[%s2099_s7 + $0x8] sm:$0xff]  }
 0x623   : > { %v1157_v47 = vmul.f32 1.442695, %v1150_v44 }
 0x625   : > { %1772 = vpow2.f32 %v1157_v47 }
 0x626   : > { %v1767_v24 = vpop.eup %1766 }
 0x627   : > { %v1159_v36 = vsel %vm677_vm3, %v1767_v24, 0.0 }
 0x628   : > { %v1769_v37 = vpop.eup %1768  ;;  %1160 = vadd.xlane.f32.xlu0 %v1159_v36 }
 0x629   : > { %v1162_v38 = vsel %vm677_vm3, %v1769_v37, 0.0 }
 0x62a   : > { %1163 = vadd.xlane.f32.xlu1 %v1162_v38 }
 0x62e   : > { %v1771_v40 = vpop.eup %1770 }
 0x62f   : > { %v1165_v42 = vsel %vm677_vm3, %v1771_v40, 0.0 }
 0x630   : > { %1166 = vadd.xlane.f32.xlu0 %v1165_v42 }
 0x632   : > { %v1773_v48 = vpop.eup %1772 }
 0x633   : > { %v1168_v49 = vsel %vm677_vm3, %v1773_v48, 0.0 }
 0x63b   : > { %1231 = vrot.lane.b32.xlu1 %v1904_v41, %s1796_s24 }
 0x63f   : > { %1279 = vrot.lane.b32.xlu1 %v1908_v45, %s1796_s24 }
 0x646   : > { %1183 = vrot.lane.b32.xlu0 %v1902_v39, %s1796_s24 }
 0x663   : > { %1169 = vadd.xlane.f32.xlu1 %v1168_v49 }
 0x674   : > { %1327 = vrot.lane.b32.xlu1 %v1911_v46, %s1796_s24 }
 0x6b1   : > { %v1161_v50 = vpop.xlane.xlu0 %1160 }
 0x6b2   : > { %1774 = vrcp.f32 %v1161_v50 }
 0x6b3   : > { %v1164_v51 = vpop.xlane.xlu1 %1163 }
 0x6b4   : > { %1776 = vrcp.f32 %v1164_v51 }
 0x6b7   : > { %v1232_v52 = vpop.permute.xlu1 %1231 }
 0x6b8   : > { %v1237_v41 = vsel %vm732_vm4, %v1232_v52, 0 }
 0x6b9   : > { %1699 = vmatpush3.bf16.msra.mxu0 %v1237_v41  ;;  %v1167_v45 = vpop.xlane.xlu0 %1166 }
 0x6ba   : > { %1778 = vrcp.f32 %v1167_v45  ;;  %1710 = vmatprep.subr.bf16.mxu0 %v1790_v15 }
 0x6bb   : > { %v1280_v58 = vpop.permute.xlu1 %1279 }
 0x6bc   : > { %v1285_v63 = vsel %vm732_vm4, %v1280_v58, 0 }
 0x6bd   : > { %v1184_v39 = vpop.permute.xlu0 %1183 }
 0x6be   : > { %v1189_v53 = vsel %vm732_vm4, %v1184_v39, 0 }
 0x6bf   : > { %v1775_v56 = vpop.eup %1774  ;;  %1693 = vmatpush3.bf16.msra.mxu1 %v1189_v53 }
 0x6c0   : > { %1704 = vmatprep.subr.bf16.mxu1 %v1790_v15  ;;  %v1175_v46 = vmul.f32 %v1775_v56, %v1767_v24 }
 0x6c1   : > { %v1777_v57 = vpop.eup %1776 }
 0x6c2   : > { %v1179_v59 = vpack.c.bf16 %v1175_v46, %v1175_v46  ;;  %v1176_v60 = vmul.f32 %v1777_v57, %v1769_v37 }
 0x6c4   : > { %1695 = vmatmul.mubr.msk.bf16.vlgmr.msra.gmra.mxu1 %vm728_vm5, %v1179_v59  ;;  %v1180_v2 = vpack.c.bf16 %v1176_v60, %v1176_v60 }
 0x6c5   : > { %1705 = vmatpush3.bf16.msra.mxu1 %v1285_v63  ;;  %1706 = vmatprep.mubr.msk.bf16.mxu1 %vm1791_vm1, %v1790_v15 }
 0x6c6   : > { %1701 = vmatmul.mubr.msk.bf16.vlgmr.msra.gmra.mxu0 %vm728_vm5, %v1180_v2  ;;  %1716 = vmatprep.subr.bf16.mxu1 %v1790_v15 }
 0x6c7   : > { %v1779_v4 = vpop.eup %1778  ;;  %1712 = vmatprep.mubr.msk.bf16.mxu0 %vm1791_vm1, %v1790_v15 }
 0x6c8   : > { %v1177_v5 = vmul.f32 %v1779_v4, %v1771_v40 }
 0x6ca   : > { %v1181_v6 = vpack.c.bf16 %v1177_v5, %v1177_v5 }
 0x6cc   : > { %1707 = vmatmul.mubr.msk.bf16.vlgmr.msra.gmra.mxu1 %vm728_vm5, %v1181_v6 }
 0x6cd   : > { %1720 = vmatprep.mubr.msk.bf16.mxu1 %vm1791_vm1, %v1790_v15  ;;  %1717 = vmatpush3.bf16.msra.mxu1 %v1742_v7 }
 0x6ce   : > { %1718 = vmatprep.subr.bf16.mxu1 %v1790_v15  ;;  %v1568_v15 = vld [vmem:[%s2100_s8] ss:$0 sm:$0xff] }
 0x6d1   : > { %1719 = vmatpush3.bf16.msra.mxu1 %v1743_v23 }
 0x6ec   : > { %v1170_v8 = vpop.xlane.xlu1 %1169 }
 0x6ed   : > { %1780 = vrcp.f32 %v1170_v8 }
 0x6f0   : > { %v1328_v9 = vpop.permute.xlu1 %1327 }
 0x6f1   : > { %v1333_v55 = vsel %vm732_vm4, %v1328_v9, 0 }
 0x6f2   : > { %1711 = vmatpush3.bf16.msra.mxu0 %v1333_v55 }
 0x6fa   : > { %v1781_v10 = vpop.eup %1780 }
 0x6fb   : > { %v1178_v54 = vmul.f32 %v1781_v10, %v1773_v48 }
 0x6fd   : > { %v1182_v11 = vpack.c.bf16 %v1178_v54, %v1178_v54 }
 0x6ff   : > { %1713 = vmatmul.mubr.msk.bf16.vlgmr.msra.gmra.mxu0 %vm728_vm5, %v1182_v11 }
 0x784   : > { %v1225_v62 = vpop.f32.mrf.mxu1 }
 0x785   : > { %1379 = vrot.lane.b32.xlu0 %v1225_v62, %s1797_s25 }
 0x786   : > { %v1696_v12 = vpop.f32.mrf.mxu1  ;;  %v1273_v61 = vpop.f32.mrf.mxu0 }
 0x787   : > { %1381 = vrot.lane.b32.xlu1 %v1273_v61, %s1797_s25 }
 0x788   : > { %v1228_v13 = vpop.f32.mrf.mxu1  ;;  %v1702_v14 = vpop.f32.mrf.mxu0 }
 0x78a   : > { %v1697_v16 = vpop.f32.mrf.mxu1  ;;  %v1276_v17 = vpop.f32.mrf.mxu0 }
 0x78c   : > { %v1703_v18 = vpop.f32.mrf.mxu0  ;;  %v1321_v3 = vpop.f32.mrf.mxu1 }
 0x78d   : > { %1383 = vrot.lane.b32.xlu0 %v1321_v3, %s1797_s25 }
 0x78e   : > { %v1708_v19 = vpop.f32.mrf.mxu1 }
 0x790   : > { %v1324_v21 = vpop.f32.mrf.mxu1 }
 0x792   : > { %v1709_v22 = vpop.f32.mrf.mxu1 }
 0x7bf   : > { %v1369_v25 = vpop.f32.mrf.mxu0 }
 0x7c0   : > { %1385 = vrot.lane.b32.xlu1 %v1369_v25, %s1797_s25 }
 0x7c1   : > { %v1714_v26 = vpop.f32.mrf.mxu0 }
 0x7c3   : > { %v1372_v27 = vpop.f32.mrf.mxu0 }
 0x7c5   : > { %v1715_v28 = vpop.f32.mrf.mxu0 }
 0x7f7   : > { %v1380_v29 = vpop.permute.xlu0 %1379 }
 0x7f8   : > { %1392 = vst.msk [vmem:[#allocation2] sm:$0xf] %vm1391_vm7, %v1380_v29 }
 0x7f9   : > { %v1382_v30 = vpop.permute.xlu1 %1381 }
 0x7fa   : > { %1393 = vst.msk [vmem:[#allocation2 + $0x4] sm:$0xf] %vm1391_vm7, %v1382_v30 }
 0x7ff   : > { %v1384_v31 = vpop.permute.xlu0 %1383 }
 0x800   : > { %1394 = vst.msk [vmem:[#allocation2 + $0x8] sm:$0xf] %vm1391_vm7, %v1384_v31 }
 0x801   : > { %v1744_v20 = vld [vmem:[#allocation2] sm:$0xff]  }
 0x832   : > { %v1386_v32 = vpop.permute.xlu1 %1385 }
 0x833   : > { %1395 = vst.msk [vmem:[#allocation2 + $0xc] sm:$0xf] %vm1391_vm7, %v1386_v32 }
 0x83a   : > { %v1745_v33 = vld [vmem:[#allocation2 + $0x8] sm:$0xff]  }
 0x83b   : > { %v1412_v34 = vpack.c.bf16 %v1745_v33, %v1744_v20 }
 0x83d   : > { %1721 = vmatmul.mubr.msk.bf16.vlgmr.msra.gmra.mxu1 %vm341_vm0, %v1412_v34 }
 0x8fd   : > { %v1469_v35 = vpop.f32.mrf.mxu1 }
 0x8fe   : > { %v1470_v24 = vadd.f32 %v1568_v15, %v1469_v35 }
 0x8ff   : > { %v1722_v36 = vpop.f32.mrf.mxu1 }
 0x900   : > { %v1476_v37 = vadd.f32 %v1470_v24, %v1864_v0 }
 0x901   : > { %v1472_v38 = vpop.f32.mrf.mxu1 }
 0x902   : > { %1478 = vst.msk [vmem:[%s334_s16] sm:$0xff] %vm341_vm0, %v1476_v37  ;;  %v1473_v40 = vadd.f32 %v1568_v15, %v1472_v38 }
 0x903   : > { %v1723_v42 = vpop.f32.mrf.mxu1 }
 0x904   : > { %v1477_v43 = vadd.f32 %v1473_v40, %v1866_v1 }
 0x906   : > { %1479 = vst.msk [vmem:[%s334_s16 + $0x8] sm:$0xff] %vm341_vm0, %v1477_v43 }
 0x907 PF: > { %s19_s30 = sadd.s32 1, %s1788_s30  }
 0x908   : > { %p16_p4 = scmp.ge.s32.totalorder %s19_s30, 4  }
 0x90a   :  { %18 = sbr.rel (!%p16_p4) target bundleno = 1 (0x1), region = 87 }

// kernel: _lambda_.15
= control target key start
LH: loop header
LB: loop body
LE: loop exit
PB: predicated region body
PF: predicated region fallthrough
CT: control target
= control target key end

     0   :  { %v220_v1 = vmov 0.0   ;;  %vm221_vm0 = vmmov 0   ;;  %vm162_vm1 = vcmask 523264   ;;  %s291_s0 = inlined_call_operand.vmem [shape: f32[8,128], index: 0, kind: input, shape index: {}]   ;;  %s292_s3 = inlined_call_operand.vmem [shape: bf16[128,64], index: 3, kind: input, shape index: {}]   ;;  %s293_s1 = inlined_call_operand.vmem [shape: f32[1,128], index: 1, kind: input, shape index: {}]   ;;  %s294_s2 = inlined_call_operand.vmem [shape: f32[1,128], index: 2, kind: input, shape index: {}]   ;;  %s295_s4 = inlined_call_operand.vmem [shape: f32[1,64], index: 4, kind: input, shape index: {}]   ;;  %s296_s5 = inlined_call_operand.vmem [shape: f32[8,64], index: 5, kind: output, shape index: {}]  }
   0x1   :  { %v21_v0 = vld [vmem:[%s291_s0] sm:$0xff]  ;;  %188 = vmatprep.subr.bf16.mxu0 %v220_v1  ;;  %v210_v2 = vld [vmem:[%s292_s3 + $0x38] sm:$0xff]   ;;  %v211_v3 = vld [vmem:[%s292_s3 + $0x30] sm:$0xff]   ;;  %204 = vmatprep.mubr.msk.bf16.mxu0 %vm221_vm0, %v220_v1 }
   0x2   :  { %24 = vadd.xlane.f32.xlu0 %v21_v0  ;;  %189 = vmatpush3.bf16.msra.mxu0 %v210_v2  ;;  %v212_v8 = vld [vmem:[%s292_s3 + $0x28] sm:$0xff]   ;;  %v213_v9 = vld [vmem:[%s292_s3 + $0x20] sm:$0xff]   ;;  %v214_v10 = vld [vmem:[%s292_s3 + $0x18] sm:$0xff]  }
   0x3   :  { %190 = vmatprep.subr.bf16.mxu0 %v220_v1  ;;  %v215_v11 = vld [vmem:[%s292_s3 + $0x10] sm:$0xff]   ;;  %v216_v12 = vld [vmem:[%s292_s3 + $0x8] sm:$0xff]   ;;  %v217_v13 = vld [vmem:[%s292_s3] sm:$0xff]  }
   0x4   :  { %v168_v18 = vld [vmem:[%s293_s1] ss:$0 sm:$0xff] }
   0x5   :  { %v169_v20 = vld [vmem:[%s294_s2] ss:$0 sm:$0xff] }
   0x6   :  { %191 = vmatpush3.bf16.msra.mxu0 %v211_v3  ;;  %v170_v24 = vld [vmem:[%s295_s4] ss:$0 sm:$0xff] }
   0x7   :  { %192 = vmatprep.subr.bf16.mxu0 %v220_v1 }
   0xa   :  { %193 = vmatpush3.bf16.msra.mxu0 %v212_v8 }
   0xb   :  { %194 = vmatprep.subr.bf16.mxu0 %v220_v1 }
   0xe   :  { %195 = vmatpush3.bf16.msra.mxu0 %v213_v9 }
   0xf   :  { %196 = vmatprep.subr.bf16.mxu0 %v220_v1 }
  0x12   :  { %197 = vmatpush3.bf16.msra.mxu0 %v214_v10 }
  0x13   :  { %198 = vmatprep.subr.bf16.mxu0 %v220_v1 }
  0x16   :  { %199 = vmatpush3.bf16.msra.mxu0 %v215_v11 }
  0x17   :  { %200 = vmatprep.subr.bf16.mxu0 %v220_v1 }
  0x1a   :  { %201 = vmatpush3.bf16.msra.mxu0 %v216_v12 }
  0x1b   :  { %202 = vmatprep.subr.bf16.mxu0 %v220_v1 }
  0x1e   :  { %203 = vmatpush3.bf16.msra.mxu0 %v217_v13 }
  0x8b   :  { %v25_v4 = vpop.xlane.xlu0 %24 }
  0x8c   :  { %v27_v5 = vmul.f32 0.0078125, %v25_v4 }
  0x8e   :  { %v28_v6 = vsub.f32 %v21_v0, %v27_v5 }
  0x90   :  { %v29_v7 = vmul.f32 %v28_v6, %v28_v6 }
  0x92   :  { %30 = vadd.xlane.f32.xlu0 %v29_v7 }
 0x11b   :  { %v31_v14 = vpop.xlane.xlu0 %30 }
 0x11c   :  { %v32_v15 = vmul.f32 0.0078125, %v31_v14 }
 0x11e   :  { %v33_v16 = vadd.f32 1e-05, %v32_v15 }
 0x120   :  { %218 = vrsqrt.f32 %v33_v16 }
 0x12d   :  { %v219_v17 = vpop.eup %218 }
 0x12e   :  { %v35_v19 = vmul.f32 %v219_v17, %v28_v6 }
 0x130   :  { %v42_v21 = vmul.f32 %v168_v18, %v35_v19 }
 0x132   :  { %v49_v22 = vadd.f32 %v169_v20, %v42_v21 }
 0x134   :  { %v66_v23 = vpack.c.bf16 %v49_v22, %v49_v22 }
 0x136   :  { %205 = vmatmul.mubr.bf16.vlgmr.msra.gmra.mxu0 %v66_v23 }
 0x1f6   :  { %v156_v25 = vpop.f32.mrf.mxu0 }
 0x1f7   :  { %v157_v26 = vadd.f32 %v170_v24, %v156_v25 }
 0x1f8   :  { %v206_v27 = vpop.f32.mrf.mxu0 }
 0x1f9   :  { %163 = vst.msk [vmem:[%s296_s5] sm:$0xff] %vm162_vm1, %v157_v26 }
 0x1fa   :  { %v159_v28 = vpop.f32.mrf.mxu0 }
 0x1fc   :  { %v207_v29 = vpop.f32.mrf.mxu0 }

// kernel: _lambda_.17
= control target key start
LH: loop header
LB: loop body
LE: loop exit
PB: predicated region body
PF: predicated region fallthrough
CT: control target
= control target key end

     0   :  { %vm30_vm0 = vcmask 523264   ;;  %v490_v8 = vmov 0   ;;  %v70_v42 = vlaneseq  ;;  %s630_s0 = inlined_call_operand.vmem [shape: f32[8,64], index: 0, kind: input, shape index: {}]   ;;  %s631_s3 = inlined_call_operand.vmem [shape: bf16[64,256], index: 3, kind: input, shape index: {}]   ;;  %s632_s1 = inlined_call_operand.vmem [shape: f32[1,64], index: 1, kind: input, shape index: {}]   ;;  %s633_s2 = inlined_call_operand.vmem [shape: f32[1,64], index: 2, kind: input, shape index: {}, may-alias: {2,6}]   ;;  %s634_s5 = inlined_call_operand.vmem [shape: bf16[256,64], index: 5, kind: input, shape index: {}]   ;;  %s635_s4 = inlined_call_operand.vmem [shape: f32[1,256], index: 4, kind: input, shape index: {}]   ;;  %s636_s6 = inlined_call_operand.vmem [shape: f32[1,64], index: 6, kind: input, shape index: {}, may-alias: {2,6}]   ;;  %s637_s7 = inlined_call_operand.vmem [shape: f32[8,64], index: 7, kind: output, shape index: {}]  }
   0x1   :  { %v534_v0 = vld [vmem:[%s630_s0] sm:$0xff]  ;;  %v452_v7 = vld [vmem:[%s631_s3 + $0x34] ss:$8 sps:$4 sm:$0xff]   ;;  %155 = vmatprep.mubr.bf16.mxu0 %v490_v8  ;;  %v454_v9 = vld [vmem:[%s631_s3 + $0x30] ss:$8 sps:$4 sm:$0xff]  }
   0x2   :  { %v31_v1 = vsel %vm30_vm0, %v534_v0, 0.0  ;;  %131 = vmatprep.subr.bf16.mxu0 %v452_v7  ;;  %v455_v10 = vld [vmem:[%s631_s3 + $0x24] ss:$8 sps:$4 sm:$0xff]   ;;  %v457_v11 = vld [vmem:[%s631_s3 + $0x20] ss:$8 sps:$4 sm:$0xff]   ;;  %v464_v26 = vld [vmem:[%s634_s5 + $0x78] sm:$0xff]  }
   0x3   :  { %32 = vadd.xlane.f32.xlu0 %v31_v1  ;;  %132 = vmatpush1.bf16.msra.mxu0 %v454_v9  ;;  %v458_v12 = vld [vmem:[%s631_s3 + $0x14] ss:$8 sps:$4 sm:$0xff]   ;;  %v460_v13 = vld [vmem:[%s631_s3 + $0x10] ss:$8 sps:$4 sm:$0xff]   ;;  %v461_v14 = vld [vmem:[%s631_s3 + $0x4] ss:$8 sps:$4 sm:$0xff]  }
   0x4   :  { %133 = vmatprep.subr.bf16.mxu0 %v455_v10  ;;  %v463_v15 = vld [vmem:[%s631_s3] ss:$8 sps:$4 sm:$0xff]   ;;  %v465_v27 = vld [vmem:[%s634_s5 + $0x38] sm:$0xff]   ;;  %429 = vmatprep.subr.bf16.mxu1 %v464_v26  ;;  %v466_v28 = vld [vmem:[%s634_s5 + $0x70] sm:$0xff]   ;;  %v71_v43 = vshrl.u32 %v70_v42, 7 }
   0x5   :  { %v401_v20 = vld [vmem:[%s632_s1] ss:$0 sm:$0xff]  ;;  %430 = vmatpush3.bf16.msra.mxu1 %v465_v27  ;;  %v467_v29 = vld [vmem:[%s634_s5 + $0x30] sm:$0xff]   ;;  %v468_v30 = vld [vmem:[%s634_s5 + $0x68] sm:$0xff]  }
   0x6   :  { %v402_v22 = vld [vmem:[%s633_s2] ss:$0 sm:$0xff]  ;;  %431 = vmatprep.subr.bf16.mxu1 %v466_v28  ;;  %v469_v31 = vld [vmem:[%s634_s5 + $0x28] sm:$0xff]   ;;  %v472_v34 = vld [vmem:[%s634_s5 + $0x58] sm:$0xff]   ;;  %v72_v44 = vsub.s32 0, %v71_v43  ;;  %v76_v46 = vsub.s32 1, %v71_v43 }
   0x7   :  { %134 = vmatpush1.bf16.msra.mxu0 %v457_v11  ;;  %v470_v32 = vld [vmem:[%s634_s5 + $0x60] sm:$0xff]   ;;  %v473_v35 = vld [vmem:[%s634_s5 + $0x18] sm:$0xff]   ;;  %v474_v36 = vld [vmem:[%s634_s5 + $0x50] sm:$0xff]  }
   0x8   :  { %135 = vmatprep.subr.bf16.mxu0 %v458_v12  ;;  %v471_v33 = vld [vmem:[%s634_s5 + $0x20] sm:$0xff]   ;;  %v475_v37 = vld [vmem:[%s634_s5 + $0x10] sm:$0xff]   ;;  %v476_v38 = vld [vmem:[%s634_s5 + $0x48] sm:$0xff]  }
   0x9   :  { %432 = vmatpush3.bf16.msra.mxu1 %v467_v29  ;;  %v477_v39 = vld [vmem:[%s634_s5 + $0x8] sm:$0xff]   ;;  %v478_v40 = vld [vmem:[%s634_s5 + $0x40] sm:$0xff]  }
   0xa   :  { %433 = vmatprep.subr.bf16.mxu1 %v468_v30  ;;  %v479_v41 = vld [vmem:[%s634_s5] sm:$0xff]  }
   0xb   :  { %136 = vmatpush1.bf16.msra.mxu0 %v460_v13  ;;  %v68_v45 = vld [vmem:[%s635_s4] sm:$0x3] }
   0xc   :  { %137 = vmatprep.subr.bf16.mxu0 %v461_v14  ;;  %v73_v47 = vrot.slane %v68_v45, %v72_v44  ;;  %v77_v48 = vrot.slane %v68_v45, %v76_v46  ;;  %v412_v45 = vld [vmem:[%s636_s6] ss:$0 sm:$0xff] }
   0xd   :  { %434 = vmatpush3.bf16.msra.mxu1 %v469_v31 }
   0xe   :  { %435 = vmatprep.subr.bf16.mxu1 %v470_v32 }
   0xf   :  { %138 = vmatpush1.bf16.msra.mxu0 %v463_v15 }
  0x11   :  { %436 = vmatpush3.bf16.msra.mxu1 %v471_v33 }
  0x12   :  { %437 = vmatprep.subr.bf16.mxu1 %v472_v34 }
  0x15   :  { %438 = vmatpush3.bf16.msra.mxu1 %v473_v35 }
  0x16   :  { %439 = vmatprep.subr.bf16.mxu1 %v474_v36 }
  0x19   :  { %440 = vmatpush3.bf16.msra.mxu1 %v475_v37 }
  0x1a   :  { %441 = vmatprep.subr.bf16.mxu1 %v476_v38 }
  0x1d   :  { %442 = vmatpush3.bf16.msra.mxu1 %v477_v39 }
  0x1e   :  { %443 = vmatprep.subr.bf16.mxu1 %v478_v40 }
  0x21   :  { %444 = vmatpush3.bf16.msra.mxu1 %v479_v41 }
  0x8c   :  { %v33_v2 = vpop.xlane.xlu0 %32 }
  0x8d   :  { %v35_v3 = vmul.f32 0.015625, %v33_v2 }
  0x8f   :  { %v36_v4 = vsub.f32 %v534_v0, %v35_v3 }
  0x91   :  { %v37_v5 = vmul.f32 %v36_v4, %v36_v4 }
  0x93   :  { %v38_v6 = vsel %vm30_vm0, %v37_v5, 0.0 }
  0x94   :  { %39 = vadd.xlane.f32.xlu0 %v38_v6 }
 0x11d   :  { %v40_v16 = vpop.xlane.xlu0 %39 }
 0x11e   :  { %v41_v17 = vmul.f32 0.015625, %v40_v16 }
 0x120   :  { %v42_v18 = vadd.f32 1e-05, %v41_v17 }
 0x122   :  { %480 = vrsqrt.f32 %v42_v18 }
 0x12f   :  { %v481_v19 = vpop.eup %480 }
 0x130   :  { %v44_v21 = vmul.f32 %v481_v19, %v36_v4 }
 0x132   :  { %v51_v23 = vmul.f32 %v401_v20, %v44_v21 }
 0x134   :  { %v58_v24 = vadd.f32 %v402_v22, %v51_v23 }
 0x136   :  { %v67_v25 = vpack.c.bf16 %v58_v24, %v58_v24 }
 0x138   :  { %411 = vmatmul.mubr.msk.bf16.vlgmr.msra.gmra.mxu0 %vm30_vm0, %v67_v25 }
 0x1f8   :  { %v157_v49 = vpop.f32.mrf.mxu0 }
 0x1f9   :  { %v158_v50 = vadd.f32 %v157_v49, %v73_v47 }
 0x1fa   :  { %v159_v51 = vpop.f32.mrf.mxu0 }
 0x1fb   :  { %v166_v52 = vmul.f32 0.70710677, %v158_v50  ;;  %v160_v53 = vadd.f32 %v159_v51, %v77_v48  ;;  %v164_v36 = vmul.f32 0.5, %v158_v50 }
 0x1fc   :  { %v161_v54 = vpop.f32.mrf.mxu0 }
 0x1fd   :  { %v168_v55 = vand.u32 2147483647, %v166_v52  ;;  %v167_v56 = vmul.f32 0.70710677, %v160_v53  ;;  %vm208_vm1 = vcmp.lt.f32.partialorder %v166_v52, 0.0  ;;  %v165_v38 = vmul.f32 0.5, %v160_v53 }
 0x1fe   :  { %v162_v57 = vpop.f32.mrf.mxu0 }
 0x1ff   :  { %v170_v58 = vmul.f32 0.3275911, %v168_v55  ;;  %v169_v59 = vand.u32 2147483647, %v167_v56  ;;  %v196_v63 = vsub.f32 0.0, %v168_v55  ;;  %vm209_vm2 = vcmp.lt.f32.partialorder %v167_v56, 0.0 }
 0x201   :  { %v172_v60 = vadd.f32 1.0, %v170_v58  ;;  %v171_v61 = vmul.f32 0.3275911, %v169_v59  ;;  %v197_v1 = vsub.f32 0.0, %v169_v59  ;;  %v198_v2 = vmul.f32 %v196_v63, %v168_v55 }
 0x203   :  { %482 = vrcp.f32 %v172_v60  ;;  %v173_v62 = vadd.f32 1.0, %v171_v61  ;;  %v199_v4 = vmul.f32 %v197_v1, %v169_v59  ;;  %v200_v5 = vmul.f32 1.442695, %v198_v2 }
 0x205   :  { %484 = vrcp.f32 %v173_v62  ;;  %v202_v9 = vmul.f32 1.442695, %v199_v4 }
 0x206   :  { %486 = vpow2.f32 %v200_v5 }
 0x207   :  { %488 = vpow2.f32 %v202_v9 }
 0x210   :  { %v483_v3 = vpop.eup %482 }
 0x211   :  { %v178_v6 = vmul.f32 1.0614054, %v483_v3 }
 0x212   :  { %v485_v7 = vpop.eup %484 }
 0x213   :  { %v180_v8 = vadd.f32 -1.4531521, %v178_v6  ;;  %v179_v10 = vmul.f32 1.0614054, %v485_v7  ;;  %v487_v24 = vpop.eup %486 }
 0x214   :  { %v489_v28 = vpop.eup %488 }
 0x215   :  { %v182_v11 = vmul.f32 %v483_v3, %v180_v8  ;;  %v181_v12 = vadd.f32 -1.4531521, %v179_v10 }
 0x217   :  { %v184_v13 = vadd.f32 1.4214138, %v182_v11  ;;  %v183_v14 = vmul.f32 %v485_v7, %v181_v12 }
 0x219   :  { %v186_v15 = vmul.f32 %v483_v3, %v184_v13  ;;  %v185_v16 = vadd.f32 1.4214138, %v183_v14 }
 0x21b   :  { %v188_v17 = vadd.f32 -0.28449672, %v186_v15  ;;  %v187_v18 = vmul.f32 %v485_v7, %v185_v16 }
 0x21d   :  { %v190_v19 = vmul.f32 %v483_v3, %v188_v17  ;;  %v189_v20 = vadd.f32 -0.28449672, %v187_v18 }
 0x21f   :  { %v192_v21 = vadd.f32 0.2548296, %v190_v19  ;;  %v191_v22 = vmul.f32 %v485_v7, %v189_v20 }
 0x221   :  { %v194_v23 = vmul.f32 %v483_v3, %v192_v21  ;;  %v193_v25 = vadd.f32 0.2548296, %v191_v22 }
 0x223   :  { %v204_v26 = vmul.f32 %v487_v24, %v194_v23  ;;  %v195_v27 = vmul.f32 %v485_v7, %v193_v25 }
 0x225   :  { %v206_v29 = vsub.f32 1.0, %v204_v26  ;;  %v205_v30 = vmul.f32 %v489_v28, %v195_v27 }
 0x227   :  { %v210_v31 = vsub.f32 0.0, %v206_v29  ;;  %v207_v32 = vsub.f32 1.0, %v205_v30 }
 0x229   :  { %v212_v33 = vsel %vm208_vm1, %v210_v31, %v206_v29  ;;  %v211_v34 = vsub.f32 0.0, %v207_v32 }
 0x22a   :  { %v214_v35 = vadd.f32 1.0, %v212_v33 }
 0x22b   :  { %v213_v37 = vsel %vm209_vm2, %v211_v34, %v207_v32 }
 0x22c   :  { %v215_v39 = vadd.f32 1.0, %v213_v37  ;;  %v216_v40 = vmul.f32 %v214_v35, %v164_v36 }
 0x22e   :  { %v217_v41 = vmul.f32 %v215_v39, %v165_v38  ;;  %v250_v43 = vpack.c.bf16 %v216_v40, %v216_v40 }
 0x230   :  { %v251_v42 = vpack.c.bf16 %v217_v41, %v217_v41 }
 0x232   :  { %387 = vmatprep.mubr.bf16.mxu1 %v251_v42 }
 0x233   :  { %388 = vmatmul.mubr.bf16.vlgmr.msra.gmra.mxu1 %v250_v43 }
 0x2f3   :  { %v445_v44 = vpop.f32.mrf.mxu1 }
 0x2f5   :  { %v446_v46 = vpop.f32.mrf.mxu1 }
 0x2f6   :  { %v447_v47 = vadd.f32 %v446_v46, %v445_v44 }
 0x2f7   :  { %v448_v48 = vpop.f32.mrf.mxu1 }
 0x2f8   :  { %v390_v49 = vadd.f32 %v447_v47, %v412_v45 }
 0x2f9   :  { %v449_v51 = vpop.f32.mrf.mxu1 }
 0x2fa   :  { %v395_v50 = vadd.f32 %v390_v49, %v534_v0 }
 0x2fc   :  { %396 = vst.msk [vmem:[%s637_s7] sm:$0xff] %vm30_vm0, %v395_v50 }

// kernel: _lambda_.16
= control target key start
LH: loop header
LB: loop body
LE: loop exit
PB: predicated region body
PF: predicated region fallthrough
CT: control target
= control target key end

     0   :  { %vm36_vm0 = vcmask 523264   ;;  %v1486_v8 = vmov 0   ;;  %v76_v26 = vlaneseq  ;;  %v1487_v31 = vmov 0.0   ;;  %s1491_s12 = smov 48   ;;  %s1492_s14 = smov 32   ;;  %s1800_s0 = inlined_call_operand.vmem [shape: f32[8,64], index: 0, kind: input, shape index: {}]   ;;  %s1801_s3 = inlined_call_operand.vmem [shape: bf16[64,192], index: 3, kind: input, shape index: {}]   ;;  %s1802_s1 = inlined_call_operand.vmem [shape: f32[1,64], index: 1, kind: input, shape index: {}]   ;;  %s1803_s2 = inlined_call_operand.vmem [shape: f32[1,64], index: 2, kind: input, shape index: {}, may-alias: {2,8}]   ;;  %s1804_s4 = inlined_call_operand.vmem [shape: f32[1,192], index: 4, kind: input, shape index: {}]   ;;  %s1805_s5 = inlined_call_operand.vmem [shape: f32[4,4,4], index: 5, kind: input, shape index: {}]   ;;  %s1806_s6 = inlined_call_operand.vmem [shape: f32[1,4,4], index: 6, kind: input, shape index: {}]   ;;  %s1807_s7 = inlined_call_operand.vmem [shape: bf16[64,64], index: 7, kind: input, shape index: {}]   ;;  %s1808_s8 = inlined_call_operand.vmem [shape: f32[1,64], index: 8, kind: input, shape index: {}, may-alias: {2,8}]   ;;  %s1809_s9 = inlined_call_operand.vmem [shape: f32[8,64], index: 9, kind: output, shape index: {}]  }
   0x1   :  { %v1549_v0 = vld [vmem:[%s1800_s0] sm:$0xff]  ;;  %v1435_v7 = vld [vmem:[%s1801_s3 + $0x34] ss:$8 sps:$4 sm:$0xff]   ;;  %161 = vmatprep.mubr.bf16.mxu0 %v1486_v8  ;;  %v1437_v9 = vld [vmem:[%s1801_s3 + $0x30] ss:$8 sps:$4 sm:$0xff]   ;;  %1302 = vmatprep.subr.bf16.mxu1 %v1487_v31  ;;  %vm1488_vm1 = vmmov 0  }
   0x2   :  { %v37_v1 = vsel %vm36_vm0, %v1549_v0, 0.0  ;;  %137 = vmatprep.subr.bf16.mxu0 %v1435_v7  ;;  %v1438_v10 = vld [vmem:[%s1801_s3 + $0x24] ss:$8 sps:$4 sm:$0xff]   ;;  %v1440_v11 = vld [vmem:[%s1801_s3 + $0x20] ss:$8 sps:$4 sm:$0xff]   ;;  %v77_v27 = vshrl.u32 %v76_v26, 7  ;;  %1304 = vmatprep.mubr.msk.bf16.mxu1 %vm1488_vm1, %v1487_v31 }
   0x3   :  { %38 = vadd.xlane.f32.xlu0 %v37_v1  ;;  %138 = vmatpush1.bf16.msra.mxu0 %v1437_v9  ;;  %v1441_v12 = vld [vmem:[%s1801_s3 + $0x14] ss:$8 sps:$4 sm:$0xff]   ;;  %v1443_v13 = vld [vmem:[%s1801_s3 + $0x10] ss:$8 sps:$4 sm:$0xff]   ;;  %v1444_v14 = vld [vmem:[%s1801_s3 + $0x4] ss:$8 sps:$4 sm:$0xff]  }
   0x4   :  { %139 = vmatprep.subr.bf16.mxu0 %v1438_v10  ;;  %v1446_v15 = vld [vmem:[%s1801_s3] ss:$8 sps:$4 sm:$0xff]   ;;  %v78_v28 = vsub.s32 0, %v77_v27  ;;  %v82_v29 = vsub.s32 1, %v77_v27  ;;  %vm187_vm2 = vcmask 130048   ;;  %vm320_vm3 = vcmask 1041408  }
   0x5   :  { %v1227_v20 = vld [vmem:[%s1802_s1] ss:$0 sm:$0xff]  ;;  %s1489_s1 = smov 64   ;;  %vm285_vm4 = vcmask 27648   ;;  %vm316_vm5 = vcmask 31744   ;;  %vm410_vm6 = vcmask 125952  }
   0x6   :  { %v1228_v22 = vld [vmem:[%s1803_s2] ss:$0 sm:$0xff]  ;;  %s1493_s15 = smov 96   ;;  %s1494_s18 = smov 16   ;;  %vm651_vm7 = vcmask 257152   ;;  %vm890_vm8 = vcmask 388352  }
   0x7   :  { %140 = vmatpush1.bf16.msra.mxu0 %v1440_v11  ;;  %v74_v30 = vld [vmem:[%s1804_s4] sm:$0x3]  ;;  %s1495_s19 = smov 80   ;;  %vm1129_vm9 = vcmask 519552  }
   0x8   :  { %141 = vmatprep.subr.bf16.mxu0 %v1441_v12  ;;  %v79_v32 = vrot.slane %v74_v30, %v78_v28  ;;  %v83_v33 = vrot.slane %v74_v30, %v82_v29  ;;  %v183_v57 = vld [vmem:[%s1805_s5] sm:$0xf] }
   0x9   :  { %v1630_v59 = vld [vmem:[%s1806_s6] sm:$0xf]  ;;  %s1490_s6 = smov 112  }
   0xb   :  { %142 = vmatpush1.bf16.msra.mxu0 %v1443_v13 }
   0xc   :  { %143 = vmatprep.subr.bf16.mxu0 %v1444_v14 }
   0xf   :  { %144 = vmatpush1.bf16.msra.mxu0 %v1446_v15 }
  0x10   :  { %1326 = vmatprep.subr.bf16.mxu0 %v1487_v31 }
  0x8c   :  { %v39_v2 = vpop.xlane.xlu0 %38 }
  0x8d   :  { %v41_v3 = vmul.f32 0.015625, %v39_v2 }
  0x8f   :  { %v42_v4 = vsub.f32 %v1549_v0, %v41_v3 }
  0x91   :  { %v43_v5 = vmul.f32 %v42_v4, %v42_v4 }
  0x93   :  { %v44_v6 = vsel %vm36_vm0, %v43_v5, 0.0 }
  0x94   :  { %45 = vadd.xlane.f32.xlu0 %v44_v6 }
 0x11d   :  { %v46_v16 = vpop.xlane.xlu0 %45 }
 0x11e   :  { %v47_v17 = vmul.f32 0.015625, %v46_v16 }
 0x120   :  { %v48_v18 = vadd.f32 1e-05, %v47_v17 }
 0x122   :  { %1452 = vrsqrt.f32 %v48_v18 }
 0x12f   :  { %v1453_v19 = vpop.eup %1452 }
 0x130   :  { %v50_v21 = vmul.f32 %v1453_v19, %v42_v4 }
 0x132   :  { %v57_v23 = vmul.f32 %v1227_v20, %v50_v21 }
 0x134   :  { %v64_v24 = vadd.f32 %v1228_v22, %v57_v23 }
 0x136   :  { %v73_v25 = vpack.c.bf16 %v64_v24, %v64_v24 }
 0x138   :  { %1237 = vmatmul.mubr.msk.bf16.vlgmr.msra.gmra.mxu0 %vm36_vm0, %v73_v25 }
 0x139   :  { %1328 = vmatprep.mubr.msk.bf16.mxu0 %vm1488_vm1, %v1487_v31 }
 0x1f8   :  { %v163_v34 = vpop.f32.mrf.mxu0 }
 0x1f9   :  { %v164_v36 = vadd.f32 %v163_v34, %v79_v32 }
 0x1fa   :  { %v165_v35 = vpop.f32.mrf.mxu0 }
 0x1fb   :  { %v166_v37 = vadd.f32 %v165_v35, %v83_v33 }
 0x1fc   :  { %v167_v38 = vpop.f32.mrf.mxu0 }
 0x1fd   :  { %v172_v39 = vcombine.low %v164_v36, %v166_v37  ;;  %v1240_v40 = vcombine.low %v166_v37, %v166_v37  ;;  %v1595_v41 = vcombine.high %v166_v37, %v166_v37  ;;  %v173_v43 = vcombine.high %v164_v36, %v166_v37  ;;  %v1244_v37 = vld [vmem:[%s1805_s5 + $0x4] sm:$0xf] }
 0x1fe   :  { %v168_v42 = vpop.f32.mrf.mxu0 }
 0x1ff   :  { %v1597_v44 = vpack.c.bf16 %v172_v39, %v172_v39  ;;  %v1600_v45 = vpack.i.bf16 %v1595_v41, %v1240_v40  ;;  %v1603_v46 = vpack.c.bf16 %v173_v43, %v173_v43  ;;  %v177_v49 = vmul.f32 0.25, %v172_v39 }
 0x200   :  { %v178_v53 = vmul.f32 0.25, %v173_v43  ;;  %v314_v54 = vpack.c.bf16 %v1240_v40, %v1240_v40  ;;  %v315_v26 = vpack.c.bf16 %v1595_v41, %v1595_v41 }
 0x201   :  { %185 = vrot.lane.b32.xlu1 %v1597_v44, %s1489_s1  ;;  %v1608_v51 = vpack.c.bf16 %v177_v49, %v177_v49 }
 0x202   :  { %v1616_v55 = vpack.c.bf16 %v178_v53, %v178_v53  ;;  %v322_v56 = vsel %vm320_vm3, %v314_v54, 0  ;;  %v368_v28 = vsel %vm320_vm3, %v315_v26, 0 }
 0x205   :  { %235 = vrot.lane.b32.xlu1 %v1603_v46, %s1489_s1 }
 0x273   :  { %v186_v47 = vpop.permute.xlu1 %185 }
 0x274   :  { %v192_v48 = vsel %vm187_vm2, %v186_v47, 0 }
 0x275   :  { %1303 = vmatpush3.bf16.xpose.msra.mxu1 %v192_v48 }
 0x276   :  { %1308 = vmatprep.subr.bf16.mxu1 %v1487_v31 }
 0x277   :  { %v236_v50 = vpop.permute.xlu1 %235 }
 0x278   :  { %v241_v52 = vsel %vm187_vm2, %v236_v50, 0 }
 0x27c   :  { %1305 = vmatmul.mubr.msk.bf16.vlgmr.msra.gmra.mxu1 %vm187_vm2, %v1608_v51 }
 0x27d   :  { %1309 = vmatpush3.bf16.xpose.msra.mxu1 %v241_v52  ;;  %1310 = vmatprep.mubr.msk.bf16.mxu1 %vm1488_vm1, %v1487_v31 }
 0x27e   :  { %1314 = vmatprep.subr.bf16.mxu1 %v1487_v31 }
 0x284   :  { %1311 = vmatmul.mubr.msk.bf16.vlgmr.msra.gmra.mxu1 %vm187_vm2, %v1616_v55 }
 0x285   :  { %1315 = vmatpush3.bf16.msra.mxu1 %v322_v56  ;;  %1316 = vmatprep.mubr.msk.bf16.mxu1 %vm1488_vm1, %v1487_v31 }
 0x286   :  { %1320 = vmatprep.subr.bf16.mxu1 %v1487_v31 }
 0x33c   :  { %v228_v58 = vpop.f32.mrf.mxu1 }
 0x33d   :  { %v229_v60 = vadd.f32 %v228_v58, %v183_v57 }
 0x33e   :  { %v1306_v61 = vpop.f32.mrf.mxu1 }
 0x33f   :  { %v283_v62 = vadd.f32 %v229_v60, %v1630_v59 }
 0x340   :  { %v231_v63 = vpop.f32.mrf.mxu1 }
 0x341   :  { %v286_v1 = vsel %vm285_vm4, %v283_v62, -inf }
 0x342   :  { %287 = vmax.xlane.f32.xlu0 %v286_v1  ;;  %v1307_v2 = vpop.f32.mrf.mxu1 }
 0x344   :  { %v277_v3 = vpop.f32.mrf.mxu1 }
 0x345   :  { %v278_v4 = vadd.f32 %v277_v3, %v183_v57 }
 0x346   :  { %v1312_v5 = vpop.f32.mrf.mxu1 }
 0x347   :  { %v284_v6 = vadd.f32 %v278_v4, %v1630_v59 }
 0x348   :  { %v280_v7 = vpop.f32.mrf.mxu1 }
 0x349   :  { %v289_v8 = vsel %vm285_vm4, %v284_v6, -inf }
 0x34a   :  { %290 = vmax.xlane.f32.xlu1 %v289_v8  ;;  %v1313_v9 = vpop.f32.mrf.mxu1 }
 0x35b   :  { %416 = vrot.lane.b32.xlu1 %v1608_v51, %s1490_s6 }
 0x3cb   :  { %v288_v10 = vpop.xlane.xlu0 %287 }
 0x3cc   :  { %v292_v11 = vsub.f32 %v283_v62, %v288_v10 }
 0x3ce   :  { %v294_v12 = vmul.f32 1.442695, %v292_v11 }
 0x3d0   :  { %1454 = vpow2.f32 %v294_v12 }
 0x3d3   :  { %v291_v15 = vpop.xlane.xlu1 %290 }
 0x3d4   :  { %v293_v16 = vsub.f32 %v284_v6, %v291_v15 }
 0x3d6   :  { %v296_v17 = vmul.f32 1.442695, %v293_v16 }
 0x3d7   :  { %v417_v23 = vpop.permute.xlu1 %416 }
 0x3d8   :  { %1456 = vpow2.f32 %v296_v17 }
 0x3dd   :  { %v1455_v13 = vpop.eup %1454 }
 0x3de   :  { %v298_v14 = vsel %vm285_vm4, %v1455_v13, 0.0 }
 0x3df   :  { %299 = vadd.xlane.f32.xlu0 %v298_v14 }
 0x3e5   :  { %v1457_v18 = vpop.eup %1456 }
 0x3e6   :  { %v301_v19 = vsel %vm285_vm4, %v1457_v18, 0.0 }
 0x3f5   :  { %418 = vrot.lane.b32.xlu0 %v1597_v44, %s1491_s12 }
 0x414   :  { %302 = vadd.xlane.f32.xlu0 %v301_v19 }
 0x42a   :  { %469 = vrot.lane.b32.xlu0 %v1603_v46, %s1491_s12 }
 0x42e   :  { %467 = vrot.lane.b32.xlu0 %v1616_v55, %s1490_s6 }
 0x468   :  { %v300_v20 = vpop.xlane.xlu0 %299 }
 0x469   :  { %1458 = vrcp.f32 %v300_v20 }
 0x46c   :  { %v419_v21 = vpop.permute.xlu0 %418 }
 0x46d   :  { %v424_v22 = vsel %vm187_vm2, %v419_v21, 0 }
 0x46e   :  { %1327 = vmatpush3.bf16.xpose.msra.mxu0 %v424_v22 }
 0x46f   :  { %1338 = vmatprep.subr.bf16.mxu0 %v1487_v31 }
 0x475   :  { %1329 = vmatmul.mubr.msk.bf16.vlgmr.msra.gmra.mxu0 %vm187_vm2, %v417_v23 }
 0x476   :  { %v1459_v24 = vpop.eup %1458  ;;  %1340 = vmatprep.mubr.msk.bf16.mxu0 %vm1488_vm1, %v1487_v31 }
 0x477   :  { %v306_v25 = vmul.f32 %v1459_v24, %v1455_v13 }
 0x479   :  { %v308_v27 = vpack.c.bf16 %v306_v25, %v306_v25 }
 0x47b   :  { %1317 = vmatmul.mubr.msk.bf16.vlgmr.msra.gmra.mxu1 %vm316_vm5, %v308_v27 }
 0x47c   :  { %1321 = vmatpush3.bf16.msra.mxu1 %v368_v28  ;;  %1322 = vmatprep.mubr.msk.bf16.mxu1 %vm1488_vm1, %v1487_v31 }
 0x47d   :  { %1332 = vmatprep.subr.bf16.mxu1 %v1487_v31 }
 0x49d   :  { %v303_v29 = vpop.xlane.xlu0 %302 }
 0x49e   :  { %1460 = vrcp.f32 %v303_v29 }
 0x4a1   :  { %v470_v33 = vpop.permute.xlu0 %469 }
 0x4a2   :  { %v475_v35 = vsel %vm187_vm2, %v470_v33, 0 }
 0x4a5   :  { %v468_v36 = vpop.permute.xlu0 %467 }
 0x4ab   :  { %v1461_v30 = vpop.eup %1460 }
 0x4ac   :  { %v307_v32 = vmul.f32 %v1461_v30, %v1457_v18 }
 0x4ae   :  { %v309_v34 = vpack.c.bf16 %v307_v32, %v307_v32 }
 0x4b0   :  { %1323 = vmatmul.mubr.msk.bf16.vlgmr.msra.gmra.mxu1 %vm316_vm5, %v309_v34 }
 0x4b1   :  { %1333 = vmatpush3.bf16.xpose.msra.mxu1 %v475_v35  ;;  %1334 = vmatprep.mubr.msk.bf16.mxu1 %vm1488_vm1, %v1487_v31 }
 0x4b2   :  { %1344 = vmatprep.subr.bf16.mxu1 %v1487_v31 }
 0x4b8   :  { %1335 = vmatmul.mubr.msk.bf16.vlgmr.msra.gmra.mxu1 %vm187_vm2, %v468_v36 }
 0x4b9   :  { %1346 = vmatprep.mubr.msk.bf16.mxu1 %vm1488_vm1, %v1487_v31 }
 0x535   :  { %v460_v38 = vpop.f32.mrf.mxu0 }
 0x536   :  { %v461_v39 = vadd.f32 %v1244_v37, %v460_v38 }
 0x537   :  { %v1330_v40 = vpop.f32.mrf.mxu0 }
 0x538   :  { %v517_v41 = vadd.f32 %v461_v39, %v1630_v59  ;;  %v1249_v39 = vld [vmem:[%s1805_s5 + $0x8] sm:$0xf] }
 0x539   :  { %v463_v42 = vpop.f32.mrf.mxu0 }
 0x53a   :  { %v519_v43 = vsel %vm285_vm4, %v517_v41, -inf }
 0x53b   :  { %520 = vmax.xlane.f32.xlu0 %v519_v43  ;;  %v358_v47 = vpop.f32.mrf.mxu1  ;;  %v1331_v48 = vpop.f32.mrf.mxu0 }
 0x53c   :  { %411 = vst.msk [vmem:[#allocation2] sm:$0xf] %vm410_vm6, %v358_v47 }
 0x53d   :  { %v1318_v49 = vpop.f32.mrf.mxu1 }
 0x53f   :  { %v361_v50 = vpop.f32.mrf.mxu1 }
 0x541   :  { %v1319_v52 = vpop.f32.mrf.mxu1 }
 0x570   :  { %v404_v53 = vpop.f32.mrf.mxu1 }
 0x571   :  { %412 = vst.msk [vmem:[#allocation2 + $0x4] sm:$0xf] %vm410_vm6, %v404_v53 }
 0x572   :  { %v1324_v54 = vpop.f32.mrf.mxu1 }
 0x574   :  { %v407_v56 = vpop.f32.mrf.mxu1 }
 0x576   :  { %v1325_v57 = vpop.f32.mrf.mxu1 }
 0x578   :  { %v511_v58 = vpop.f32.mrf.mxu1 }
 0x579   :  { %v512_v60 = vadd.f32 %v1244_v37, %v511_v58 }
 0x57a   :  { %v1336_v61 = vpop.f32.mrf.mxu1 }
 0x57b   :  { %v518_v62 = vadd.f32 %v512_v60, %v1630_v59 }
 0x57c   :  { %v514_v63 = vpop.f32.mrf.mxu1 }
 0x57d   :  { %v522_v1 = vsel %vm285_vm4, %v518_v62, -inf }
 0x57e   :  { %523 = vmax.xlane.f32.xlu1 %v522_v1  ;;  %v1337_v2 = vpop.f32.mrf.mxu1 }
 0x58f   :  { %658 = vrot.lane.b32.xlu1 %v1597_v44, %s1492_s14 }
 0x593   :  { %656 = vrot.lane.b32.xlu1 %v1608_v51, %s1493_s15 }
 0x5c4   :  { %v521_v3 = vpop.xlane.xlu0 %520 }
 0x5c5   :  { %v525_v4 = vsub.f32 %v517_v41, %v521_v3 }
 0x5c7   :  { %v527_v5 = vmul.f32 1.442695, %v525_v4 }
 0x5c9   :  { %1462 = vpow2.f32 %v527_v5 }
 0x5d6   :  { %v1463_v6 = vpop.eup %1462 }
 0x5d7   :  { %v531_v7 = vsel %vm285_vm4, %v1463_v6, 0.0 }
 0x5d8   :  { %532 = vadd.xlane.f32.xlu0 %v531_v7 }
 0x5ee   :  { %1421 = vrot.lane.b32.xlu0 %v1600_v45, %s1490_s6 }
 0x607   :  { %v524_v8 = vpop.xlane.xlu1 %523 }
 0x608   :  { %v526_v9 = vsub.f32 %v518_v62, %v524_v8 }
 0x60a   :  { %v529_v10 = vmul.f32 1.442695, %v526_v9 }
 0x60b   :  { %v659_v23 = vpop.permute.xlu1 %658 }
 0x60c   :  { %1464 = vpow2.f32 %v529_v10  ;;  %v664_v25 = vsel %vm187_vm2, %v659_v23, 0 }
 0x60f   :  { %v657_v26 = vpop.permute.xlu1 %656 }
 0x619   :  { %v1465_v11 = vpop.eup %1464 }
 0x61a   :  { %v534_v12 = vsel %vm285_vm4, %v1465_v11, 0.0 }
 0x61b   :  { %535 = vadd.xlane.f32.xlu0 %v534_v12 }
 0x631   :  { %708 = vrot.lane.b32.xlu0 %v1603_v46, %s1492_s14 }
 0x635   :  { %706 = vrot.lane.b32.xlu0 %v1616_v55, %s1493_s15 }
 0x661   :  { %v533_v13 = vpop.xlane.xlu0 %532 }
 0x662   :  { %1466 = vrcp.f32 %v533_v13 }
 0x665   :  { %v1422_v14 = vpop.permute.xlu0 %1421 }
 0x666   :  { %v1424_v15 = vunpack.i.h.bf16 %v1422_v14  ;;  %v1423_v16 = vunpack.i.l.bf16 %v1422_v14 }
 0x668   :  { %v550_v17 = vpack.c.bf16 %v1424_v15, %v1424_v15  ;;  %v549_v18 = vpack.c.bf16 %v1423_v16, %v1423_v16 }
 0x66a   :  { %v555_v19 = vsel %vm320_vm3, %v549_v18, 0  ;;  %v601_v20 = vsel %vm320_vm3, %v550_v17, 0 }
 0x66b   :  { %1339 = vmatpush3.bf16.msra.mxu0 %v555_v19  ;;  %1345 = vmatpush3.bf16.msra.mxu1 %v601_v20 }
 0x66c   :  { %1350 = vmatprep.subr.bf16.mxu0 %v1487_v31  ;;  %1356 = vmatprep.subr.bf16.mxu1 %v1487_v31 }
 0x66f   :  { %v1467_v21 = vpop.eup %1466 }
 0x670   :  { %v539_v22 = vmul.f32 %v1467_v21, %v1463_v6 }
 0x672   :  { %v541_v24 = vpack.c.bf16 %v539_v22, %v539_v22 }
 0x674   :  { %1341 = vmatmul.mubr.msk.bf16.vlgmr.msra.gmra.mxu0 %vm316_vm5, %v541_v24 }
 0x675   :  { %1351 = vmatpush3.bf16.xpose.msra.mxu0 %v664_v25  ;;  %1352 = vmatprep.mubr.msk.bf16.mxu0 %vm1488_vm1, %v1487_v31 }
 0x676   :  { %1362 = vmatprep.subr.bf16.mxu0 %v1487_v31 }
 0x67c   :  { %1353 = vmatmul.mubr.msk.bf16.vlgmr.msra.gmra.mxu0 %vm187_vm2, %v657_v26 }
 0x67d   :  { %1364 = vmatprep.mubr.msk.bf16.mxu0 %vm1488_vm1, %v1487_v31 }
 0x6a4   :  { %v536_v27 = vpop.xlane.xlu0 %535 }
 0x6a5   :  { %1468 = vrcp.f32 %v536_v27 }
 0x6a8   :  { %v709_v30 = vpop.permute.xlu0 %708 }
 0x6a9   :  { %v714_v33 = vsel %vm187_vm2, %v709_v30, 0 }
 0x6ac   :  { %v707_v34 = vpop.permute.xlu0 %706 }
 0x6b2   :  { %v1469_v28 = vpop.eup %1468 }
 0x6b3   :  { %v540_v29 = vmul.f32 %v1469_v28, %v1465_v11 }
 0x6b5   :  { %v542_v32 = vpack.c.bf16 %v540_v29, %v540_v29 }
 0x6b7   :  { %1347 = vmatmul.mubr.msk.bf16.vlgmr.msra.gmra.mxu1 %vm316_vm5, %v542_v32 }
 0x6b8   :  { %1357 = vmatpush3.bf16.xpose.msra.mxu1 %v714_v33  ;;  %1358 = vmatprep.mubr.msk.bf16.mxu1 %vm1488_vm1, %v1487_v31  ;;  %v1254_v33 = vld [vmem:[%s1805_s5 + $0xc] sm:$0xf] }
 0x6b9   :  { %1368 = vmatprep.subr.bf16.mxu1 %v1487_v31 }
 0x6bf   :  { %1359 = vmatmul.mubr.msk.bf16.vlgmr.msra.gmra.mxu1 %vm187_vm2, %v707_v34 }
 0x6c0   :  { %1370 = vmatprep.mubr.msk.bf16.mxu1 %vm1488_vm1, %v1487_v31 }
 0x734   :  { %v1705_v35 = vpop.f32.mrf.mxu0 }
 0x736   :  { %v1342_v36 = vpop.f32.mrf.mxu0 }
 0x738   :  { %v594_v37 = vpop.f32.mrf.mxu0 }
 0x73a   :  { %v1343_v38 = vpop.f32.mrf.mxu0 }
 0x73c   :  { %v700_v40 = vpop.f32.mrf.mxu0 }
 0x73d   :  { %v701_v41 = vadd.f32 %v1249_v39, %v700_v40 }
 0x73e   :  { %v1354_v42 = vpop.f32.mrf.mxu0 }
 0x73f   :  { %v756_v43 = vadd.f32 %v701_v41, %v1630_v59 }
 0x740   :  { %v703_v47 = vpop.f32.mrf.mxu0 }
 0x741   :  { %v758_v48 = vsel %vm285_vm4, %v756_v43, -inf }
 0x742   :  { %759 = vmax.xlane.f32.xlu1 %v758_v48  ;;  %v1355_v49 = vpop.f32.mrf.mxu0 }
 0x753   :  { %1426 = vrot.lane.b32.xlu1 %v1600_v45, %s1493_s15 }
 0x757   :  { %947 = vrot.lane.b32.xlu1 %v1603_v46, %s1494_s18 }
 0x75b   :  { %895 = vrot.lane.b32.xlu1 %v1608_v51, %s1495_s19 }
 0x75f   :  { %945 = vrot.lane.b32.xlu1 %v1616_v55, %s1495_s19 }
 0x777   :  { %v1720_v50 = vpop.f32.mrf.mxu1 }
 0x779   :  { %v1348_v52 = vpop.f32.mrf.mxu1 }
 0x77b   :  { %v640_v53 = vpop.f32.mrf.mxu1 }
 0x77d   :  { %v1349_v54 = vpop.f32.mrf.mxu1 }
 0x77f   :  { %v750_v56 = vpop.f32.mrf.mxu1 }
 0x780   :  { %v751_v57 = vadd.f32 %v1249_v39, %v750_v56 }
 0x781   :  { %v1360_v58 = vpop.f32.mrf.mxu1 }
 0x782   :  { %v757_v60 = vadd.f32 %v751_v57, %v1630_v59 }
 0x783   :  { %v753_v61 = vpop.f32.mrf.mxu1 }
 0x784   :  { %v761_v46 = vsel %vm285_vm4, %v757_v60, -inf }
 0x785   :  { %762 = vmax.xlane.f32.xlu0 %v761_v46  ;;  %v1361_v62 = vpop.f32.mrf.mxu1 }
 0x7cb   :  { %v760_v63 = vpop.xlane.xlu1 %759 }
 0x7cc   :  { %v764_v51 = vsub.f32 %v756_v43, %v760_v63 }
 0x7ce   :  { %v766_v1 = vmul.f32 1.442695, %v764_v51 }
 0x7cf   :  { %v1427_v2 = vpop.permute.xlu1 %1426 }
 0x7d0   :  { %1470 = vpow2.f32 %v766_v1  ;;  %v1429_v55 = vunpack.i.h.bf16 %v1427_v2  ;;  %v1428_v3 = vunpack.i.l.bf16 %v1427_v2 }
 0x7d2   :  { %v789_v4 = vpack.c.bf16 %v1429_v55, %v1429_v55  ;;  %v788_v5 = vpack.c.bf16 %v1428_v3, %v1428_v3 }
 0x7d3   :  { %v948_v22 = vpop.permute.xlu1 %947 }
 0x7d4   :  { %v794_v6 = vsel %vm320_vm3, %v788_v5, 0  ;;  %v840_v7 = vsel %vm320_vm3, %v789_v4, 0  ;;  %v953_v26 = vsel %vm187_vm2, %v948_v22, 0 }
 0x7d5   :  { %1363 = vmatpush3.bf16.msra.mxu0 %v794_v6  ;;  %1369 = vmatpush3.bf16.msra.mxu1 %v840_v7 }
 0x7d6   :  { %1374 = vmatprep.subr.bf16.mxu0 %v1487_v31  ;;  %1380 = vmatprep.subr.bf16.mxu1 %v1487_v31 }
 0x7dd   :  { %v1471_v8 = vpop.eup %1470 }
 0x7de   :  { %v770_v9 = vsel %vm285_vm4, %v1471_v8, 0.0 }
 0x7df   :  { %771 = vadd.xlane.f32.xlu0 %v770_v9 }
 0x80e   :  { %v763_v10 = vpop.xlane.xlu0 %762 }
 0x80f   :  { %v765_v11 = vsub.f32 %v757_v60, %v763_v10 }
 0x811   :  { %v768_v12 = vmul.f32 1.442695, %v765_v11 }
 0x813   :  { %1472 = vpow2.f32 %v768_v12 }
 0x820   :  { %v1473_v13 = vpop.eup %1472 }
 0x821   :  { %v773_v14 = vsel %vm285_vm4, %v1473_v13, 0.0 }
 0x822   :  { %774 = vadd.xlane.f32.xlu0 %v773_v14 }
 0x838   :  { %897 = vrot.lane.b32.xlu0 %v1597_v44, %s1494_s18  ;;  %v896_v44 = vpop.permute.xlu1 %895 }
 0x83c   :  { %v946_v27 = vpop.permute.xlu1 %945 }
 0x868   :  { %v772_v15 = vpop.xlane.xlu0 %771 }
 0x869   :  { %1474 = vrcp.f32 %v772_v15 }
 0x876   :  { %v1475_v16 = vpop.eup %1474 }
 0x877   :  { %v778_v17 = vmul.f32 %v1475_v16, %v1471_v8 }
 0x879   :  { %v780_v18 = vpack.c.bf16 %v778_v17, %v778_v17 }
 0x87b   :  { %1365 = vmatmul.mubr.msk.bf16.vlgmr.msra.gmra.mxu0 %vm316_vm5, %v780_v18 }
 0x87c   :  { %1376 = vmatprep.mubr.msk.bf16.mxu0 %vm1488_vm1, %v1487_v31 }
 0x8ab   :  { %v775_v19 = vpop.xlane.xlu0 %774 }
 0x8ac   :  { %1476 = vrcp.f32 %v775_v19  ;;  %v1447_v19 = vld [vmem:[%s1807_s7 + $0x18] sm:$0xff]  }
 0x8af   :  { %v898_v20 = vpop.permute.xlu0 %897 }
 0x8b0   :  { %v903_v21 = vsel %vm187_vm2, %v898_v20, 0  ;;  %v1448_v20 = vld [vmem:[%s1807_s7 + $0x10] sm:$0xff]  }
 0x8b1   :  { %1375 = vmatpush3.bf16.xpose.msra.mxu0 %v903_v21  ;;  %v1449_v21 = vld [vmem:[%s1807_s7 + $0x8] sm:$0xff]  }
 0x8b2   :  { %1386 = vmatprep.subr.bf16.mxu0 %v1487_v31 }
 0x8b8   :  { %1377 = vmatmul.mubr.msk.bf16.vlgmr.msra.gmra.mxu0 %vm187_vm2, %v896_v44  ;;  %v1450_v44 = vld [vmem:[%s1807_s7] sm:$0xff]  }
 0x8b9   :  { %v1477_v23 = vpop.eup %1476  ;;  %1388 = vmatprep.mubr.msk.bf16.mxu0 %vm1488_vm1, %v1487_v31 }
 0x8ba   :  { %v779_v24 = vmul.f32 %v1477_v23, %v1473_v13 }
 0x8bc   :  { %v781_v25 = vpack.c.bf16 %v779_v24, %v779_v24 }
 0x8be   :  { %1371 = vmatmul.mubr.msk.bf16.vlgmr.msra.gmra.mxu1 %vm316_vm5, %v781_v25 }
 0x8bf   :  { %1381 = vmatpush3.bf16.xpose.msra.mxu1 %v953_v26  ;;  %1382 = vmatprep.mubr.msk.bf16.mxu1 %vm1488_vm1, %v1487_v31 }
 0x8c0   :  { %1392 = vmatprep.subr.bf16.mxu1 %v1487_v31 }
 0x8c6   :  { %1383 = vmatmul.mubr.msk.bf16.vlgmr.msra.gmra.mxu1 %vm187_vm2, %v946_v27 }
 0x8c7   :  { %1394 = vmatprep.mubr.msk.bf16.mxu1 %vm1488_vm1, %v1487_v31 }
 0x93b   :  { %v830_v28 = vpop.f32.mrf.mxu0 }
 0x93d   :  { %v1366_v29 = vpop.f32.mrf.mxu0 }
 0x93f   :  { %v833_v30 = vpop.f32.mrf.mxu0 }
 0x941   :  { %v1367_v32 = vpop.f32.mrf.mxu0 }
 0x978   :  { %v939_v34 = vpop.f32.mrf.mxu0 }
 0x979   :  { %v940_v36 = vadd.f32 %v1254_v33, %v939_v34 }
 0x97a   :  { %v1378_v37 = vpop.f32.mrf.mxu0 }
 0x97b   :  { %v995_v38 = vadd.f32 %v940_v36, %v1630_v59 }
 0x97c   :  { %v942_v39 = vpop.f32.mrf.mxu0 }
 0x97d   :  { %v997_v40 = vsel %vm285_vm4, %v995_v38, -inf }
 0x97e   :  { %998 = vmax.xlane.f32.xlu0 %v997_v40  ;;  %v876_v41 = vpop.f32.mrf.mxu1  ;;  %v1379_v42 = vpop.f32.mrf.mxu0 }
 0x980   :  { %v1372_v43 = vpop.f32.mrf.mxu1 }
 0x982   :  { %v879_v47 = vpop.f32.mrf.mxu1 }
 0x984   :  { %v1373_v48 = vpop.f32.mrf.mxu1 }
 0x986   :  { %v989_v49 = vpop.f32.mrf.mxu1 }
 0x987   :  { %v990_v52 = vadd.f32 %v1254_v33, %v989_v49 }
 0x988   :  { %v1384_v53 = vpop.f32.mrf.mxu1 }
 0x989   :  { %v996_v54 = vadd.f32 %v990_v52, %v1630_v59 }
 0x98a   :  { %v992_v56 = vpop.f32.mrf.mxu1 }
 0x98b   :  { %v1000_v57 = vsel %vm285_vm4, %v996_v54, -inf }
 0x98c   :  { %1001 = vmax.xlane.f32.xlu1 %v1000_v57  ;;  %v1385_v58 = vpop.f32.mrf.mxu1 }
 0x99d   :  { %645 = vrot.lane.b32.xlu1 %v1705_v35, %s1494_s18 }
 0x9a1   :  { %647 = vrot.lane.b32.xlu1 %v1720_v50, %s1494_s18 }
 0x9a5   :  { %884 = vrot.lane.b32.xlu1 %v830_v28, %s1492_s14 }
 0xa07   :  { %v999_v60 = vpop.xlane.xlu0 %998 }
 0xa08   :  { %v1003_v61 = vsub.f32 %v995_v38, %v999_v60 }
 0xa0a   :  { %v1005_v46 = vmul.f32 1.442695, %v1003_v61 }
 0xa0c   :  { %1478 = vpow2.f32 %v1005_v46 }
 0xa15   :  { %v1002_v62 = vpop.xlane.xlu1 %1001 }
 0xa16   :  { %v1004_v63 = vsub.f32 %v996_v54, %v1002_v62 }
 0xa18   :  { %v1007_v59 = vmul.f32 1.442695, %v1004_v63 }
 0xa19   :  { %v1479_v51 = vpop.eup %1478  ;;  %v646_v1 = vpop.permute.xlu1 %645 }
 0xa1a   :  { %1480 = vpow2.f32 %v1007_v59  ;;  %652 = vst.msk [vmem:[#allocation2] sm:$0xf] %vm651_vm7, %v646_v1  ;;  %v1009_v2 = vsel %vm285_vm4, %v1479_v51, 0.0 }
 0xa1b   :  { %1010 = vadd.xlane.f32.xlu0 %v1009_v2 }
 0xa1d   :  { %v648_v35 = vpop.permute.xlu1 %647 }
 0xa1e   :  { %653 = vst.msk [vmem:[#allocation2 + $0x4] sm:$0xf] %vm651_vm7, %v648_v35 }
 0xa21   :  { %v885_v50 = vpop.permute.xlu1 %884 }
 0xa22   :  { %891 = vst.msk [vmem:[#allocation2] sm:$0xf] %vm890_vm8, %v885_v50 }
 0xa27   :  { %v1481_v55 = vpop.eup %1480 }
 0xa28   :  { %v1012_v3 = vsel %vm285_vm4, %v1481_v55, 0.0 }
 0xa29   :  { %1013 = vadd.xlane.f32.xlu0 %v1012_v3 }
 0xa3f   :  { %1431 = vrot.lane.b32.xlu0 %v1600_v45, %s1495_s19 }
 0xa43   :  { %886 = vrot.lane.b32.xlu0 %v876_v41, %s1492_s14 }
 0xaa4   :  { %v1011_v4 = vpop.xlane.xlu0 %1010 }
 0xaa5   :  { %1482 = vrcp.f32 %v1011_v4 }
 0xab2   :  { %v1014_v5 = vpop.xlane.xlu0 %1013  ;;  %v1483_v6 = vpop.eup %1482 }
 0xab3   :  { %1484 = vrcp.f32 %v1014_v5  ;;  %v1017_v12 = vmul.f32 %v1483_v6, %v1479_v51 }
 0xab5   :  { %v1019_v15 = vpack.c.bf16 %v1017_v12, %v1017_v12 }
 0xab6   :  { %v1432_v7 = vpop.permute.xlu0 %1431 }
 0xab7   :  { %v1434_v8 = vunpack.i.h.bf16 %v1432_v7  ;;  %v1433_v9 = vunpack.i.l.bf16 %v1432_v7 }
 0xab9   :  { %v1028_v10 = vpack.c.bf16 %v1434_v8, %v1434_v8  ;;  %v1027_v11 = vpack.c.bf16 %v1433_v9, %v1433_v9 }
 0xaba   :  { %v887_v13 = vpop.permute.xlu0 %886 }
 0xabb   :  { %892 = vst.msk [vmem:[#allocation2 + $0x4] sm:$0xf] %vm890_vm8, %v887_v13  ;;  %v1033_v14 = vsel %vm320_vm3, %v1027_v11, 0  ;;  %v1079_v45 = vsel %vm320_vm3, %v1028_v10, 0 }
 0xabc   :  { %1387 = vmatpush3.bf16.msra.mxu0 %v1033_v14  ;;  %1393 = vmatpush3.bf16.msra.mxu1 %v1079_v45 }
 0xabd   :  { %1398 = vmatprep.subr.bf16.mxu0 %v1487_v31 }
 0xabf   :  { %1389 = vmatmul.mubr.msk.bf16.vlgmr.msra.gmra.mxu0 %vm316_vm5, %v1019_v15 }
 0xac0   :  { %v1485_v16 = vpop.eup %1484  ;;  %1406 = vmatprep.mubr.msk.bf16.mxu0 %vm1488_vm1, %v1487_v31  ;;  %1399 = vmatpush3.bf16.msra.mxu0 %v1447_v19 }
 0xac1   :  { %v1018_v17 = vmul.f32 %v1485_v16, %v1481_v55  ;;  %1400 = vmatprep.subr.bf16.mxu0 %v1487_v31 }
 0xac3   :  { %v1020_v18 = vpack.c.bf16 %v1018_v17, %v1018_v17 }
 0xac4   :  { %1401 = vmatpush3.bf16.msra.mxu0 %v1448_v20 }
 0xac5   :  { %1395 = vmatmul.mubr.msk.bf16.vlgmr.msra.gmra.mxu1 %vm316_vm5, %v1020_v18  ;;  %1402 = vmatprep.subr.bf16.mxu0 %v1487_v31 }
 0xac8   :  { %1403 = vmatpush3.bf16.msra.mxu0 %v1449_v21 }
 0xac9   :  { %1404 = vmatprep.subr.bf16.mxu0 %v1487_v31  ;;  %v1259_v31 = vld [vmem:[%s1808_s8] ss:$0 sm:$0xff] }
 0xacc   :  { %1405 = vmatpush3.bf16.msra.mxu0 %v1450_v44 }
 0xb7f   :  { %v1069_v22 = vpop.f32.mrf.mxu0 }
 0xb80   :  { %1123 = vrot.lane.b32.xlu1 %v1069_v22, %s1491_s12 }
 0xb81   :  { %v1390_v23 = vpop.f32.mrf.mxu0 }
 0xb83   :  { %v1072_v24 = vpop.f32.mrf.mxu0 }
 0xb85   :  { %v1391_v25 = vpop.f32.mrf.mxu0  ;;  %v1115_v26 = vpop.f32.mrf.mxu1 }
 0xb86   :  { %1125 = vrot.lane.b32.xlu0 %v1115_v26, %s1491_s12 }
 0xb87   :  { %v1396_v27 = vpop.f32.mrf.mxu1 }
 0xb89   :  { %v1118_v28 = vpop.f32.mrf.mxu1 }
 0xb8b   :  { %v1397_v29 = vpop.f32.mrf.mxu1 }
 0xbf2   :  { %v1124_v30 = vpop.permute.xlu1 %1123 }
 0xbf3   :  { %1130 = vst.msk [vmem:[#allocation2] sm:$0xf] %vm1129_vm9, %v1124_v30 }
 0xbf8   :  { %v1126_v32 = vpop.permute.xlu0 %1125 }
 0xbf9   :  { %1131 = vst.msk [vmem:[#allocation2 + $0x4] sm:$0xf] %vm1129_vm9, %v1126_v32 }
 0xc00   :  { %v1451_v33 = vld [vmem:[#allocation2] sm:$0xff]  }
 0xc01   :  { %v1146_v34 = vpack.c.bf16 %v1451_v33, %v1451_v33 }
 0xc03   :  { %1407 = vmatmul.mubr.msk.bf16.vlgmr.msra.gmra.mxu0 %vm36_vm0, %v1146_v34 }
 0xcc3   :  { %v1215_v36 = vpop.f32.mrf.mxu0 }
 0xcc4   :  { %v1216_v37 = vadd.f32 %v1259_v31, %v1215_v36 }
 0xcc5   :  { %v1408_v38 = vpop.f32.mrf.mxu0 }
 0xcc6   :  { %v1221_v39 = vadd.f32 %v1216_v37, %v1549_v0 }
 0xcc7   :  { %v1218_v40 = vpop.f32.mrf.mxu0 }
 0xcc8   :  { %1222 = vst.msk [vmem:[%s1809_s9] sm:$0xff] %vm36_vm0, %v1221_v39 }
 0xcc9   :  { %v1409_v41 = vpop.f32.mrf.mxu0 }

</bundles_post_ra>
